<compile_context>
chip_gen: v7x
topology: tpu7x:2x2x1
jax: 0.10.0
libtpu: 0.0.40
codegen_flags: <defaults>
</compile_context>

<pallas_src>
import jax
import jax.numpy as jnp
from jax.experimental import pallas as pl
from jax.experimental.pallas import tpu as pltpu

_VMEM_LIMIT_BYTES = 32 * 1024 * 1024


# ---------------------------------------------------------------------------
# Fused conv + BN-bias (+residual) (+ReLU) Pallas kernel
# ---------------------------------------------------------------------------
def _make_conv_kernel(taps, th, wo, cin, relu, has_residual):
    """Kernel factory.

    taps: tuple of (phase_index, qi, qj) static offsets -- one per conv tap.
    For one (batch element, output row band, Cout tile) the kernel:
      1. gathers the shifted (th, wo, cin) windows of the phase-decomposed
         input into a VMEM im2col scratch (th, wo, ntaps*cin)  [VMEM-local],
      2. runs ONE deep-K matmul (M=th*wo, K=ntaps*cin, N=tn) on the MXU with
         f32 accumulation,
      3. fused epilogue: + BN bias (+ residual) (+ ReLU), bf16 store in the
         flat (M, tn) layout.
    """
    band_m = th * wo
    ntaps = len(taps)
    k_total = ntaps * cin

    def kernel(x_ref, w_ref, b_ref, *rest):
        if has_residual:
            r_ref, o_ref, patch_ref = rest
        else:
            o_ref, patch_ref = rest

        row0 = pl.multiple_of(pl.program_id(1) * th, th)

        # Fused im2col into VMEM scratch (concat happens only in VMEM; the
        # HBM-side image is still read ~1x via the resident decomposed block).
        for t, (p, qi, qj) in enumerate(taps):
            patch_ref[:, :, t * cin:(t + 1) * cin] = (
                x_ref[0, p, pl.ds(row0 + qi, th), qj:qj + wo, :])

        # Single deep-K MXU matmul, f32 accumulation.
        y = jnp.dot(patch_ref[...].reshape(band_m, k_total), w_ref[...],
                    preferred_element_type=jnp.float32)

        y = y + b_ref[...]                                   # (M,tn) + (1,tn)
        if has_residual:
            y = y + r_ref[0].astype(jnp.float32)
        if relu:
            y = jnp.maximum(y, 0.0)
        o_ref[0] = y.astype(o_ref.dtype)

    return kernel


def _phase_decompose(xp, kh, kw, stride, ho, wo):
    """Split the padded NHWC input into stride-phase planes so that every conv
    tap becomes a contiguous (ho, wo) window with a small static offset.
    Total size of all planes ~= size of the padded input (1x, not kh*kw x)."""
    hd = ho + (kh - 1) // stride
    wd = wo + (kw - 1) // stride
    phases, taps = [], []
    for di in range(kh):
        for dj in range(kw):
            ph = (di % stride, dj % stride)
            if ph not in phases:
                phases.append(ph)
            taps.append((phases.index(ph), di // stride, dj // stride))
    # Every tap window must fit inside the (hd, wd) plane.
    for (_, qi, qj) in taps:
        assert qi + ho <= hd and qj + wo <= wd, (qi, qj, ho, wo, hd, wd)
    planes = []
    for (ri, rj) in phases:
        pln = xp[:, ri::stride, rj::stride, :][:, :hd, :wd, :]
        dh, dw = hd - pln.shape[1], wd - pln.shape[2]
        if dh or dw:                                  # never read, but keep dense
            pln = jnp.pad(pln, ((0, 0), (0, dh), (0, dw), (0, 0)))
        planes.append(pln)
    xd = planes[0][:, None] if len(planes) == 1 else jnp.stack(planes, axis=1)
    return xd, taps, hd, wd                           # xd: (N, nph, hd, wd, Cin)


def _pick_band_rows(ho, wo, target_m=2048):
    """Largest divisor th of ho whose band M = th*wo stays <= target_m and is
    sublane-aligned (multiple of 8) unless it is the full extent."""
    for th in range(ho, 0, -1):
        if ho % th:
            continue
        m = th * wo
        if m <= target_m and (th == ho or m % 8 == 0):
            return th
    return ho


def conv_bn_act(x, w_flat, bias, *, ksize, stride, pad, relu, residual=None):
    """x: (N,H,W,Cin) bf16 NHWC.  w_flat: (kh*kw*Cin, Cout) bf16 with the BN
    scale already folded in.  bias: (1, Cout) f32.  Returns (N,Ho,Wo,Cout) bf16."""
    n, h, w, cin = x.shape
    kh = kw = ksize
    k_total, cout = w_flat.shape
    assert k_total == kh * kw * cin
    ho = (h + 2 * pad - kh) // stride + 1
    wo = (w + 2 * pad - kw) // stride + 1
    if pad:
        x = jnp.pad(x, ((0, 0), (pad, pad), (pad, pad), (0, 0)))
    xd, taps, hd, wd = _phase_decompose(x, kh, kw, stride, ho, wo)
    nph = xd.shape[1]

    # Cout tile: full Cout when it fits, else 256 (multiple of 128).
    tn = cout if cout <= 256 else 256
    assert cout % tn == 0
    nct = cout // tn

    # Output-row band (spatial tiling): bounds the patch scratch / out block.
    th = _pick_band_rows(ho, wo)
    nrb = ho // th
    m, band_m = ho * wo, th * wo

    kernel = _make_conv_kernel(tuple(taps), th, wo, cin, relu,
                               residual is not None)

    in_specs = [
        # Whole phase-decomposed image per batch element; the block index only
        # depends on the batch axis, so it is DMA'd once per image and reused
        # across row bands and Cout tiles.
        pl.BlockSpec((1, nph, hd, wd, cin), lambda i, r, j: (i, 0, 0, 0, 0)),
        pl.BlockSpec((k_total, tn), lambda i, r, j: (0, j)),
        pl.BlockSpec((1, tn), lambda i, r, j: (0, j)),
    ]
    args = [xd, w_flat, bias]
    if residual is not None:
        args.append(residual.reshape(n, m, cout))
        in_specs.append(pl.BlockSpec((1, band_m, tn), lambda i, r, j: (i, r, j)))

    out = pl.pallas_call(
        kernel,
        out_shape=jax.ShapeDtypeStruct((n, m, cout), jnp.bfloat16),
        grid=(n, nrb, nct),
        in_specs=in_specs,
        out_specs=pl.BlockSpec((1, band_m, tn), lambda i, r, j: (i, r, j)),
        scratch_shapes=[pltpu.VMEM((th, wo, k_total), jnp.bfloat16)],
        compiler_params=pltpu.CompilerParams(
            dimension_semantics=("parallel", "parallel", "parallel"),
            vmem_limit_bytes=_VMEM_LIMIT_BYTES),
    )(*args)
    return out.reshape(n, ho, wo, cout)


# ---------------------------------------------------------------------------
# Parameter construction (deterministic, synthetic) + one-time kernel prep
# ---------------------------------------------------------------------------
def _conv_w(key, kh, kw, cin, cout):
    fan_in = kh * kw * cin
    return jax.random.normal(key, (kh, kw, cin, cout), jnp.float32) / jnp.sqrt(fan_in)


def _bn_affine(key, c, eps=1e-5):
    k1, k2 = jax.random.split(key)
    gamma = 1.0 + 0.1 * jax.random.normal(k1, (c,), jnp.float32)
    beta = 0.1 * jax.random.normal(k2, (c,), jnp.float32)
    mean = jnp.zeros((c,), jnp.float32)
    var = jnp.ones((c,), jnp.float32)
    scale = gamma / jnp.sqrt(var + eps)
    bias = beta - mean * scale
    return scale, bias


def _fold(w, scale):
    """Fold BN scale into the conv weights once; flatten to (kh*kw*Cin, Cout) bf16
    so the kernel does a single deep-K matmul (K index = tap*Cin + cin)."""
    kh, kw, cin, cout = w.shape
    wf = (w * scale[None, None, None, :]).reshape(kh * kw * cin, cout)
    return wf.astype(jnp.bfloat16)


def make_basic_block_params(key, inplanes, planes, stride=1, bn_eps=1e-5):
    """Returns (raw f32 params for the JAX reference, prepped params for the kernels)."""
    keys = jax.random.split(key, 6)
    w1 = _conv_w(keys[0], 3, 3, inplanes, planes)
    s1, b1 = _bn_affine(keys[1], planes, bn_eps)
    w2 = _conv_w(keys[2], 3, 3, planes, planes)
    s2, b2 = _bn_affine(keys[3], planes, bn_eps)
    raw = dict(stride=stride, w1=w1, s1=s1, b1=b1, w2=w2, s2=s2, b2=b2)
    prep = dict(stride=stride,
                w1=_fold(w1, s1), b1=b1.reshape(1, -1),
                w2=_fold(w2, s2), b2=b2.reshape(1, -1))
    if stride != 1 or inplanes != planes:            # expansion = 1
        wd = _conv_w(keys[4], 1, 1, inplanes, planes)
        sd, bd = _bn_affine(keys[5], planes, bn_eps)
        raw.update(wd=wd, sd=sd, bd=bd)
        prep.update(wd=_fold(wd, sd), bd=bd.reshape(1, -1))
    return raw, prep


# ---------------------------------------------------------------------------
# BasicBlock forward (matches the PyTorch module semantics, eval-mode BN)
# ---------------------------------------------------------------------------
def basic_block_forward(x, p):
    """x: NHWC bf16.  conv3x3-BN-ReLU -> conv3x3-BN (+identity) -> ReLU."""
    s = p["stride"]
    out = conv_bn_act(x, p["w1"], p["b1"], ksize=3, stride=s, pad=1, relu=True)
    if "wd" in p:       # downsample branch: 1x1 conv + BN
        identity = conv_bn_act(x, p["wd"], p["bd"], ksize=1, stride=s, pad=0,
                               relu=False)
    else:
        identity = x
    # conv2: BN bias + residual add + ReLU all fused into the GEMM epilogue.
    out = conv_bn_act(out, p["w2"], p["b2"], ksize=3, stride=1, pad=1,
                      relu=True, residual=identity)
    return out


def model_forward(block_params, x_nchw):
    """Public entry: NCHW f32 in / NCHW f32 out (PyTorch convention)."""
    x = jnp.transpose(x_nchw, (0, 2, 3, 1)).astype(jnp.bfloat16)
    for p in block_params:
        x = basic_block_forward(x, p)
    return jnp.transpose(x, (0, 3, 1, 2)).astype(jnp.float32)


# ---------------------------------------------------------------------------
# Pure-JAX f32 reference (for correctness check)
# ---------------------------------------------------------------------------
def _ref_conv(x, w, stride, pad):
    return jax.lax.conv_general_dilated(
        x, w, window_strides=(stride, stride),
        padding=[(pad, pad), (pad, pad)],
        dimension_numbers=("NHWC", "HWIO", "NHWC"))


def reference_forward(raw_params, x_nchw):
    x = jnp.transpose(x_nchw, (0, 2, 3, 1))
    for r in raw_params:
        s = r["stride"]
        out = _ref_conv(x, r["w1"], s, 1) * r["s1"] + r["b1"]
        out = jnp.maximum(out, 0.0)
        out = _ref_conv(out, r["w2"], 1, 1) * r["s2"] + r["b2"]
        identity = x
        if "wd" in r:
            identity = _ref_conv(x, r["wd"], s, 0) * r["sd"] + r["bd"]
        x = jnp.maximum(out + identity, 0.0)
    return jnp.transpose(x, (0, 3, 1, 2))


# ---------------------------------------------------------------------------
if __name__ == "__main__":
    key = jax.random.PRNGKey(0)
    kp1, kp2, kx = jax.random.split(key, 3)

    n, cin, h, w = 2, 16, 16, 16
    planes = 32

    # Block 1 exercises the downsample path (stride=2, channel change);
    # block 2 exercises the identity path (stride=1, same channels).
    raw1, prep1 = make_basic_block_params(kp1, cin, planes, stride=2)
    raw2, prep2 = make_basic_block_params(kp2, planes, planes, stride=1)
    x = jax.random.normal(kx, (n, cin, h, w), jnp.float32)     # NCHW

    fwd = jax.jit(lambda v: model_forward((prep1, prep2), v))
    out = jax.block_until_ready(fwd(x))

    assert out.shape == (n, planes, h // 2, w // 2), out.shape
    assert bool(jnp.all(jnp.isfinite(out)))

    ref = reference_forward((raw1, raw2), x)
    err = float(jnp.max(jnp.abs(out - ref)) / (jnp.max(jnp.abs(ref)) + 1e-6))
    assert err < 5e-2, f"mismatch vs reference: rel_err={err}"

    print("KERNEL_OK")
</pallas_src>

<mosaic_0001>
module attributes {stable_mosaic.version = 11 : i64} {
  func.func @kernel(%arg0: i32, %arg1: i32, %arg2: i32, %arg3: memref<1x1x8x8x16xbf16, #tpu.memory_space<vmem>>, %arg4: memref<16x32xbf16, #tpu.memory_space<vmem>>, %arg5: memref<1x32xf32, #tpu.memory_space<vmem>>, %arg6: memref<1x64x32xbf16, #tpu.memory_space<vmem>>, %arg7: memref<8x8x16xbf16, #tpu.memory_space<vmem>>) attributes {dimension_semantics = [#tpu.dimension_semantics<parallel>, #tpu.dimension_semantics<parallel>, #tpu.dimension_semantics<parallel>], iteration_bounds = array<i64: 2, 1, 1>, scalar_prefetch = 0 : i64, scratch_operands = 1 : i64, tpu.core_type = #tpu.core_type<tc>, window_params = [{transform_indices = @transform_0, window_bounds = array<i64: 1, 1, 8, 8, 16>}, {transform_indices = @transform_1, window_bounds = array<i64: 16, 32>}, {transform_indices = @transform_2, window_bounds = array<i64: 1, 32>}, {transform_indices = @transform_3, window_bounds = array<i64: 1, 64, 32>}]} {
    %c8_i32 = arith.constant 8 : i32
    %0 = arith.muli %arg1, %c8_i32 : i32
    %1 = tpu.assume_multiple %0, 8 : i32
    %c0_i32 = arith.constant 0 : i32
    %2 = arith.addi %1, %c0_i32 : i32
    %c0 = arith.constant 0 : index
    %c0_0 = arith.constant 0 : index
    %3 = arith.index_cast %2 : i32 to index
    %c0_1 = arith.constant 0 : index
    %c0_2 = arith.constant 0 : index
    %4 = vector.load %arg3[%c0, %c0_0, %3, %c0_1, %c0_2] : memref<1x1x8x8x16xbf16, #tpu.memory_space<vmem>>, vector<1x1x8x8x16xbf16>
    %5 = vector.shape_cast %4 : vector<1x1x8x8x16xbf16> to vector<8x8x16xbf16>
    %c0_3 = arith.constant 0 : index
    %c0_4 = arith.constant 0 : index
    %c0_5 = arith.constant 0 : index
    %6 = vector.load %arg7[%c0_3, %c0_4, %c0_5] : memref<8x8x16xbf16, #tpu.memory_space<vmem>>, vector<8x8x16xbf16>
    tpu.vector_store %arg7[%c0_3, %c0_4, %c0_5], %5 {strides = array<i32>} : memref<8x8x16xbf16, #tpu.memory_space<vmem>>, vector<8x8x16xbf16>,
    %c0_6 = arith.constant 0 : index
    %c0_7 = arith.constant 0 : index
    %c0_8 = arith.constant 0 : index
    %7 = vector.load %arg7[%c0_6, %c0_7, %c0_8] : memref<8x8x16xbf16, #tpu.memory_space<vmem>>, vector<8x8x16xbf16>
    %8 = vector.shape_cast %7 : vector<8x8x16xbf16> to vector<64x16xbf16>
    %c0_9 = arith.constant 0 : index
    %c0_10 = arith.constant 0 : index
    %9 = vector.load %arg4[%c0_9, %c0_10] : memref<16x32xbf16, #tpu.memory_space<vmem>>, vector<16x32xbf16>
    %cst = arith.constant dense<0.000000e+00> : vector<64x32xf32>
    %10 = tpu.matmul %8, %9, %cst {dimension_numbers = #tpu.dot_dimension_numbers<[1], [0], [0], [1], [0, 0, 1, 1], [], []>} : vector<64x16xbf16>, vector<16x32xbf16>, vector<64x32xf32> -> vector<64x32xf32>
    %c0_11 = arith.constant 0 : index
    %c0_12 = arith.constant 0 : index
    %11 = vector.load %arg5[%c0_11, %c0_12] : memref<1x32xf32, #tpu.memory_space<vmem>>, vector<1x32xf32>
    %12 = vector.broadcast %11 : vector<1x32xf32> to vector<64x32xf32>
    %13 = arith.addf %10, %12 : vector<64x32xf32>
    %14 = arith.truncf %13 : vector<64x32xf32> to vector<64x32xbf16>
    %c0_13 = arith.constant 0 : index
    %c0_14 = arith.constant 0 : index
    %c0_15 = arith.constant 0 : index
    %15 = vector.load %arg6[%c0_13, %c0_14, %c0_15] : memref<1x64x32xbf16, #tpu.memory_space<vmem>>, vector<1x64x32xbf16>
    %16 = vector.shape_cast %15 : vector<1x64x32xbf16> to vector<64x32xbf16>
    %17 = vector.shape_cast %14 : vector<64x32xbf16> to vector<1x64x32xbf16>
    tpu.vector_store %arg6[%c0_13, %c0_14, %c0_15], %17 {strides = array<i32>} : memref<1x64x32xbf16, #tpu.memory_space<vmem>>, vector<1x64x32xbf16>,
    return
  }
  func.func @transform_0(%arg0: i32, %arg1: i32, %arg2: i32) -> (i32, i32, i32, i32, i32) {
    %c0_i32 = arith.constant 0 : i32
    %c0_i32_0 = arith.constant 0 : i32
    %c0_i32_1 = arith.constant 0 : i32
    %c0_i32_2 = arith.constant 0 : i32
    %c0_i32_3 = arith.constant 0 : i32
    return %arg0, %c0_i32, %c0_i32_0, %c0_i32_1, %c0_i32_2 : i32, i32, i32, i32, i32
  }
  func.func @transform_1(%arg0: i32, %arg1: i32, %arg2: i32) -> (i32, i32) {
    %c0_i32 = arith.constant 0 : i32
    %c0_i32_0 = arith.constant 0 : i32
    return %c0_i32, %arg2 : i32, i32
  }
  func.func @transform_2(%arg0: i32, %arg1: i32, %arg2: i32) -> (i32, i32) {
    %c0_i32 = arith.constant 0 : i32
    %c0_i32_0 = arith.constant 0 : i32
    return %c0_i32, %arg2 : i32, i32
  }
  func.func @transform_3(%arg0: i32, %arg1: i32, %arg2: i32) -> (i32, i32, i32) {
    %c0_i32 = arith.constant 0 : i32
    return %arg0, %arg1, %arg2 : i32, i32, i32
  }
}

module attributes {stable_mosaic.version = 11 : i64} {
  func.func @kernel(%arg0: i32, %arg1: i32, %arg2: i32, %arg3: memref<1x4x9x9x16xbf16, #tpu.memory_space<vmem>>, %arg4: memref<144x32xbf16, #tpu.memory_space<vmem>>, %arg5: memref<1x32xf32, #tpu.memory_space<vmem>>, %arg6: memref<1x64x32xbf16, #tpu.memory_space<vmem>>, %arg7: memref<8x8x144xbf16, #tpu.memory_space<vmem>>) attributes {dimension_semantics = [#tpu.dimension_semantics<parallel>, #tpu.dimension_semantics<parallel>, #tpu.dimension_semantics<parallel>], iteration_bounds = array<i64: 2, 1, 1>, scalar_prefetch = 0 : i64, scratch_operands = 1 : i64, tpu.core_type = #tpu.core_type<tc>, window_params = [{transform_indices = @transform_0, window_bounds = array<i64: 1, 4, 9, 9, 16>}, {transform_indices = @transform_1, window_bounds = array<i64: 144, 32>}, {transform_indices = @transform_2, window_bounds = array<i64: 1, 32>}, {transform_indices = @transform_3, window_bounds = array<i64: 1, 64, 32>}]} {
    %c8_i32 = arith.constant 8 : i32
    %0 = arith.muli %arg1, %c8_i32 : i32
    %1 = tpu.assume_multiple %0, 8 : i32
    %c0_i32 = arith.constant 0 : i32
    %2 = arith.addi %1, %c0_i32 : i32
    %c0 = arith.constant 0 : index
    %c0_0 = arith.constant 0 : index
    %3 = arith.index_cast %2 : i32 to index
    %c0_1 = arith.constant 0 : index
    %c0_2 = arith.constant 0 : index
    %4 = vector.load %arg3[%c0, %c0_0, %3, %c0_1, %c0_2] : memref<1x4x9x9x16xbf16, #tpu.memory_space<vmem>>, vector<1x1x8x8x16xbf16>
    %5 = vector.shape_cast %4 : vector<1x1x8x8x16xbf16> to vector<8x8x16xbf16>
    %c0_3 = arith.constant 0 : index
    %c0_4 = arith.constant 0 : index
    %c0_5 = arith.constant 0 : index
    %6 = vector.load %arg7[%c0_3, %c0_4, %c0_5] : memref<8x8x144xbf16, #tpu.memory_space<vmem>>, vector<8x8x16xbf16>
    tpu.vector_store %arg7[%c0_3, %c0_4, %c0_5], %5 {strides = array<i32>} : memref<8x8x144xbf16, #tpu.memory_space<vmem>>, vector<8x8x16xbf16>,
    %c0_i32_6 = arith.constant 0 : i32
    %7 = arith.addi %1, %c0_i32_6 : i32
    %c0_7 = arith.constant 0 : index
    %c1 = arith.constant 1 : index
    %8 = arith.index_cast %7 : i32 to index
    %c0_8 = arith.constant 0 : index
    %c0_9 = arith.constant 0 : index
    %9 = vector.load %arg3[%c0_7, %c1, %8, %c0_8, %c0_9] : memref<1x4x9x9x16xbf16, #tpu.memory_space<vmem>>, vector<1x1x8x8x16xbf16>
    %10 = vector.shape_cast %9 : vector<1x1x8x8x16xbf16> to vector<8x8x16xbf16>
    %c0_10 = arith.constant 0 : index
    %c0_11 = arith.constant 0 : index
    %c16 = arith.constant 16 : index
    %11 = vector.load %arg7[%c0_10, %c0_11, %c16] : memref<8x8x144xbf16, #tpu.memory_space<vmem>>, vector<8x8x16xbf16>
    tpu.vector_store %arg7[%c0_10, %c0_11, %c16], %10 {strides = array<i32>} : memref<8x8x144xbf16, #tpu.memory_space<vmem>>, vector<8x8x16xbf16>,
    %c0_i32_12 = arith.constant 0 : i32
    %12 = arith.addi %1, %c0_i32_12 : i32
    %c0_13 = arith.constant 0 : index
    %c0_14 = arith.constant 0 : index
    %13 = arith.index_cast %12 : i32 to index
    %c1_15 = arith.constant 1 : index
    %c0_16 = arith.constant 0 : index
    %14 = vector.load %arg3[%c0_13, %c0_14, %13, %c1_15, %c0_16] : memref<1x4x9x9x16xbf16, #tpu.memory_space<vmem>>, vector<1x1x8x8x16xbf16>
    %15 = vector.shape_cast %14 : vector<1x1x8x8x16xbf16> to vector<8x8x16xbf16>
    %c0_17 = arith.constant 0 : index
    %c0_18 = arith.constant 0 : index
    %c32 = arith.constant 32 : index
    %16 = vector.load %arg7[%c0_17, %c0_18, %c32] : memref<8x8x144xbf16, #tpu.memory_space<vmem>>, vector<8x8x16xbf16>
    tpu.vector_store %arg7[%c0_17, %c0_18, %c32], %15 {strides = array<i32>} : memref<8x8x144xbf16, #tpu.memory_space<vmem>>, vector<8x8x16xbf16>,
    %c0_i32_19 = arith.constant 0 : i32
    %17 = arith.addi %1, %c0_i32_19 : i32
    %c0_20 = arith.constant 0 : index
    %c2 = arith.constant 2 : index
    %18 = arith.index_cast %17 : i32 to index
    %c0_21 = arith.constant 0 : index
    %c0_22 = arith.constant 0 : index
    %19 = vector.load %arg3[%c0_20, %c2, %18, %c0_21, %c0_22] : memref<1x4x9x9x16xbf16, #tpu.memory_space<vmem>>, vector<1x1x8x8x16xbf16>
    %20 = vector.shape_cast %19 : vector<1x1x8x8x16xbf16> to vector<8x8x16xbf16>
    %c0_23 = arith.constant 0 : index
    %c0_24 = arith.constant 0 : index
    %c48 = arith.constant 48 : index
    %21 = vector.load %arg7[%c0_23, %c0_24, %c48] : memref<8x8x144xbf16, #tpu.memory_space<vmem>>, vector<8x8x16xbf16>
    tpu.vector_store %arg7[%c0_23, %c0_24, %c48], %20 {strides = array<i32>} : memref<8x8x144xbf16, #tpu.memory_space<vmem>>, vector<8x8x16xbf16>,
    %c0_i32_25 = arith.constant 0 : i32
    %22 = arith.addi %1, %c0_i32_25 : i32
    %c0_26 = arith.constant 0 : index
    %c3 = arith.constant 3 : index
    %23 = arith.index_cast %22 : i32 to index
    %c0_27 = arith.constant 0 : index
    %c0_28 = arith.constant 0 : index
    %24 = vector.load %arg3[%c0_26, %c3, %23, %c0_27, %c0_28] : memref<1x4x9x9x16xbf16, #tpu.memory_space<vmem>>, vector<1x1x8x8x16xbf16>
    %25 = vector.shape_cast %24 : vector<1x1x8x8x16xbf16> to vector<8x8x16xbf16>
    %c0_29 = arith.constant 0 : index
    %c0_30 = arith.constant 0 : index
    %c64 = arith.constant 64 : index
    %26 = vector.load %arg7[%c0_29, %c0_30, %c64] : memref<8x8x144xbf16, #tpu.memory_space<vmem>>, vector<8x8x16xbf16>
    tpu.vector_store %arg7[%c0_29, %c0_30, %c64], %25 {strides = array<i32>} : memref<8x8x144xbf16, #tpu.memory_space<vmem>>, vector<8x8x16xbf16>,
    %c0_i32_31 = arith.constant 0 : i32
    %27 = arith.addi %1, %c0_i32_31 : i32
    %c0_32 = arith.constant 0 : index
    %c2_33 = arith.constant 2 : index
    %28 = arith.index_cast %27 : i32 to index
    %c1_34 = arith.constant 1 : index
    %c0_35 = arith.constant 0 : index
    %29 = vector.load %arg3[%c0_32, %c2_33, %28, %c1_34, %c0_35] : memref<1x4x9x9x16xbf16, #tpu.memory_space<vmem>>, vector<1x1x8x8x16xbf16>
    %30 = vector.shape_cast %29 : vector<1x1x8x8x16xbf16> to vector<8x8x16xbf16>
    %c0_36 = arith.constant 0 : index
    %c0_37 = arith.constant 0 : index
    %c80 = arith.constant 80 : index
    %31 = vector.load %arg7[%c0_36, %c0_37, %c80] : memref<8x8x144xbf16, #tpu.memory_space<vmem>>, vector<8x8x16xbf16>
    tpu.vector_store %arg7[%c0_36, %c0_37, %c80], %30 {strides = array<i32>} : memref<8x8x144xbf16, #tpu.memory_space<vmem>>, vector<8x8x16xbf16>,
    %c1_i32 = arith.constant 1 : i32
    %32 = arith.addi %1, %c1_i32 : i32
    %c0_38 = arith.constant 0 : index
    %c0_39 = arith.constant 0 : index
    %33 = arith.index_cast %32 : i32 to index
    %c0_40 = arith.constant 0 : index
    %c0_41 = arith.constant 0 : index
    %34 = vector.load %arg3[%c0_38, %c0_39, %33, %c0_40, %c0_41] : memref<1x4x9x9x16xbf16, #tpu.memory_space<vmem>>, vector<1x1x8x8x16xbf16>
    %35 = vector.shape_cast %34 : vector<1x1x8x8x16xbf16> to vector<8x8x16xbf16>
    %c0_42 = arith.constant 0 : index
    %c0_43 = arith.constant 0 : index
    %c96 = arith.constant 96 : index
    %36 = vector.load %arg7[%c0_42, %c0_43, %c96] : memref<8x8x144xbf16, #tpu.memory_space<vmem>>, vector<8x8x16xbf16>
    tpu.vector_store %arg7[%c0_42, %c0_43, %c96], %35 {strides = array<i32>} : memref<8x8x144xbf16, #tpu.memory_space<vmem>>, vector<8x8x16xbf16>,
    %c1_i32_44 = arith.constant 1 : i32
    %37 = arith.addi %1, %c1_i32_44 : i32
    %c0_45 = arith.constant 0 : index
    %c1_46 = arith.constant 1 : index
    %38 = arith.index_cast %37 : i32 to index
    %c0_47 = arith.constant 0 : index
    %c0_48 = arith.constant 0 : index
    %39 = vector.load %arg3[%c0_45, %c1_46, %38, %c0_47, %c0_48] : memref<1x4x9x9x16xbf16, #tpu.memory_space<vmem>>, vector<1x1x8x8x16xbf16>
    %40 = vector.shape_cast %39 : vector<1x1x8x8x16xbf16> to vector<8x8x16xbf16>
    %c0_49 = arith.constant 0 : index
    %c0_50 = arith.constant 0 : index
    %c112 = arith.constant 112 : index
    %41 = vector.load %arg7[%c0_49, %c0_50, %c112] : memref<8x8x144xbf16, #tpu.memory_space<vmem>>, vector<8x8x16xbf16>
    tpu.vector_store %arg7[%c0_49, %c0_50, %c112], %40 {strides = array<i32>} : memref<8x8x144xbf16, #tpu.memory_space<vmem>>, vector<8x8x16xbf16>,
    %c1_i32_51 = arith.constant 1 : i32
    %42 = arith.addi %1, %c1_i32_51 : i32
    %c0_52 = arith.constant 0 : index
    %c0_53 = arith.constant 0 : index
    %43 = arith.index_cast %42 : i32 to index
    %c1_54 = arith.constant 1 : index
    %c0_55 = arith.constant 0 : index
    %44 = vector.load %arg3[%c0_52, %c0_53, %43, %c1_54, %c0_55] : memref<1x4x9x9x16xbf16, #tpu.memory_space<vmem>>, vector<1x1x8x8x16xbf16>
    %45 = vector.shape_cast %44 : vector<1x1x8x8x16xbf16> to vector<8x8x16xbf16>
    %c0_56 = arith.constant 0 : index
    %c0_57 = arith.constant 0 : index
    %c128 = arith.constant 128 : index
    %46 = vector.load %arg7[%c0_56, %c0_57, %c128] : memref<8x8x144xbf16, #tpu.memory_space<vmem>>, vector<8x8x16xbf16>
    tpu.vector_store %arg7[%c0_56, %c0_57, %c128], %45 {strides = array<i32>} : memref<8x8x144xbf16, #tpu.memory_space<vmem>>, vector<8x8x16xbf16>,
    %c0_58 = arith.constant 0 : index
    %c0_59 = arith.constant 0 : index
    %c0_60 = arith.constant 0 : index
    %47 = vector.load %arg7[%c0_58, %c0_59, %c0_60] : memref<8x8x144xbf16, #tpu.memory_space<vmem>>, vector<8x8x144xbf16>
    %48 = vector.shape_cast %47 : vector<8x8x144xbf16> to vector<64x144xbf16>
    %c0_61 = arith.constant 0 : index
    %c0_62 = arith.constant 0 : index
    %49 = vector.load %arg4[%c0_61, %c0_62] : memref<144x32xbf16, #tpu.memory_space<vmem>>, vector<144x32xbf16>
    %cst = arith.constant dense<0.000000e+00> : vector<64x32xf32>
    %50 = tpu.matmul %48, %49, %cst {dimension_numbers = #tpu.dot_dimension_numbers<[1], [0], [0], [1], [0, 0, 1, 1], [], []>} : vector<64x144xbf16>, vector<144x32xbf16>, vector<64x32xf32> -> vector<64x32xf32>
    %c0_63 = arith.constant 0 : index
    %c0_64 = arith.constant 0 : index
    %51 = vector.load %arg5[%c0_63, %c0_64] : memref<1x32xf32, #tpu.memory_space<vmem>>, vector<1x32xf32>
    %52 = vector.broadcast %51 : vector<1x32xf32> to vector<64x32xf32>
    %53 = arith.addf %50, %52 : vector<64x32xf32>
    %cst_65 = arith.constant 0.000000e+00 : f32
    %54 = vector.broadcast %cst_65 : f32 to vector<64x32xf32>
    %55 = arith.maximumf %53, %54 : vector<64x32xf32>
    %56 = arith.truncf %55 : vector<64x32xf32> to vector<64x32xbf16>
    %c0_66 = arith.constant 0 : index
    %c0_67 = arith.constant 0 : index
    %c0_68 = arith.constant 0 : index
    %57 = vector.load %arg6[%c0_66, %c0_67, %c0_68] : memref<1x64x32xbf16, #tpu.memory_space<vmem>>, vector<1x64x32xbf16>
    %58 = vector.shape_cast %57 : vector<1x64x32xbf16> to vector<64x32xbf16>
    %59 = vector.shape_cast %56 : vector<64x32xbf16> to vector<1x64x32xbf16>
    tpu.vector_store %arg6[%c0_66, %c0_67, %c0_68], %59 {strides = array<i32>} : memref<1x64x32xbf16, #tpu.memory_space<vmem>>, vector<1x64x32xbf16>,
    return
  }
  func.func @transform_0(%arg0: i32, %arg1: i32, %arg2: i32) -> (i32, i32, i32, i32, i32) {
    %c0_i32 = arith.constant 0 : i32
    %c0_i32_0 = arith.constant 0 : i32
    %c0_i32_1 = arith.constant 0 : i32
    %c0_i32_2 = arith.constant 0 : i32
    %c0_i32_3 = arith.constant 0 : i32
    return %arg0, %c0_i32, %c0_i32_0, %c0_i32_1, %c0_i32_2 : i32, i32, i32, i32, i32
  }
  func.func @transform_1(%arg0: i32, %arg1: i32, %arg2: i32) -> (i32, i32) {
    %c0_i32 = arith.constant 0 : i32
    %c0_i32_0 = arith.constant 0 : i32
    return %c0_i32, %arg2 : i32, i32
  }
  func.func @transform_2(%arg0: i32, %arg1: i32, %arg2: i32) -> (i32, i32) {
    %c0_i32 = arith.constant 0 : i32
    %c0_i32_0 = arith.constant 0 : i32
    return %c0_i32, %arg2 : i32, i32
  }
  func.func @transform_3(%arg0: i32, %arg1: i32, %arg2: i32) -> (i32, i32, i32) {
    %c0_i32 = arith.constant 0 : i32
    return %arg0, %arg1, %arg2 : i32, i32, i32
  }
}

module attributes {stable_mosaic.version = 11 : i64} {
  func.func @kernel(%arg0: i32, %arg1: i32, %arg2: i32, %arg3: memref<1x1x10x10x32xbf16, #tpu.memory_space<vmem>>, %arg4: memref<288x32xbf16, #tpu.memory_space<vmem>>, %arg5: memref<1x32xf32, #tpu.memory_space<vmem>>, %arg6: memref<1x64x32xbf16, #tpu.memory_space<vmem>>, %arg7: memref<1x64x32xbf16, #tpu.memory_space<vmem>>, %arg8: memref<8x8x288xbf16, #tpu.memory_space<vmem>>) attributes {dimension_semantics = [#tpu.dimension_semantics<parallel>, #tpu.dimension_semantics<parallel>, #tpu.dimension_semantics<parallel>], iteration_bounds = array<i64: 2, 1, 1>, scalar_prefetch = 0 : i64, scratch_operands = 1 : i64, tpu.core_type = #tpu.core_type<tc>, window_params = [{transform_indices = @transform_0, window_bounds = array<i64: 1, 1, 10, 10, 32>}, {transform_indices = @transform_1, window_bounds = array<i64: 288, 32>}, {transform_indices = @transform_2, window_bounds = array<i64: 1, 32>}, {transform_indices = @transform_3, window_bounds = array<i64: 1, 64, 32>}, {transform_indices = @transform_4, window_bounds = array<i64: 1, 64, 32>}]} {
    %c8_i32 = arith.constant 8 : i32
    %0 = arith.muli %arg1, %c8_i32 : i32
    %1 = tpu.assume_multiple %0, 8 : i32
    %c0_i32 = arith.constant 0 : i32
    %2 = arith.addi %1, %c0_i32 : i32
    %c0 = arith.constant 0 : index
    %c0_0 = arith.constant 0 : index
    %3 = arith.index_cast %2 : i32 to index
    %c0_1 = arith.constant 0 : index
    %c0_2 = arith.constant 0 : index
    %4 = vector.load %arg3[%c0, %c0_0, %3, %c0_1, %c0_2] : memref<1x1x10x10x32xbf16, #tpu.memory_space<vmem>>, vector<1x1x8x8x32xbf16>
    %5 = vector.shape_cast %4 : vector<1x1x8x8x32xbf16> to vector<8x8x32xbf16>
    %c0_3 = arith.constant 0 : index
    %c0_4 = arith.constant 0 : index
    %c0_5 = arith.constant 0 : index
    %6 = vector.load %arg8[%c0_3, %c0_4, %c0_5] : memref<8x8x288xbf16, #tpu.memory_space<vmem>>, vector<8x8x32xbf16>
    tpu.vector_store %arg8[%c0_3, %c0_4, %c0_5], %5 {strides = array<i32>} : memref<8x8x288xbf16, #tpu.memory_space<vmem>>, vector<8x8x32xbf16>,
    %c0_i32_6 = arith.constant 0 : i32
    %7 = arith.addi %1, %c0_i32_6 : i32
    %c0_7 = arith.constant 0 : index
    %c0_8 = arith.constant 0 : index
    %8 = arith.index_cast %7 : i32 to index
    %c1 = arith.constant 1 : index
    %c0_9 = arith.constant 0 : index
    %9 = vector.load %arg3[%c0_7, %c0_8, %8, %c1, %c0_9] : memref<1x1x10x10x32xbf16, #tpu.memory_space<vmem>>, vector<1x1x8x8x32xbf16>
    %10 = vector.shape_cast %9 : vector<1x1x8x8x32xbf16> to vector<8x8x32xbf16>
    %c0_10 = arith.constant 0 : index
    %c0_11 = arith.constant 0 : index
    %c32 = arith.constant 32 : index
    %11 = vector.load %arg8[%c0_10, %c0_11, %c32] : memref<8x8x288xbf16, #tpu.memory_space<vmem>>, vector<8x8x32xbf16>
    tpu.vector_store %arg8[%c0_10, %c0_11, %c32], %10 {strides = array<i32>} : memref<8x8x288xbf16, #tpu.memory_space<vmem>>, vector<8x8x32xbf16>,
    %c0_i32_12 = arith.constant 0 : i32
    %12 = arith.addi %1, %c0_i32_12 : i32
    %c0_13 = arith.constant 0 : index
    %c0_14 = arith.constant 0 : index
    %13 = arith.index_cast %12 : i32 to index
    %c2 = arith.constant 2 : index
    %c0_15 = arith.constant 0 : index
    %14 = vector.load %arg3[%c0_13, %c0_14, %13, %c2, %c0_15] : memref<1x1x10x10x32xbf16, #tpu.memory_space<vmem>>, vector<1x1x8x8x32xbf16>
    %15 = vector.shape_cast %14 : vector<1x1x8x8x32xbf16> to vector<8x8x32xbf16>
    %c0_16 = arith.constant 0 : index
    %c0_17 = arith.constant 0 : index
    %c64 = arith.constant 64 : index
    %16 = vector.load %arg8[%c0_16, %c0_17, %c64] : memref<8x8x288xbf16, #tpu.memory_space<vmem>>, vector<8x8x32xbf16>
    tpu.vector_store %arg8[%c0_16, %c0_17, %c64], %15 {strides = array<i32>} : memref<8x8x288xbf16, #tpu.memory_space<vmem>>, vector<8x8x32xbf16>,
    %c1_i32 = arith.constant 1 : i32
    %17 = arith.addi %1, %c1_i32 : i32
    %c0_18 = arith.constant 0 : index
    %c0_19 = arith.constant 0 : index
    %18 = arith.index_cast %17 : i32 to index
    %c0_20 = arith.constant 0 : index
    %c0_21 = arith.constant 0 : index
    %19 = vector.load %arg3[%c0_18, %c0_19, %18, %c0_20, %c0_21] : memref<1x1x10x10x32xbf16, #tpu.memory_space<vmem>>, vector<1x1x8x8x32xbf16>
    %20 = vector.shape_cast %19 : vector<1x1x8x8x32xbf16> to vector<8x8x32xbf16>
    %c0_22 = arith.constant 0 : index
    %c0_23 = arith.constant 0 : index
    %c96 = arith.constant 96 : index
    %21 = vector.load %arg8[%c0_22, %c0_23, %c96] : memref<8x8x288xbf16, #tpu.memory_space<vmem>>, vector<8x8x32xbf16>
    tpu.vector_store %arg8[%c0_22, %c0_23, %c96], %20 {strides = array<i32>} : memref<8x8x288xbf16, #tpu.memory_space<vmem>>, vector<8x8x32xbf16>,
    %c1_i32_24 = arith.constant 1 : i32
    %22 = arith.addi %1, %c1_i32_24 : i32
    %c0_25 = arith.constant 0 : index
    %c0_26 = arith.constant 0 : index
    %23 = arith.index_cast %22 : i32 to index
    %c1_27 = arith.constant 1 : index
    %c0_28 = arith.constant 0 : index
    %24 = vector.load %arg3[%c0_25, %c0_26, %23, %c1_27, %c0_28] : memref<1x1x10x10x32xbf16, #tpu.memory_space<vmem>>, vector<1x1x8x8x32xbf16>
    %25 = vector.shape_cast %24 : vector<1x1x8x8x32xbf16> to vector<8x8x32xbf16>
    %c0_29 = arith.constant 0 : index
    %c0_30 = arith.constant 0 : index
    %c128 = arith.constant 128 : index
    %26 = vector.load %arg8[%c0_29, %c0_30, %c128] : memref<8x8x288xbf16, #tpu.memory_space<vmem>>, vector<8x8x32xbf16>
    tpu.vector_store %arg8[%c0_29, %c0_30, %c128], %25 {strides = array<i32>} : memref<8x8x288xbf16, #tpu.memory_space<vmem>>, vector<8x8x32xbf16>,
    %c1_i32_31 = arith.constant 1 : i32
    %27 = arith.addi %1, %c1_i32_31 : i32
    %c0_32 = arith.constant 0 : index
    %c0_33 = arith.constant 0 : index
    %28 = arith.index_cast %27 : i32 to index
    %c2_34 = arith.constant 2 : index
    %c0_35 = arith.constant 0 : index
    %29 = vector.load %arg3[%c0_32, %c0_33, %28, %c2_34, %c0_35] : memref<1x1x10x10x32xbf16, #tpu.memory_space<vmem>>, vector<1x1x8x8x32xbf16>
    %30 = vector.shape_cast %29 : vector<1x1x8x8x32xbf16> to vector<8x8x32xbf16>
    %c0_36 = arith.constant 0 : index
    %c0_37 = arith.constant 0 : index
    %c160 = arith.constant 160 : index
    %31 = vector.load %arg8[%c0_36, %c0_37, %c160] : memref<8x8x288xbf16, #tpu.memory_space<vmem>>, vector<8x8x32xbf16>
    tpu.vector_store %arg8[%c0_36, %c0_37, %c160], %30 {strides = array<i32>} : memref<8x8x288xbf16, #tpu.memory_space<vmem>>, vector<8x8x32xbf16>,
    %c2_i32 = arith.constant 2 : i32
    %32 = arith.addi %1, %c2_i32 : i32
    %c0_38 = arith.constant 0 : index
    %c0_39 = arith.constant 0 : index
    %33 = arith.index_cast %32 : i32 to index
    %c0_40 = arith.constant 0 : index
    %c0_41 = arith.constant 0 : index
    %34 = vector.load %arg3[%c0_38, %c0_39, %33, %c0_40, %c0_41] : memref<1x1x10x10x32xbf16, #tpu.memory_space<vmem>>, vector<1x1x8x8x32xbf16>
    %35 = vector.shape_cast %34 : vector<1x1x8x8x32xbf16> to vector<8x8x32xbf16>
    %c0_42 = arith.constant 0 : index
    %c0_43 = arith.constant 0 : index
    %c192 = arith.constant 192 : index
    %36 = vector.load %arg8[%c0_42, %c0_43, %c192] : memref<8x8x288xbf16, #tpu.memory_space<vmem>>, vector<8x8x32xbf16>
    tpu.vector_store %arg8[%c0_42, %c0_43, %c192], %35 {strides = array<i32>} : memref<8x8x288xbf16, #tpu.memory_space<vmem>>, vector<8x8x32xbf16>,
    %c2_i32_44 = arith.constant 2 : i32
    %37 = arith.addi %1, %c2_i32_44 : i32
    %c0_45 = arith.constant 0 : index
    %c0_46 = arith.constant 0 : index
    %38 = arith.index_cast %37 : i32 to index
    %c1_47 = arith.constant 1 : index
    %c0_48 = arith.constant 0 : index
    %39 = vector.load %arg3[%c0_45, %c0_46, %38, %c1_47, %c0_48] : memref<1x1x10x10x32xbf16, #tpu.memory_space<vmem>>, vector<1x1x8x8x32xbf16>
    %40 = vector.shape_cast %39 : vector<1x1x8x8x32xbf16> to vector<8x8x32xbf16>
    %c0_49 = arith.constant 0 : index
    %c0_50 = arith.constant 0 : index
    %c224 = arith.constant 224 : index
    %41 = vector.load %arg8[%c0_49, %c0_50, %c224] : memref<8x8x288xbf16, #tpu.memory_space<vmem>>, vector<8x8x32xbf16>
    tpu.vector_store %arg8[%c0_49, %c0_50, %c224], %40 {strides = array<i32>} : memref<8x8x288xbf16, #tpu.memory_space<vmem>>, vector<8x8x32xbf16>,
    %c2_i32_51 = arith.constant 2 : i32
    %42 = arith.addi %1, %c2_i32_51 : i32
    %c0_52 = arith.constant 0 : index
    %c0_53 = arith.constant 0 : index
    %43 = arith.index_cast %42 : i32 to index
    %c2_54 = arith.constant 2 : index
    %c0_55 = arith.constant 0 : index
    %44 = vector.load %arg3[%c0_52, %c0_53, %43, %c2_54, %c0_55] : memref<1x1x10x10x32xbf16, #tpu.memory_space<vmem>>, vector<1x1x8x8x32xbf16>
    %45 = vector.shape_cast %44 : vector<1x1x8x8x32xbf16> to vector<8x8x32xbf16>
    %c0_56 = arith.constant 0 : index
    %c0_57 = arith.constant 0 : index
    %c256 = arith.constant 256 : index
    %46 = vector.load %arg8[%c0_56, %c0_57, %c256] : memref<8x8x288xbf16, #tpu.memory_space<vmem>>, vector<8x8x32xbf16>
    tpu.vector_store %arg8[%c0_56, %c0_57, %c256], %45 {strides = array<i32>} : memref<8x8x288xbf16, #tpu.memory_space<vmem>>, vector<8x8x32xbf16>,
    %c0_58 = arith.constant 0 : index
    %c0_59 = arith.constant 0 : index
    %c0_60 = arith.constant 0 : index
    %47 = vector.load %arg8[%c0_58, %c0_59, %c0_60] : memref<8x8x288xbf16, #tpu.memory_space<vmem>>, vector<8x8x288xbf16>
    %48 = vector.shape_cast %47 : vector<8x8x288xbf16> to vector<64x288xbf16>
    %c0_61 = arith.constant 0 : index
    %c0_62 = arith.constant 0 : index
    %49 = vector.load %arg4[%c0_61, %c0_62] : memref<288x32xbf16, #tpu.memory_space<vmem>>, vector<288x32xbf16>
    %cst = arith.constant dense<0.000000e+00> : vector<64x32xf32>
    %50 = tpu.matmul %48, %49, %cst {dimension_numbers = #tpu.dot_dimension_numbers<[1], [0], [0], [1], [0, 0, 1, 1], [], []>} : vector<64x288xbf16>, vector<288x32xbf16>, vector<64x32xf32> -> vector<64x32xf32>
    %c0_63 = arith.constant 0 : index
    %c0_64 = arith.constant 0 : index
    %51 = vector.load %arg5[%c0_63, %c0_64] : memref<1x32xf32, #tpu.memory_space<vmem>>, vector<1x32xf32>
    %52 = vector.broadcast %51 : vector<1x32xf32> to vector<64x32xf32>
    %53 = arith.addf %50, %52 : vector<64x32xf32>
    %c0_65 = arith.constant 0 : index
    %c0_66 = arith.constant 0 : index
    %c0_67 = arith.constant 0 : index
    %54 = vector.load %arg6[%c0_65, %c0_66, %c0_67] : memref<1x64x32xbf16, #tpu.memory_space<vmem>>, vector<1x64x32xbf16>
    %55 = vector.shape_cast %54 : vector<1x64x32xbf16> to vector<64x32xbf16>
    %56 = arith.extf %55 : vector<64x32xbf16> to vector<64x32xf32>
    %57 = arith.addf %53, %56 : vector<64x32xf32>
    %cst_68 = arith.constant 0.000000e+00 : f32
    %58 = vector.broadcast %cst_68 : f32 to vector<64x32xf32>
    %59 = arith.maximumf %57, %58 : vector<64x32xf32>
    %60 = arith.truncf %59 : vector<64x32xf32> to vector<64x32xbf16>
    %c0_69 = arith.constant 0 : index
    %c0_70 = arith.constant 0 : index
    %c0_71 = arith.constant 0 : index
    %61 = vector.load %arg7[%c0_69, %c0_70, %c0_71] : memref<1x64x32xbf16, #tpu.memory_space<vmem>>, vector<1x64x32xbf16>
    %62 = vector.shape_cast %61 : vector<1x64x32xbf16> to vector<64x32xbf16>
    %63 = vector.shape_cast %60 : vector<64x32xbf16> to vector<1x64x32xbf16>
    tpu.vector_store %arg7[%c0_69, %c0_70, %c0_71], %63 {strides = array<i32>} : memref<1x64x32xbf16, #tpu.memory_space<vmem>>, vector<1x64x32xbf16>,
    return
  }
  func.func @transform_0(%arg0: i32, %arg1: i32, %arg2: i32) -> (i32, i32, i32, i32, i32) {
    %c0_i32 = arith.constant 0 : i32
    %c0_i32_0 = arith.constant 0 : i32
    %c0_i32_1 = arith.constant 0 : i32
    %c0_i32_2 = arith.constant 0 : i32
    %c0_i32_3 = arith.constant 0 : i32
    return %arg0, %c0_i32, %c0_i32_0, %c0_i32_1, %c0_i32_2 : i32, i32, i32, i32, i32
  }
  func.func @transform_1(%arg0: i32, %arg1: i32, %arg2: i32) -> (i32, i32) {
    %c0_i32 = arith.constant 0 : i32
    %c0_i32_0 = arith.constant 0 : i32
    return %c0_i32, %arg2 : i32, i32
  }
  func.func @transform_2(%arg0: i32, %arg1: i32, %arg2: i32) -> (i32, i32) {
    %c0_i32 = arith.constant 0 : i32
    %c0_i32_0 = arith.constant 0 : i32
    return %c0_i32, %arg2 : i32, i32
  }
  func.func @transform_3(%arg0: i32, %arg1: i32, %arg2: i32) -> (i32, i32, i32) {
    %c0_i32 = arith.constant 0 : i32
    return %arg0, %arg1, %arg2 : i32, i32, i32
  }
  func.func @transform_4(%arg0: i32, %arg1: i32, %arg2: i32) -> (i32, i32, i32) {
    %c0_i32 = arith.constant 0 : i32
    return %arg0, %arg1, %arg2 : i32, i32, i32
  }
}

module attributes {stable_mosaic.version = 11 : i64} {
  func.func @kernel(%arg0: i32, %arg1: i32, %arg2: i32, %arg3: memref<1x1x10x10x32xbf16, #tpu.memory_space<vmem>>, %arg4: memref<288x32xbf16, #tpu.memory_space<vmem>>, %arg5: memref<1x32xf32, #tpu.memory_space<vmem>>, %arg6: memref<1x64x32xbf16, #tpu.memory_space<vmem>>, %arg7: memref<8x8x288xbf16, #tpu.memory_space<vmem>>) attributes {dimension_semantics = [#tpu.dimension_semantics<parallel>, #tpu.dimension_semantics<parallel>, #tpu.dimension_semantics<parallel>], iteration_bounds = array<i64: 2, 1, 1>, scalar_prefetch = 0 : i64, scratch_operands = 1 : i64, tpu.core_type = #tpu.core_type<tc>, window_params = [{transform_indices = @transform_0, window_bounds = array<i64: 1, 1, 10, 10, 32>}, {transform_indices = @transform_1, window_bounds = array<i64: 288, 32>}, {transform_indices = @transform_2, window_bounds = array<i64: 1, 32>}, {transform_indices = @transform_3, window_bounds = array<i64: 1, 64, 32>}]} {
    %c8_i32 = arith.constant 8 : i32
    %0 = arith.muli %arg1, %c8_i32 : i32
    %1 = tpu.assume_multiple %0, 8 : i32
    %c0_i32 = arith.constant 0 : i32
    %2 = arith.addi %1, %c0_i32 : i32
    %c0 = arith.constant 0 : index
    %c0_0 = arith.constant 0 : index
    %3 = arith.index_cast %2 : i32 to index
    %c0_1 = arith.constant 0 : index
    %c0_2 = arith.constant 0 : index
    %4 = vector.load %arg3[%c0, %c0_0, %3, %c0_1, %c0_2] : memref<1x1x10x10x32xbf16, #tpu.memory_space<vmem>>, vector<1x1x8x8x32xbf16>
    %5 = vector.shape_cast %4 : vector<1x1x8x8x32xbf16> to vector<8x8x32xbf16>
    %c0_3 = arith.constant 0 : index
    %c0_4 = arith.constant 0 : index
    %c0_5 = arith.constant 0 : index
    %6 = vector.load %arg7[%c0_3, %c0_4, %c0_5] : memref<8x8x288xbf16, #tpu.memory_space<vmem>>, vector<8x8x32xbf16>
    tpu.vector_store %arg7[%c0_3, %c0_4, %c0_5], %5 {strides = array<i32>} : memref<8x8x288xbf16, #tpu.memory_space<vmem>>, vector<8x8x32xbf16>,
    %c0_i32_6 = arith.constant 0 : i32
    %7 = arith.addi %1, %c0_i32_6 : i32
    %c0_7 = arith.constant 0 : index
    %c0_8 = arith.constant 0 : index
    %8 = arith.index_cast %7 : i32 to index
    %c1 = arith.constant 1 : index
    %c0_9 = arith.constant 0 : index
    %9 = vector.load %arg3[%c0_7, %c0_8, %8, %c1, %c0_9] : memref<1x1x10x10x32xbf16, #tpu.memory_space<vmem>>, vector<1x1x8x8x32xbf16>
    %10 = vector.shape_cast %9 : vector<1x1x8x8x32xbf16> to vector<8x8x32xbf16>
    %c0_10 = arith.constant 0 : index
    %c0_11 = arith.constant 0 : index
    %c32 = arith.constant 32 : index
    %11 = vector.load %arg7[%c0_10, %c0_11, %c32] : memref<8x8x288xbf16, #tpu.memory_space<vmem>>, vector<8x8x32xbf16>
    tpu.vector_store %arg7[%c0_10, %c0_11, %c32], %10 {strides = array<i32>} : memref<8x8x288xbf16, #tpu.memory_space<vmem>>, vector<8x8x32xbf16>,
    %c0_i32_12 = arith.constant 0 : i32
    %12 = arith.addi %1, %c0_i32_12 : i32
    %c0_13 = arith.constant 0 : index
    %c0_14 = arith.constant 0 : index
    %13 = arith.index_cast %12 : i32 to index
    %c2 = arith.constant 2 : index
    %c0_15 = arith.constant 0 : index
    %14 = vector.load %arg3[%c0_13, %c0_14, %13, %c2, %c0_15] : memref<1x1x10x10x32xbf16, #tpu.memory_space<vmem>>, vector<1x1x8x8x32xbf16>
    %15 = vector.shape_cast %14 : vector<1x1x8x8x32xbf16> to vector<8x8x32xbf16>
    %c0_16 = arith.constant 0 : index
    %c0_17 = arith.constant 0 : index
    %c64 = arith.constant 64 : index
    %16 = vector.load %arg7[%c0_16, %c0_17, %c64] : memref<8x8x288xbf16, #tpu.memory_space<vmem>>, vector<8x8x32xbf16>
    tpu.vector_store %arg7[%c0_16, %c0_17, %c64], %15 {strides = array<i32>} : memref<8x8x288xbf16, #tpu.memory_space<vmem>>, vector<8x8x32xbf16>,
    %c1_i32 = arith.constant 1 : i32
    %17 = arith.addi %1, %c1_i32 : i32
    %c0_18 = arith.constant 0 : index
    %c0_19 = arith.constant 0 : index
    %18 = arith.index_cast %17 : i32 to index
    %c0_20 = arith.constant 0 : index
    %c0_21 = arith.constant 0 : index
    %19 = vector.load %arg3[%c0_18, %c0_19, %18, %c0_20, %c0_21] : memref<1x1x10x10x32xbf16, #tpu.memory_space<vmem>>, vector<1x1x8x8x32xbf16>
    %20 = vector.shape_cast %19 : vector<1x1x8x8x32xbf16> to vector<8x8x32xbf16>
    %c0_22 = arith.constant 0 : index
    %c0_23 = arith.constant 0 : index
    %c96 = arith.constant 96 : index
    %21 = vector.load %arg7[%c0_22, %c0_23, %c96] : memref<8x8x288xbf16, #tpu.memory_space<vmem>>, vector<8x8x32xbf16>
    tpu.vector_store %arg7[%c0_22, %c0_23, %c96], %20 {strides = array<i32>} : memref<8x8x288xbf16, #tpu.memory_space<vmem>>, vector<8x8x32xbf16>,
    %c1_i32_24 = arith.constant 1 : i32
    %22 = arith.addi %1, %c1_i32_24 : i32
    %c0_25 = arith.constant 0 : index
    %c0_26 = arith.constant 0 : index
    %23 = arith.index_cast %22 : i32 to index
    %c1_27 = arith.constant 1 : index
    %c0_28 = arith.constant 0 : index
    %24 = vector.load %arg3[%c0_25, %c0_26, %23, %c1_27, %c0_28] : memref<1x1x10x10x32xbf16, #tpu.memory_space<vmem>>, vector<1x1x8x8x32xbf16>
    %25 = vector.shape_cast %24 : vector<1x1x8x8x32xbf16> to vector<8x8x32xbf16>
    %c0_29 = arith.constant 0 : index
    %c0_30 = arith.constant 0 : index
    %c128 = arith.constant 128 : index
    %26 = vector.load %arg7[%c0_29, %c0_30, %c128] : memref<8x8x288xbf16, #tpu.memory_space<vmem>>, vector<8x8x32xbf16>
    tpu.vector_store %arg7[%c0_29, %c0_30, %c128], %25 {strides = array<i32>} : memref<8x8x288xbf16, #tpu.memory_space<vmem>>, vector<8x8x32xbf16>,
    %c1_i32_31 = arith.constant 1 : i32
    %27 = arith.addi %1, %c1_i32_31 : i32
    %c0_32 = arith.constant 0 : index
    %c0_33 = arith.constant 0 : index
    %28 = arith.index_cast %27 : i32 to index
    %c2_34 = arith.constant 2 : index
    %c0_35 = arith.constant 0 : index
    %29 = vector.load %arg3[%c0_32, %c0_33, %28, %c2_34, %c0_35] : memref<1x1x10x10x32xbf16, #tpu.memory_space<vmem>>, vector<1x1x8x8x32xbf16>
    %30 = vector.shape_cast %29 : vector<1x1x8x8x32xbf16> to vector<8x8x32xbf16>
    %c0_36 = arith.constant 0 : index
    %c0_37 = arith.constant 0 : index
    %c160 = arith.constant 160 : index
    %31 = vector.load %arg7[%c0_36, %c0_37, %c160] : memref<8x8x288xbf16, #tpu.memory_space<vmem>>, vector<8x8x32xbf16>
    tpu.vector_store %arg7[%c0_36, %c0_37, %c160], %30 {strides = array<i32>} : memref<8x8x288xbf16, #tpu.memory_space<vmem>>, vector<8x8x32xbf16>,
    %c2_i32 = arith.constant 2 : i32
    %32 = arith.addi %1, %c2_i32 : i32
    %c0_38 = arith.constant 0 : index
    %c0_39 = arith.constant 0 : index
    %33 = arith.index_cast %32 : i32 to index
    %c0_40 = arith.constant 0 : index
    %c0_41 = arith.constant 0 : index
    %34 = vector.load %arg3[%c0_38, %c0_39, %33, %c0_40, %c0_41] : memref<1x1x10x10x32xbf16, #tpu.memory_space<vmem>>, vector<1x1x8x8x32xbf16>
    %35 = vector.shape_cast %34 : vector<1x1x8x8x32xbf16> to vector<8x8x32xbf16>
    %c0_42 = arith.constant 0 : index
    %c0_43 = arith.constant 0 : index
    %c192 = arith.constant 192 : index
    %36 = vector.load %arg7[%c0_42, %c0_43, %c192] : memref<8x8x288xbf16, #tpu.memory_space<vmem>>, vector<8x8x32xbf16>
    tpu.vector_store %arg7[%c0_42, %c0_43, %c192], %35 {strides = array<i32>} : memref<8x8x288xbf16, #tpu.memory_space<vmem>>, vector<8x8x32xbf16>,
    %c2_i32_44 = arith.constant 2 : i32
    %37 = arith.addi %1, %c2_i32_44 : i32
    %c0_45 = arith.constant 0 : index
    %c0_46 = arith.constant 0 : index
    %38 = arith.index_cast %37 : i32 to index
    %c1_47 = arith.constant 1 : index
    %c0_48 = arith.constant 0 : index
    %39 = vector.load %arg3[%c0_45, %c0_46, %38, %c1_47, %c0_48] : memref<1x1x10x10x32xbf16, #tpu.memory_space<vmem>>, vector<1x1x8x8x32xbf16>
    %40 = vector.shape_cast %39 : vector<1x1x8x8x32xbf16> to vector<8x8x32xbf16>
    %c0_49 = arith.constant 0 : index
    %c0_50 = arith.constant 0 : index
    %c224 = arith.constant 224 : index
    %41 = vector.load %arg7[%c0_49, %c0_50, %c224] : memref<8x8x288xbf16, #tpu.memory_space<vmem>>, vector<8x8x32xbf16>
    tpu.vector_store %arg7[%c0_49, %c0_50, %c224], %40 {strides = array<i32>} : memref<8x8x288xbf16, #tpu.memory_space<vmem>>, vector<8x8x32xbf16>,
    %c2_i32_51 = arith.constant 2 : i32
    %42 = arith.addi %1, %c2_i32_51 : i32
    %c0_52 = arith.constant 0 : index
    %c0_53 = arith.constant 0 : index
    %43 = arith.index_cast %42 : i32 to index
    %c2_54 = arith.constant 2 : index
    %c0_55 = arith.constant 0 : index
    %44 = vector.load %arg3[%c0_52, %c0_53, %43, %c2_54, %c0_55] : memref<1x1x10x10x32xbf16, #tpu.memory_space<vmem>>, vector<1x1x8x8x32xbf16>
    %45 = vector.shape_cast %44 : vector<1x1x8x8x32xbf16> to vector<8x8x32xbf16>
    %c0_56 = arith.constant 0 : index
    %c0_57 = arith.constant 0 : index
    %c256 = arith.constant 256 : index
    %46 = vector.load %arg7[%c0_56, %c0_57, %c256] : memref<8x8x288xbf16, #tpu.memory_space<vmem>>, vector<8x8x32xbf16>
    tpu.vector_store %arg7[%c0_56, %c0_57, %c256], %45 {strides = array<i32>} : memref<8x8x288xbf16, #tpu.memory_space<vmem>>, vector<8x8x32xbf16>,
    %c0_58 = arith.constant 0 : index
    %c0_59 = arith.constant 0 : index
    %c0_60 = arith.constant 0 : index
    %47 = vector.load %arg7[%c0_58, %c0_59, %c0_60] : memref<8x8x288xbf16, #tpu.memory_space<vmem>>, vector<8x8x288xbf16>
    %48 = vector.shape_cast %47 : vector<8x8x288xbf16> to vector<64x288xbf16>
    %c0_61 = arith.constant 0 : index
    %c0_62 = arith.constant 0 : index
    %49 = vector.load %arg4[%c0_61, %c0_62] : memref<288x32xbf16, #tpu.memory_space<vmem>>, vector<288x32xbf16>
    %cst = arith.constant dense<0.000000e+00> : vector<64x32xf32>
    %50 = tpu.matmul %48, %49, %cst {dimension_numbers = #tpu.dot_dimension_numbers<[1], [0], [0], [1], [0, 0, 1, 1], [], []>} : vector<64x288xbf16>, vector<288x32xbf16>, vector<64x32xf32> -> vector<64x32xf32>
    %c0_63 = arith.constant 0 : index
    %c0_64 = arith.constant 0 : index
    %51 = vector.load %arg5[%c0_63, %c0_64] : memref<1x32xf32, #tpu.memory_space<vmem>>, vector<1x32xf32>
    %52 = vector.broadcast %51 : vector<1x32xf32> to vector<64x32xf32>
    %53 = arith.addf %50, %52 : vector<64x32xf32>
    %cst_65 = arith.constant 0.000000e+00 : f32
    %54 = vector.broadcast %cst_65 : f32 to vector<64x32xf32>
    %55 = arith.maximumf %53, %54 : vector<64x32xf32>
    %56 = arith.truncf %55 : vector<64x32xf32> to vector<64x32xbf16>
    %c0_66 = arith.constant 0 : index
    %c0_67 = arith.constant 0 : index
    %c0_68 = arith.constant 0 : index
    %57 = vector.load %arg6[%c0_66, %c0_67, %c0_68] : memref<1x64x32xbf16, #tpu.memory_space<vmem>>, vector<1x64x32xbf16>
    %58 = vector.shape_cast %57 : vector<1x64x32xbf16> to vector<64x32xbf16>
    %59 = vector.shape_cast %56 : vector<64x32xbf16> to vector<1x64x32xbf16>
    tpu.vector_store %arg6[%c0_66, %c0_67, %c0_68], %59 {strides = array<i32>} : memref<1x64x32xbf16, #tpu.memory_space<vmem>>, vector<1x64x32xbf16>,
    return
  }
  func.func @transform_0(%arg0: i32, %arg1: i32, %arg2: i32) -> (i32, i32, i32, i32, i32) {
    %c0_i32 = arith.constant 0 : i32
    %c0_i32_0 = arith.constant 0 : i32
    %c0_i32_1 = arith.constant 0 : i32
    %c0_i32_2 = arith.constant 0 : i32
    %c0_i32_3 = arith.constant 0 : i32
    return %arg0, %c0_i32, %c0_i32_0, %c0_i32_1, %c0_i32_2 : i32, i32, i32, i32, i32
  }
  func.func @transform_1(%arg0: i32, %arg1: i32, %arg2: i32) -> (i32, i32) {
    %c0_i32 = arith.constant 0 : i32
    %c0_i32_0 = arith.constant 0 : i32
    return %c0_i32, %arg2 : i32, i32
  }
  func.func @transform_2(%arg0: i32, %arg1: i32, %arg2: i32) -> (i32, i32) {
    %c0_i32 = arith.constant 0 : i32
    %c0_i32_0 = arith.constant 0 : i32
    return %c0_i32, %arg2 : i32, i32
  }
  func.func @transform_3(%arg0: i32, %arg1: i32, %arg2: i32) -> (i32, i32, i32) {
    %c0_i32 = arith.constant 0 : i32
    return %arg0, %arg1, %arg2 : i32, i32, i32
  }
}

</mosaic_0001>

<bundles_post_ra>
// kernel: _lambda_.6
= control target key start
LH: loop header
LB: loop body
LE: loop exit
PB: predicated region body
PF: predicated region fallthrough
CT: control target
= control target key end

     0   :  { %s677_s12 = smov 0   ;;  %s679_s13 = smov 0   ;;  %s739_s0 = inlined_call_operand.vmem [shape: bf16[2,1,8,8,16], index: 0, kind: input, shape index: {}]   ;;  %s740_s1 = inlined_call_operand.vmem [shape: bf16[16,32], index: 1, kind: input, shape index: {}]   ;;  %s741_s2 = inlined_call_operand.vmem [shape: f32[1,32], index: 2, kind: input, shape index: {}]   ;;  %s742_s3 = inlined_call_operand.vmem [shape: bf16[2,64,32], index: 3, kind: output, shape index: {}]  }
   0x1   :  { %s681_s14 = smov 0  }
   0x2 LB: > { %s32_s15 = sadd.s32 1, %s651_s13  ;;  %p552_p0 = scmp.ge.s32.totalorder %s655_s14, 1  ;;  %s655_s14 = sphi %s681_s14, %s13_s14   ;;  %s651_s13 = sphi %s679_s13, %s744_s13   ;;  %s647_s12 = sphi %s677_s12, %s743_s12  }
   0x3   : > { %p34_p1 = scmp.ge.s32.totalorder %s32_s15, 2  ;;  %p177_p2 = scmp.lt.s32.totalorder %s655_s14, 3 }
   0x5   : > { %s746_s15 = smov (%p34_p1, %s32_s15), 0  ;;  %p178_p3 = pnand %p552_p0, %p177_p2 }
   0x6   : > { %v628_v0 = vld [vmem:[%s740_s1] sm:$0xff] (!%p178_p3)   ;;  %p215_p4 = scmp.lt.s32.totalorder (!%p178_p3), %s647_s12, 1  ;;  %vm252_vm0 = vcmask (!%p178_p3), 125952   ;;  %vm304_vm1 = vcmask (!%p178_p3), 130048   ;;  %vm414_vm2 = vcmask (!%p178_p3), 257024  }
   0x7   : > { %181 = sbr.rel (%p178_p3) target bundleno = 250 (0xfa), region = 32  ;;  %592 = vmatprep.subr.bf16.mxu0 (!%p178_p3), %v628_v0  ;;  %602 = vmatprep.subr.bf16.mxu1 (!%p178_p3), %v628_v0  ;;  %v557_v13 = vld [vmem:[%s741_s2] ss:$0 sm:$0xff] (!%p178_p3) }
   0x8   : > { %593 = vmatpush3.bf16.msra.mxu0 (!%p178_p3), %v628_v0  ;;  %603 = vmatpush3.bf16.msra.mxu1 (!%p178_p3), %v628_v0 }
   0xe   : > { %s748_s12 = smov (!%p215_p4, %s647_s12), 1 }
   0xf   : > { %s577_s18 = sshll.u32 %s748_s12, 5 }
  0x10   : > { %s219_s21 = scalar_lea.vmem %s739_s0, %s577_s18  ;;  %s238_s26 = scalar_lea.vmem %s742_s3, %s577_s18 }
  0x11   : > { %v244_v1 = vld [vmem:[%s219_s21] sm:$0xf]  ;;  %v245_v2 = vld [vmem:[%s219_s21 + $0x4] sm:$0xf]  ;;  %v248_v3 = vld [vmem:[%s219_s21 + $0x10] sm:$0xf] }
  0x12   : > { %253 = vst.msk [vmem:[#allocation2] sm:$0xf] %vm252_vm0, %v244_v1  ;;  %254 = vst.msk [vmem:[#allocation2 + $0x4] sm:$0xf] %vm252_vm0, %v245_v2  ;;  %v249_v4 = vld [vmem:[%s219_s21 + $0x14] sm:$0xf] }
  0x13   : > { %257 = vst.msk [vmem:[#allocation2 + $0x10] sm:$0xf] %vm252_vm0, %v248_v3  ;;  %v246_v5 = vld [vmem:[%s219_s21 + $0x8] sm:$0xf]  ;;  %v247_v6 = vld [vmem:[%s219_s21 + $0xc] sm:$0xf] }
  0x14   : > { %258 = vst.msk [vmem:[#allocation2 + $0x14] sm:$0xf] %vm252_vm0, %v249_v4  ;;  %255 = vst.msk [vmem:[#allocation2 + $0x8] sm:$0xf] %vm252_vm0, %v246_v5  ;;  %v250_v7 = vld [vmem:[%s219_s21 + $0x18] sm:$0xf] }
  0x15   : > { %256 = vst.msk [vmem:[#allocation2 + $0xc] sm:$0xf] %vm252_vm0, %v247_v6  ;;  %v251_v8 = vld [vmem:[%s219_s21 + $0x1c] sm:$0xf]  ;;  %259 = vst.msk [vmem:[#allocation2 + $0x18] sm:$0xf] %vm252_vm0, %v250_v7 }
  0x16   : > { %260 = vst.msk [vmem:[#allocation2 + $0x1c] sm:$0xf] %vm252_vm0, %v251_v8 }
  0x19   : > { %v629_v9 = vld [vmem:[#allocation2] sm:$0xff]  }
  0x1a   : > { %594 = vmatprep.mubr.msk.bf16.mxu0 %vm304_vm1, %v629_v9 }
  0x1b   : > { %v630_v10 = vld [vmem:[#allocation2 + $0x10] sm:$0xff]  }
  0x1c   : > { %v631_v11 = vld [vmem:[#allocation2 + $0x8] sm:$0xff]   ;;  %598 = vmatprep.mubr.msk.bf16.mxu1 %vm304_vm1, %v630_v10 }
  0x1d   : > { %v632_v12 = vld [vmem:[#allocation2 + $0x18] sm:$0xff]   ;;  %595 = vmatmul.mubr.msk.bf16.vlgmr.msra.gmra.mrb[0].mxu0 %vm304_vm1, %v631_v11 }
  0x1e   : > { %599 = vmatmul.mubr.msk.bf16.vlgmr.msra.gmra.mrb[0].mxu1 %vm304_vm1, %v632_v12 }
  0xf0   : > { %v596_v14 = vpop.f32.mrb[0].mxu0 }
  0xf1   : > { %v360_v15 = vadd.f32 %v596_v14, %v557_v13  ;;  %v600_v16 = vpop.f32.mrb[0].mxu1  ;;  %v351_v17 = vpop.f32.mrb[1].mxu0 }
  0xf2   : > { %v376_v18 = vadd.f32 %v600_v16, %v557_v13  ;;  %v352_v19 = vadd.f32 %v557_v13, %v351_v17  ;;  %v367_v20 = vpop.f32.mrb[1].mxu1  ;;  %v597_v21 = vpop.f32.mrb[2].mxu0 }
  0xf3   : > { %v581_v22 = vpack.c.bf16 %v360_v15, %v360_v15  ;;  %v368_v23 = vadd.f32 %v557_v13, %v367_v20  ;;  %v363_v24 = vadd.f32 %v597_v21, %v557_v13  ;;  %v601_v25 = vpop.f32.mrb[2].mxu1  ;;  %v354_v26 = vpop.f32.mrb[3].mxu0 }
  0xf4   : > { %v585_v27 = vpack.c.bf16 %v376_v18, %v376_v18  ;;  %v579_v28 = vpack.c.bf16 %v352_v19, %v352_v19  ;;  %v379_v29 = vadd.f32 %v601_v25, %v557_v13  ;;  %v355_v30 = vadd.f32 %v557_v13, %v354_v26  ;;  %v370_v31 = vpop.f32.mrb[3].mxu1 }
  0xf5   : > { %417 = vst.msk [vmem:[%s238_s26 + $0x8] sm:$0xf] %vm414_vm2, %v581_v22  ;;  %v583_v32 = vpack.c.bf16 %v368_v23, %v368_v23  ;;  %v582_v33 = vpack.c.bf16 %v363_v24, %v363_v24  ;;  %v371_v34 = vadd.f32 %v557_v13, %v370_v31 }
  0xf6   : > { %421 = vst.msk [vmem:[%s238_s26 + $0x18] sm:$0xf] %vm414_vm2, %v585_v27  ;;  %415 = vst.msk [vmem:[%s238_s26] sm:$0xf] %vm414_vm2, %v579_v28  ;;  %v586_v35 = vpack.c.bf16 %v379_v29, %v379_v29  ;;  %v580_v36 = vpack.c.bf16 %v355_v30, %v355_v30 }
  0xf7   : > { %419 = vst.msk [vmem:[%s238_s26 + $0x10] sm:$0xf] %vm414_vm2, %v583_v32  ;;  %418 = vst.msk [vmem:[%s238_s26 + $0xc] sm:$0xf] %vm414_vm2, %v582_v33  ;;  %v584_v37 = vpack.c.bf16 %v371_v34, %v371_v34 }
  0xf8   : > { %422 = vst.msk [vmem:[%s238_s26 + $0x1c] sm:$0xf] %vm414_vm2, %v586_v35  ;;  %416 = vst.msk [vmem:[%s238_s26 + $0x4] sm:$0xf] %vm414_vm2, %v580_v36 }
  0xf9   : > { %420 = vst.msk [vmem:[%s238_s26 + $0x14] sm:$0xf] %vm414_vm2, %v584_v37 }
  0xfa PF: > { %s13_s14 = sadd.s32 1, %s655_s14   ;;  %s743_s12 = smov %s651_s13 }
  0xfb   : > { %p10_p5 = scmp.ge.s32.totalorder %s13_s14, 4   ;;  %s744_s13 = smov %s746_s15 }
  0xfd   :  { %12 = sbr.rel (!%p10_p5) target bundleno = 2 (0x2), region = 69 }

// kernel: _lambda_.5
= control target key start
LH: loop header
LB: loop body
LE: loop exit
PB: predicated region body
PF: predicated region fallthrough
CT: control target
= control target key end

     0   :  { %s1633_s12 = smov 0   ;;  %s1635_s13 = smov 0   ;;  %s2052_s0 = inlined_call_operand.vmem [shape: bf16[2,4,9,9,16], index: 0, kind: input, shape index: {}]   ;;  %s2053_s1 = inlined_call_operand.vmem [shape: bf16[144,32], index: 1, kind: input, shape index: {}]   ;;  %s2054_s2 = inlined_call_operand.vmem [shape: f32[1,32], index: 2, kind: input, shape index: {}]   ;;  %s2055_s3 = inlined_call_operand.vmem [shape: bf16[2,64,32], index: 3, kind: output, shape index: {}]  }
   0x1   :  { %s1637_s14 = smov 0  }
   0x2 LB: > { %s32_s15 = sadd.s32 1, %s1599_s13  ;;  %p1392_p0 = scmp.ge.s32.totalorder %s1603_s14, 1  ;;  %s1603_s14 = sphi %s1637_s14, %s13_s14   ;;  %s1599_s13 = sphi %s1635_s13, %s2059_s13   ;;  %s1595_s12 = sphi %s1633_s12, %s2058_s12  }
   0x3   : > { %p34_p1 = scmp.ge.s32.totalorder %s32_s15, 2  ;;  %p177_p2 = scmp.lt.s32.totalorder %s1603_s14, 3 }
   0x5   : > { %s2061_s15 = smov (%p34_p1, %s32_s15), 0  ;;  %p178_p3 = pnand %p1392_p0, %p177_p2 }
   0x6   : > { %p215_p4 = scmp.lt.s32.totalorder (!%p178_p3), %s1595_s12, 1  ;;  %s1605_s20 = smov (!%p178_p3), 16   ;;  %vm330_vm0 = vsmask.f32 (!%p178_p3), 3328  ;;  %vm331_vm1 = vsmask.f32 (!%p178_p3), 7440 }
   0x7   : > { %181 = sbr.rel (%p178_p3) target bundleno = 472 (0x1d8), region = 32  ;;  %vm1679_vm2 = vmor (!%p178_p3), %vm330_vm0, %vm331_vm1  ;;  %s1606_s21 = smov (!%p178_p3), 48   ;;  %v1607_v49 = vmov (!%p178_p3), 0   ;;  %v1560_v53 = vld [vmem:[%s2053_s1] sm:$0xff] (!%p178_p3)   ;;  %v1561_v59 = vld [vmem:[%s2053_s1 + $0x8] sm:$0xff] (!%p178_p3)   ;;  %vm253_vm3 = vcmask (!%p178_p3), 125952  }
   0x8   : > { %1128 = vmatprep.subr.bf16.mxu0 (!%p178_p3), %v1607_v49  ;;  %1509 = vmatprep.subr.bf16.mxu1 (!%p178_p3), %v1607_v49  ;;  %s1608_s22 = smov (!%p178_p3), 32   ;;  %s1609_s4 = smov (!%p178_p3), 64   ;;  %vm305_vm4 = vcmask (!%p178_p3), 257152   ;;  %vm469_vm5 = vcmask (!%p178_p3), 388352   ;;  %vm521_vm6 = vcmask (!%p178_p3), 519552   ;;  %vm573_vm7 = vcmask (!%p178_p3), 650752  }
   0x9   : > { %1129 = vmatpush1.bf16.msra.mxu0 (!%p178_p3), %v1560_v53  ;;  %1518 = vmatpush1.bf16.msra.mxu1 (!%p178_p3), %v1560_v53  ;;  %s1610_s9 = smov (!%p178_p3), 80   ;;  %s1611_s18 = smov (!%p178_p3), 96   ;;  %vm734_vm8 = vcmask (!%p178_p3), 781952   ;;  %vm787_vm9 = vcmask (!%p178_p3), 913152   ;;  %vm839_vm10 = vcmask (!%p178_p3), 1044352   ;;  %vm1115_vm11 = vcmask (!%p178_p3), 130048  }
   0xa   : > { %1130 = vmatprep.subr.bf16.mxu0 (!%p178_p3), %v1607_v49  ;;  %1510 = vmatprep.subr.bf16.mxu1 (!%p178_p3), %v1607_v49  ;;  %s1612_s25 = smov (!%p178_p3), 112   ;;  %vm1233_vm12 = vcmask (!%p178_p3), 257024  }
   0xd   : > { %1131 = vmatpush1.bf16.msra.mxu0 (!%p178_p3), %v1561_v59  ;;  %1519 = vmatpush1.bf16.msra.mxu1 (!%p178_p3), %v1561_v59 }
   0xe   : > { %s2063_s12 = smov (!%p215_p4, %s1595_s12), 1  ;;  %1132 = vmatprep.subr.bf16.mxu0 %v1607_v49  ;;  %1511 = vmatprep.subr.bf16.mxu1 %v1607_v49 }
   0xf   : > { %s1527_s16 = smul.u32 288, %s2063_s12 }
  0x11   : > { %s1657_s19 = scalar_lea.vmem %s2052_s0, %s1527_s16 }
  0x12   : > { %v1400_v0 = vld [vmem:[%s1657_s19 + $0x68] sm:$0xf]  ;;  %v1401_v2 = vld [vmem:[%s1657_s19 + $0x70] sm:$0xf]  ;;  %v317_v5 = vld [vmem:[%s1657_s19 + $0xc] sm:$0x1] }
  0x13   : > { %v1396_v1 = vld [vmem:[%s1657_s19 + $0x48] sm:$0xf]  ;;  %289 = vrot.lane.b32.xlu1 %v1400_v0, %s1605_s20  ;;  %v1397_v3 = vld [vmem:[%s1657_s19 + $0x50] sm:$0xf]  ;;  %v357_v8 = vshll.u32 %v317_v5, 16 }
  0x14   : > { %281 = vrot.lane.b32.xlu0 %v1396_v1, %s1605_s20  ;;  %v316_v4 = vld [vmem:[%s1657_s19 + $0x8] sm:$0xf]  ;;  %v314_v9 = vld [vmem:[%s1657_s19] sm:$0xf]  ;;  %v1405_v10 = vld [vmem:[%s1657_s19 + $0x98] sm:$0xf] }
  0x15   : > { %v348_v6 = vshrl.u32 %v316_v4, 16  ;;  %v351_v7 = vshll.u32 %v316_v4, 16  ;;  %v1404_v11 = vld [vmem:[%s1657_s19 + $0x90] sm:$0xf]  ;;  %v315_v12 = vld [vmem:[%s1657_s19 + $0x4] sm:$0x1] }
  0x16   : > { %v334_v13 = vshrl.u32 %v314_v9, 16  ;;  %v337_v14 = vshll.u32 %v314_v9, 16  ;;  %v324_v15 = vld [vmem:[%s1657_s19 + $0x28] sm:$0xf]  ;;  %v359_v18 = vrot.slane %v357_v8, 5  ;;  %v343_v19 = vshll.u32 %v315_v12, 16 }
  0x17   : > { %291 = vrot.lane.b32.xlu1 %v1401_v2, %s1605_s20  ;;  %v350_v16 = vrot.slane %v348_v6, 4  ;;  %v353_v17 = vrot.slane %v351_v7, 5  ;;  %v325_v20 = vld [vmem:[%s1657_s19 + $0x2c] sm:$0x1]  ;;  %v404_v23 = vshrl.u32 %v324_v15, 16  ;;  %v407_v24 = vshll.u32 %v324_v15, 16 }
  0x18   : > { %283 = vrot.lane.b32.xlu0 %v1397_v3, %s1605_s20  ;;  %v336_v21 = vrot.slane %v334_v13, 4  ;;  %v339_v22 = vrot.slane %v337_v14, 5  ;;  %v322_v25 = vld [vmem:[%s1657_s19 + $0x20] sm:$0xf]  ;;  %v345_v27 = vrot.slane %v343_v19, 5  ;;  %v413_v28 = vshll.u32 %v325_v20, 16 }
  0x19   : > { %v354_v26 = vor.u32 %v353_v17, %v350_v16  ;;  %v323_v29 = vld [vmem:[%s1657_s19 + $0x24] sm:$0x1]  ;;  %v390_v30 = vshrl.u32 %v322_v25, 16  ;;  %v406_v33 = vrot.slane %v404_v23, 4  ;;  %v409_v34 = vrot.slane %v407_v24, 5  ;;  %v1563_v23 = vld [vmem:[%s2053_s1 + $0x18] sm:$0xff]  }
  0x1a   : > { %v340_v32 = vor.u32 %v339_v22, %v336_v21  ;;  %v393_v35 = vshll.u32 %v322_v25, 16  ;;  %v399_v38 = vshll.u32 %v323_v29, 16  ;;  %v415_v41 = vrot.slane %v413_v28, 5  ;;  %v1422_v48 = vld [vmem:[%s1657_s19 + $0x98] sm:$0xf] }
  0x1b   : > { %499 = vrot.lane.b32.xlu1 %v1405_v10, %s1606_s21  ;;  %v355_v36 = vrot.slane %v354_v26, 4  ;;  %v392_v37 = vrot.slane %v390_v30, 4  ;;  %v410_v40 = vor.u32 %v409_v34, %v406_v33  ;;  %v613_v50 = vshrl.u32 %v1422_v48, 16  ;;  %v1420_v52 = vld [vmem:[%s1657_s19 + $0x90] sm:$0xf] }
  0x1c   : > { %497 = vrot.lane.b32.xlu0 %v1404_v11, %s1606_s21  ;;  %v341_v39 = vrot.slane %v340_v32, 4  ;;  %v395_v42 = vrot.slane %v393_v35, 5  ;;  %v401_v47 = vrot.slane %v399_v38, 5  ;;  %v616_v51 = vshll.u32 %v1422_v48, 16  ;;  %v1430_v58 = vld [vmem:[%s1657_s19 + $0xb8] sm:$0xf] }
  0x1d   : > { %v360_v43 = vsel %vm1679_vm2, %v355_v36, %v359_v18  ;;  %v411_v45 = vrot.slane %v410_v40, 4  ;;  %v599_v56 = vshrl.u32 %v1420_v52, 16  ;;  %v602_v57 = vshll.u32 %v1420_v52, 16  ;;  %v1409_v61 = vld [vmem:[%s1657_s19 + $0xb8] sm:$0xf]  ;;  %v1562_v10 = vld [vmem:[%s2053_s1 + $0x10] sm:$0xff]  }
  0x1e   : > { %v346_v44 = vsel %vm1679_vm2, %v341_v39, %v345_v27  ;;  %v396_v46 = vor.u32 %v395_v42, %v392_v37  ;;  %v1408_v62 = vld [vmem:[%s1657_s19 + $0xb0] sm:$0xf]  ;;  %v1423_v63 = vld [vmem:[%s1657_s19 + $0x9c] sm:$0x1]  ;;  %v615_v0 = vrot.slane %v613_v50, 4  ;;  %v618_v1 = vrot.slane %v616_v51, 5  ;;  %1133 = vmatpush1.bf16.msra.mxu0 %v1562_v10  ;;  %1520 = vmatpush1.bf16.msra.mxu1 %v1562_v10 }
  0x1f   : > { %447 = vrot.lane.b32.xlu1 %v360_v43, %s1608_s22  ;;  %v416_v54 = vsel %vm1679_vm2, %v411_v45, %v415_v41  ;;  %v601_v2 = vrot.slane %v599_v56, 4  ;;  %v604_v3 = vrot.slane %v602_v57, 5  ;;  %v1428_v4 = vld [vmem:[%s1657_s19 + $0xb0] sm:$0xf]  ;;  %v1421_v5 = vld [vmem:[%s1657_s19 + $0x94] sm:$0x1]  ;;  %1134 = vmatprep.subr.bf16.mxu0 %v1607_v49 }
  0x20   : > { %445 = vrot.lane.b32.xlu0 %v346_v44, %s1608_s22  ;;  %v397_v55 = vrot.slane %v396_v46, 4  ;;  %v669_v6 = vshrl.u32 %v1430_v58, 16  ;;  %v672_v7 = vshll.u32 %v1430_v58, 16  ;;  %v655_v8 = vshrl.u32 %v1428_v4, 16  ;;  %v1413_v11 = vld [vmem:[%s1657_s19 + $0xe0] sm:$0xf]  ;;  %1512 = vmatprep.subr.bf16.mxu1 %v1607_v49 }
  0x21   : > { %v658_v9 = vshll.u32 %v1428_v4, 16  ;;  %v1412_v12 = vld [vmem:[%s1657_s19 + $0xd8] sm:$0xf]  ;;  %v619_v13 = vor.u32 %v618_v1, %v615_v0  ;;  %v622_v14 = vshll.u32 %v1423_v63, 16  ;;  %v605_v15 = vor.u32 %v604_v3, %v601_v2  ;;  %v1431_v17 = vld [vmem:[%s1657_s19 + $0xbc] sm:$0x1] }
  0x22   : > { %v402_v60 = vsel %vm1679_vm2, %v397_v55, %v401_v47  ;;  %v608_v16 = vshll.u32 %v1421_v5, 16  ;;  %v671_v18 = vrot.slane %v669_v6, 4  ;;  %v674_v19 = vrot.slane %v672_v7, 5  ;;  %v1429_v22 = vld [vmem:[%s1657_s19 + $0xb4] sm:$0x1]  ;;  %1135 = vmatpush1.bf16.msra.mxu0 %v1563_v23  ;;  %1521 = vmatpush1.bf16.msra.mxu1 %v1563_v23  ;;  %v1564_v35 = vld [vmem:[%s2053_s1 + $0x20] sm:$0xff]  }
  0x23   : > { %455 = vrot.lane.b32.xlu1 %v416_v54, %s1608_s22  ;;  %v657_v20 = vrot.slane %v655_v8, 4  ;;  %v660_v21 = vrot.slane %v658_v9, 5  ;;  %v620_v24 = vrot.slane %v619_v13, 4  ;;  %v624_v25 = vrot.slane %v622_v14, 5  ;;  %v1417_v28 = vld [vmem:[%s1657_s19 + $0x100] sm:$0xf]  ;;  %1136 = vmatprep.subr.bf16.mxu0 %v1607_v49 }
  0x24   : > { %453 = vrot.lane.b32.xlu0 %v402_v60, %s1608_s22  ;;  %v610_v26 = vrot.slane %v608_v16, 5  ;;  %v678_v27 = vshll.u32 %v1431_v17, 16  ;;  %v1416_v29 = vld [vmem:[%s1657_s19 + $0xf8] sm:$0xf]  ;;  %v606_v30 = vrot.slane %v605_v15, 4  ;;  %v675_v32 = vor.u32 %v674_v19, %v671_v18  ;;  %1513 = vmatprep.subr.bf16.mxu1 %v1607_v49  ;;  %v1565_v43 = vld [vmem:[%s2053_s1 + $0x28] sm:$0xff]  }
  0x25   : > { %v661_v33 = vor.u32 %v660_v21, %v657_v20  ;;  %v664_v34 = vshll.u32 %v1429_v22, 16  ;;  %v625_v36 = vsel %vm1679_vm2, %v620_v24, %v624_v25  ;;  %v320_v42 = vld [vmem:[%s1657_s19 + $0x18] sm:$0xf]  ;;  %v318_v44 = vld [vmem:[%s1657_s19 + $0x10] sm:$0xf]  ;;  %v1568_v10 = vld [vmem:[%s2053_s1 + $0x40] sm:$0xff]  }
  0x26   : > { %v680_v37 = vrot.slane %v678_v27, 5  ;;  %v611_v38 = vsel %vm1679_vm2, %v606_v30, %v610_v26  ;;  %v676_v39 = vrot.slane %v675_v32, 4  ;;  %1137 = vmatpush1.bf16.msra.mxu0 %v1564_v35  ;;  %1522 = vmatpush1.bf16.msra.mxu1 %v1564_v35  ;;  %v376_v47 = vshrl.u32 %v320_v42, 16  ;;  %v1566_v52 = vld [vmem:[%s2053_s1 + $0x30] sm:$0xff]   ;;  %v1436_v54 = vld [vmem:[%s1657_s19 + $0x8] sm:$0xf] }
  0x27   : > { %507 = vrot.lane.b32.xlu1 %v1409_v61, %s1606_s21  ;;  %v662_v40 = vrot.slane %v661_v33, 4  ;;  %v666_v41 = vrot.slane %v664_v34, 5  ;;  %1138 = vmatprep.subr.bf16.mxu0 %v1607_v49  ;;  %v379_v48 = vshll.u32 %v320_v42, 16  ;;  %v362_v50 = vshrl.u32 %v318_v44, 16  ;;  %v1437_v53 = vld [vmem:[%s1657_s19 + $0x10] sm:$0xf] }
  0x28   : > { %505 = vrot.lane.b32.xlu0 %v1408_v62, %s1606_s21  ;;  %1514 = vmatprep.subr.bf16.mxu1 %v1607_v49  ;;  %v681_v45 = vsel %vm1679_vm2, %v676_v39, %v680_v37  ;;  %v365_v51 = vshll.u32 %v318_v44, 16  ;;  %v321_v55 = vld [vmem:[%s1657_s19 + $0x1c] sm:$0x1]  ;;  %v378_v56 = vrot.slane %v376_v47, 4  ;;  %v319_v58 = vld [vmem:[%s1657_s19 + $0x14] sm:$0x1] }
  0x29   : > { %v667_v46 = vsel %vm1679_vm2, %v662_v40, %v666_v41  ;;  %v381_v57 = vrot.slane %v379_v48, 5  ;;  %v364_v59 = vrot.slane %v362_v50, 4  ;;  %v328_v61 = vld [vmem:[%s1657_s19 + $0x38] sm:$0xf]  ;;  %v329_v63 = vld [vmem:[%s1657_s19 + $0x3c] sm:$0x1] }
  0x2a   : > { %1139 = vmatpush1.bf16.msra.mxu0 %v1565_v43  ;;  %1523 = vmatpush1.bf16.msra.mxu1 %v1565_v43  ;;  %v367_v60 = vrot.slane %v365_v51, 5  ;;  %v1567_v62 = vld [vmem:[%s2053_s1 + $0x38] sm:$0xff]   ;;  %v1441_v0 = vld [vmem:[%s1657_s19 + $0x30] sm:$0xf]  ;;  %v1440_v1 = vld [vmem:[%s1657_s19 + $0x28] sm:$0xf] }
  0x2b   : > { %551 = vrot.lane.b32.xlu1 %v1413_v11, %s1609_s4  ;;  %1140 = vmatprep.subr.bf16.mxu0 %v1607_v49  ;;  %v382_v2 = vor.u32 %v381_v57, %v378_v56  ;;  %v385_v3 = vshll.u32 %v321_v55, 16  ;;  %v371_v4 = vshll.u32 %v319_v58, 16  ;;  %v432_v5 = vshrl.u32 %v328_v61, 16  ;;  %v326_v6 = vld [vmem:[%s1657_s19 + $0x30] sm:$0xf] }
  0x2c   : > { %549 = vrot.lane.b32.xlu0 %v1412_v12, %s1609_s4  ;;  %1515 = vmatprep.subr.bf16.mxu1 %v1607_v49  ;;  %v368_v7 = vor.u32 %v367_v60, %v364_v59  ;;  %v435_v8 = vshll.u32 %v328_v61, 16  ;;  %v441_v9 = vshll.u32 %v329_v63, 16  ;;  %v1786_v11 = vld [vmem:[%s1657_s19 + $0x34] sm:$0x1]  ;;  %v1445_v12 = vld [vmem:[%s1657_s19 + $0x58] sm:$0xf] }
  0x2d   : > { %v418_v13 = vshrl.u32 %v326_v6, 16  ;;  %v421_v14 = vshll.u32 %v326_v6, 16  ;;  %v1444_v15 = vld [vmem:[%s1657_s19 + $0x50] sm:$0xf]  ;;  %v1794_v16 = vrot.slane %v382_v2, 4  ;;  %v1796_v17 = vrot.slane %v385_v3, 5 }
  0x2e   : > { %1141 = vmatpush1.bf16.msra.mxu0 %v1566_v52  ;;  %1524 = vmatpush1.bf16.msra.mxu1 %v1566_v52  ;;  %v1800_v18 = vrot.slane %v432_v5, 4  ;;  %v1802_v19 = vrot.slane %v368_v7, 4  ;;  %v1804_v20 = vrot.slane %v435_v8, 5  ;;  %v1806_v21 = vrot.slane %v441_v9, 5  ;;  %v249_v23 = vld [vmem:[%s1657_s19 + $0x20] sm:$0xf] }
  0x2f   : > { %559 = vrot.lane.b32.xlu1 %v1417_v28, %s1609_s4  ;;  %1142 = vmatprep.subr.bf16.mxu0 %v1607_v49  ;;  %v427_v22 = vshll.u32 %v1786_v11, 16  ;;  %v1449_v24 = vld [vmem:[%s1657_s19 + $0x78] sm:$0xf]  ;;  %v1448_v25 = vld [vmem:[%s1657_s19 + $0x70] sm:$0xf]  ;;  %v1820_v30 = vrot.slane %v421_v14, 5  ;;  %v388_v44 = vsel %vm1679_vm2, %v1794_v16, %v1796_v17 }
  0x30   : > { %557 = vrot.lane.b32.xlu0 %v1416_v29, %s1609_s4  ;;  %1516 = vmatprep.subr.bf16.mxu1 %v1607_v49  ;;  %258 = vst.msk [vmem:[#allocation2 + $0x20] sm:$0xf] %vm253_vm3, %v249_v23  ;;  %v245_v26 = vld [vmem:[%s1657_s19] sm:$0xf]  ;;  %v250_v27 = vld [vmem:[%s1657_s19 + $0x28] sm:$0xf]  ;;  %v438_v56 = vor.u32 %v1804_v20, %v1800_v18 }
  0x31   : > { %v246_v28 = vld [vmem:[%s1657_s19 + $0x8] sm:$0xf]  ;;  %v1818_v29 = vrot.slane %v418_v13, 4  ;;  %254 = vst.msk [vmem:[#allocation2] sm:$0xf] %vm253_vm3, %v245_v26  ;;  %v429_v8 = vrot.slane %v427_v22, 5 }
  0x32   : > { %1143 = vmatpush1.bf16.msra.mxu0 %v1567_v62  ;;  %1525 = vmatpush1.bf16.msra.mxu1 %v1567_v62  ;;  %259 = vst.msk [vmem:[#allocation2 + $0x28] sm:$0xf] %vm253_vm3, %v250_v27  ;;  %255 = vst.msk [vmem:[#allocation2 + $0x8] sm:$0xf] %vm253_vm3, %v246_v28  ;;  %v248_v32 = vld [vmem:[%s1657_s19 + $0x18] sm:$0xf] }
  0x33   : > { %712 = vrot.lane.b32.xlu1 %v625_v36, %s1610_s9  ;;  %1144 = vmatprep.subr.bf16.mxu0 %v1607_v49  ;;  %257 = vst.msk [vmem:[#allocation2 + $0x18] sm:$0xf] %vm253_vm3, %v248_v32  ;;  %v247_v33 = vld [vmem:[%s1657_s19 + $0x10] sm:$0xf]  ;;  %v1399_v34 = vld [vmem:[%s1657_s19 + $0x60] sm:$0xf]  ;;  %v424_v57 = vor.u32 %v1820_v30, %v1818_v29 }
  0x34   : > { %710 = vrot.lane.b32.xlu0 %v611_v38, %s1610_s9  ;;  %1517 = vmatprep.subr.bf16.mxu1 %v1607_v49  ;;  %v1798_v49 = vrot.slane %v371_v4, 5  ;;  %v1398_v35 = vld [vmem:[%s1657_s19 + $0x58] sm:$0xf]  ;;  %256 = vst.msk [vmem:[#allocation2 + $0x10] sm:$0xf] %vm253_vm3, %v247_v33  ;;  %v439_v17 = vrot.slane %v438_v56, 4 }
  0x35   : > { %v1452_v36 = vld [vmem:[%s1657_s19 + $0x8] sm:$0xf]  ;;  %v1453_v37 = vld [vmem:[%s1657_s19 + $0xc] sm:$0x1]  ;;  %v1454_v38 = vld [vmem:[%s1657_s19 + $0x10] sm:$0xf] }
  0x36   : > { %1145 = vmatpush1.bf16.msra.mxu0 %v1568_v10  ;;  %1526 = vmatpush1.bf16.msra.mxu1 %v1568_v10  ;;  %v1455_v39 = vld [vmem:[%s1657_s19 + $0x14] sm:$0x1]  ;;  %v865_v40 = vshrl.u32 %v1452_v36, 16  ;;  %v868_v41 = vshll.u32 %v1452_v36, 16  ;;  %v874_v42 = vshll.u32 %v1453_v37, 16  ;;  %v879_v43 = vshrl.u32 %v1454_v38, 16 }
  0x37   : > { %720 = vrot.lane.b32.xlu1 %v681_v45, %s1610_s9  ;;  %v882_v45 = vshll.u32 %v1454_v38, 16  ;;  %v252_v47 = vld [vmem:[%s1657_s19 + $0x38] sm:$0xf]  ;;  %v251_v48 = vld [vmem:[%s1657_s19 + $0x30] sm:$0xf]  ;;  %v374_v13 = vsel %vm1679_vm2, %v1802_v19, %v1798_v49  ;;  %v425_v22 = vrot.slane %v424_v57, 4  ;;  %v444_v27 = vsel %vm1679_vm2, %v439_v17, %v1806_v21 }
  0x38   : > { %718 = vrot.lane.b32.xlu0 %v667_v46, %s1610_s9  ;;  %v888_v46 = vshll.u32 %v1455_v39, 16  ;;  %v867_v50 = vrot.slane %v865_v40, 4  ;;  %v870_v51 = vrot.slane %v868_v41, 5  ;;  %v876_v52 = vrot.slane %v874_v42, 5  ;;  %261 = vst.msk [vmem:[#allocation2 + $0x38] sm:$0xf] %vm253_vm3, %v252_v47 }
  0x39   : > { %260 = vst.msk [vmem:[#allocation2 + $0x30] sm:$0xf] %vm253_vm3, %v251_v48  ;;  %v1403_v55 = vld [vmem:[%s1657_s19 + $0x80] sm:$0xf]  ;;  %v884_v58 = vrot.slane %v882_v45, 5  ;;  %v430_v28 = vsel %vm1679_vm2, %v425_v22, %v429_v8 }
  0x3a   : > { %v890_v59 = vrot.slane %v888_v46, 5  ;;  %v1461_v60 = vld [vmem:[%s1657_s19 + $0x2c] sm:$0x1]  ;;  %v1462_v61 = vld [vmem:[%s1657_s19 + $0x30] sm:$0xf]  ;;  %v871_v62 = vor.u32 %v870_v51, %v867_v50 }
  0x3b   : > { %765 = vrot.lane.b32.xlu1 %v1437_v53, %s1611_s18  ;;  %v881_v53 = vrot.slane %v879_v43, 4  ;;  %v1463_v63 = vld [vmem:[%s1657_s19 + $0x34] sm:$0x1]  ;;  %v930_v2 = vshll.u32 %v1461_v60, 16  ;;  %v1402_v3 = vld [vmem:[%s1657_s19 + $0x78] sm:$0xf] }
  0x3c   : > { %763 = vrot.lane.b32.xlu0 %v1436_v54, %s1611_s18  ;;  %v1460_v54 = vld [vmem:[%s1657_s19 + $0x28] sm:$0xf]  ;;  %v935_v5 = vshrl.u32 %v1462_v61, 16  ;;  %v938_v6 = vshll.u32 %v1462_v61, 16  ;;  %v944_v7 = vshll.u32 %v1463_v63, 16  ;;  %v872_v9 = vrot.slane %v871_v62, 4 }
  0x3d   : > { %v885_v4 = vor.u32 %v884_v58, %v881_v53  ;;  %v932_v20 = vrot.slane %v930_v2, 5  ;;  %v1426_v29 = vld [vmem:[%s1657_s19 + $0xa8] sm:$0xf]  ;;  %v1424_v30 = vld [vmem:[%s1657_s19 + $0xa0] sm:$0xf] }
  0x3e   : > { %v940_v16 = vrot.slane %v938_v6, 5  ;;  %v877_v11 = vsel %vm1679_vm2, %v872_v9, %v876_v52  ;;  %v946_v19 = vrot.slane %v944_v7, 5  ;;  %v1434_v33 = vld [vmem:[%s1657_s19 + $0xc8] sm:$0xf]  ;;  %v641_v21 = vshrl.u32 %v1426_v29, 16 }
  0x3f   : > { %773 = vrot.lane.b32.xlu1 %v1441_v0, %s1611_s18  ;;  %v921_v0 = vshrl.u32 %v1460_v54, 16  ;;  %v886_v14 = vrot.slane %v885_v4, 4  ;;  %984 = vst.msk [vmem:[#allocation2 + $0x4] sm:$0xf] %vm253_vm3, %v877_v11  ;;  %v627_v36 = vshrl.u32 %v1424_v30, 16  ;;  %v630_v37 = vshll.u32 %v1424_v30, 16 }
  0x40   : > { %771 = vrot.lane.b32.xlu0 %v1440_v1, %s1611_s18  ;;  %v924_v1 = vshll.u32 %v1460_v54, 16  ;;  %v1407_v38 = vld [vmem:[%s1657_s19 + $0xa8] sm:$0xf]  ;;  %v1406_v39 = vld [vmem:[%s1657_s19 + $0xa0] sm:$0xf]  ;;  %v697_v40 = vshrl.u32 %v1434_v33, 16 }
  0x41   : > { %v923_v10 = vrot.slane %v921_v0, 4  ;;  %v891_v23 = vsel %vm1679_vm2, %v886_v14, %v890_v59  ;;  %v700_v41 = vshll.u32 %v1434_v33, 16  ;;  %v1410_v45 = vld [vmem:[%s1657_s19 + $0xc0] sm:$0xf]  ;;  %v643_v46 = vrot.slane %v641_v21, 4 }
  0x42   : > { %985 = vst.msk [vmem:[#allocation2 + $0xc] sm:$0xf] %vm253_vm3, %v891_v23  ;;  %v629_v48 = vrot.slane %v627_v36, 4  ;;  %v632_v50 = vrot.slane %v630_v37, 5  ;;  %v1427_v51 = vld [vmem:[%s1657_s19 + $0xac] sm:$0x1] }
  0x43   : > { %817 = vrot.lane.b32.xlu1 %v1445_v12, %s1612_s25  ;;  %v926_v12 = vrot.slane %v924_v1, 5  ;;  %v1425_v52 = vld [vmem:[%s1657_s19 + $0xa4] sm:$0x1]  ;;  %v1435_v53 = vld [vmem:[%s1657_s19 + $0xcc] sm:$0x1]  ;;  %v699_v54 = vrot.slane %v697_v40, 4 }
  0x44   : > { %815 = vrot.lane.b32.xlu0 %v1444_v15, %s1612_s25  ;;  %v937_v15 = vrot.slane %v935_v5, 4  ;;  %v1433_v56 = vld [vmem:[%s1657_s19 + $0xc4] sm:$0x1]  ;;  %v650_v60 = vshll.u32 %v1427_v51, 16  ;;  %v633_v61 = vor.u32 %v632_v50, %v629_v48  ;;  %v636_v62 = vshll.u32 %v1425_v52, 16 }
  0x45   : > { %v927_v18 = vor.u32 %v926_v12, %v923_v10  ;;  %v1415_v63 = vld [vmem:[%s1657_s19 + $0xf0] sm:$0xf]  ;;  %v1414_v0 = vld [vmem:[%s1657_s19 + $0xe8] sm:$0xf]  ;;  %v706_v1 = vshll.u32 %v1435_v53, 16  ;;  %v692_v2 = vshll.u32 %v1433_v56, 16 }
  0x46   : > { %v941_v49 = vor.u32 %v940_v16, %v937_v15  ;;  %v652_v6 = vrot.slane %v650_v60, 5  ;;  %v634_v7 = vrot.slane %v633_v61, 4  ;;  %v638_v8 = vrot.slane %v636_v62, 5  ;;  %v1419_v9 = vld [vmem:[%s1657_s19 + $0x110] sm:$0xf] }
  0x47   : > { %825 = vrot.lane.b32.xlu1 %v1449_v24, %s1612_s25  ;;  %v928_v24 = vrot.slane %v927_v18, 4  ;;  %v1418_v10 = vld [vmem:[%s1657_s19 + $0x108] sm:$0xf]  ;;  %v708_v12 = vrot.slane %v706_v1, 5  ;;  %v1456_v16 = vld [vmem:[%s1657_s19 + $0x18] sm:$0xf] }
  0x48   : > { %823 = vrot.lane.b32.xlu0 %v1448_v25, %s1612_s25  ;;  %v942_v25 = vrot.slane %v941_v49, 4  ;;  %v1458_v17 = vld [vmem:[%s1657_s19 + $0x20] sm:$0xf]  ;;  %v893_v11 = vshrl.u32 %v1456_v16, 16  ;;  %v896_v18 = vshll.u32 %v1456_v16, 16  ;;  %v639_v49 = vsel %vm1679_vm2, %v634_v7, %v638_v8 }
  0x49   : > { %v933_v26 = vsel %vm1679_vm2, %v928_v24, %v932_v20  ;;  %v907_v20 = vshrl.u32 %v1458_v17, 16  ;;  %v910_v22 = vshll.u32 %v1458_v17, 16  ;;  %v1459_v30 = vld [vmem:[%s1657_s19 + $0x24] sm:$0x1]  ;;  %v1466_v36 = vld [vmem:[%s1657_s19 + $0x40] sm:$0xf] }
  0x4a   : > { %v947_v32 = vsel %vm1679_vm2, %v942_v25, %v946_v19  ;;  %988 = vst.msk [vmem:[#allocation2 + $0x24] sm:$0xf] %vm253_vm3, %v933_v26  ;;  %v895_v19 = vrot.slane %v893_v11, 4  ;;  %v898_v24 = vrot.slane %v896_v18, 5  ;;  %v966_v40 = vshll.u32 %v1466_v36, 16 }
  0x4b   : > { %287 = vrot.lane.b32.xlu1 %v1399_v34, %s1605_s20  ;;  %989 = vst.msk [vmem:[#allocation2 + $0x2c] sm:$0xf] %vm253_vm3, %v947_v32  ;;  %v1432_v34 = vld [vmem:[%s1657_s19 + $0xc0] sm:$0xf]  ;;  %v909_v25 = vrot.slane %v907_v20, 4  ;;  %v912_v26 = vrot.slane %v910_v22, 5 }
  0x4c   : > { %285 = vrot.lane.b32.xlu0 %v1398_v35, %s1605_s20  ;;  %v644_v35 = vshll.u32 %v1426_v29, 16  ;;  %v683_v42 = vshrl.u32 %v1432_v34, 16  ;;  %v686_v43 = vshll.u32 %v1432_v34, 16  ;;  %v1457_v29 = vld [vmem:[%s1657_s19 + $0x1c] sm:$0x1]  ;;  %v899_v33 = vor.u32 %v898_v24, %v895_v19 }
  0x4d   : > { %v1464_v32 = vld [vmem:[%s1657_s19 + $0x38] sm:$0xf]  ;;  %v902_v34 = vshll.u32 %v1457_v29, 16  ;;  %v913_v21 = vor.u32 %v912_v26, %v909_v25  ;;  %v1443_v1 = vld [vmem:[%s1657_s19 + $0x40] sm:$0xf] }
  0x4e   : > { %v646_v47 = vrot.slane %v644_v35, 5  ;;  %v685_v57 = vrot.slane %v683_v42, 4  ;;  %v688_v58 = vrot.slane %v686_v43, 5  ;;  %v916_v35 = vshll.u32 %v1459_v30, 16  ;;  %v1450_v7 = vld [vmem:[%s1657_s19 + $0x80] sm:$0xf] }
  0x4f   : > { %295 = vrot.lane.b32.xlu1 %v1403_v55, %s1605_s20  ;;  %v702_v55 = vrot.slane %v700_v41, 5  ;;  %v949_v37 = vshrl.u32 %v1464_v32, 16  ;;  %v900_v41 = vrot.slane %v899_v33, 4  ;;  %v904_v42 = vrot.slane %v902_v34, 5 }
  0x50   : > { %293 = vrot.lane.b32.xlu0 %v1402_v3, %s1605_s20  ;;  %v647_v59 = vor.u32 %v646_v47, %v643_v46  ;;  %v689_v4 = vor.u32 %v688_v58, %v685_v57  ;;  %v914_v43 = vrot.slane %v913_v21, 4  ;;  %v1467_v46 = vld [vmem:[%s1657_s19 + $0x44] sm:$0x1]  ;;  %v1439_v57 = vld [vmem:[%s1657_s19 + $0x20] sm:$0xf] }
  0x51   : > { %v703_v3 = vor.u32 %v702_v55, %v699_v54  ;;  %v951_v47 = vrot.slane %v949_v37, 4  ;;  %v905_v50 = vsel %vm1679_vm2, %v900_v41, %v904_v42  ;;  %v968_v55 = vrot.slane %v966_v40, 5  ;;  %v1438_v58 = vld [vmem:[%s1657_s19 + $0x18] sm:$0xf] }
  0x52   : > { %v648_v5 = vrot.slane %v647_v59, 4  ;;  %v690_v15 = vrot.slane %v689_v4, 4  ;;  %986 = vst.msk [vmem:[#allocation2 + $0x14] sm:$0xf] %vm253_vm3, %v905_v50  ;;  %v972_v56 = vshll.u32 %v1467_v46, 16 }
  0x53   : > { %451 = vrot.lane.b32.xlu1 %v388_v44, %s1608_s22  ;;  %v1411_v44 = vld [vmem:[%s1657_s19 + $0xc8] sm:$0xf]  ;;  %v704_v14 = vrot.slane %v703_v3, 4  ;;  %v1574_v42 = vld [vmem:[#allocation2 + $0x24] ss:$8 sps:$4 sm:$0xff]  }
  0x54   : > { %449 = vrot.lane.b32.xlu0 %v374_v13, %s1608_s22  ;;  %v694_v13 = vrot.slane %v692_v2, 5  ;;  %v653_v23 = vsel %vm1679_vm2, %v648_v5, %v652_v6  ;;  %v974_v62 = vrot.slane %v972_v56, 5  ;;  %v1442_v2 = vld [vmem:[%s1657_s19 + $0x38] sm:$0xf]  ;;  %v1447_v4 = vld [vmem:[%s1657_s19 + $0x68] sm:$0xf]  ;;  %1488 = vmatprep.mubr.msk.bf16.mxu1 %vm1115_vm11, %v1574_v42 }
  0x55   : > { %v1446_v5 = vld [vmem:[%s1657_s19 + $0x60] sm:$0xf]  ;;  %v1451_v6 = vld [vmem:[%s1657_s19 + $0x88] sm:$0xf] }
  0x57   : > { %459 = vrot.lane.b32.xlu1 %v444_v27, %s1608_s22  ;;  %v709_v27 = vsel %vm1679_vm2, %v704_v14, %v708_v12 }
  0x58   : > { %457 = vrot.lane.b32.xlu0 %v430_v28, %s1608_s22  ;;  %v695_v28 = vsel %vm1679_vm2, %v690_v15, %v694_v13 }
  0x5b   : > { %503 = vrot.lane.b32.xlu1 %v1407_v38, %s1606_s21  ;;  %v952_v38 = vshll.u32 %v1464_v32, 16 }
  0x5c   : > { %501 = vrot.lane.b32.xlu0 %v1406_v39, %s1606_s21  ;;  %v963_v39 = vshrl.u32 %v1466_v36, 16 }
  0x5d   : > { %v954_v48 = vrot.slane %v952_v38, 5  ;;  %v1571_v38 = vld [vmem:[#allocation2 + $0x4] ss:$8 sps:$4 sm:$0xff]  }
  0x5e   : > { %v965_v53 = vrot.slane %v963_v39, 4  ;;  %1486 = vmatprep.mubr.msk.bf16.mxu0 %vm1115_vm11, %v1571_v38 }
  0x5f   : > { %511 = vrot.lane.b32.xlu1 %v1411_v44, %s1606_s21  ;;  %v918_v44 = vrot.slane %v916_v35, 5  ;;  %v955_v54 = vor.u32 %v954_v48, %v951_v47 }
  0x60   : > { %509 = vrot.lane.b32.xlu0 %v1410_v45, %s1606_s21  ;;  %v1465_v45 = vld [vmem:[%s1657_s19 + $0x3c] sm:$0x1]  ;;  %v969_v61 = vor.u32 %v968_v55, %v965_v53  ;;  %s1500_s21 = sshll.u32 %s2063_s12, 5 }
  0x61   : > { %v919_v51 = vsel %vm1679_vm2, %v914_v43, %v918_v44  ;;  %v958_v52 = vshll.u32 %v1465_v45, 16  ;;  %v956_v60 = vrot.slane %v955_v54, 4  ;;  %s2025_s27 = scalar_lea.vmem %s2055_s3, %s1500_s21 }
  0x62   : > { %987 = vst.msk [vmem:[#allocation2 + $0x1c] sm:$0xf] %vm253_vm3, %v919_v51 }
  0x63   : > { %555 = vrot.lane.b32.xlu1 %v1415_v63, %s1609_s4  ;;  %v960_v59 = vrot.slane %v958_v52, 5 }
  0x64   : > { %553 = vrot.lane.b32.xlu0 %v1414_v0, %s1609_s4  ;;  %v970_v0 = vrot.slane %v969_v61, 4 }
  0x65   : > { %v961_v63 = vsel %vm1679_vm2, %v956_v60, %v960_v59 }
  0x66   : > { %990 = vst.msk [vmem:[#allocation2 + $0x34] sm:$0xf] %vm253_vm3, %v961_v63  ;;  %v975_v3 = vsel %vm1679_vm2, %v970_v0, %v974_v62 }
  0x67   : > { %563 = vrot.lane.b32.xlu1 %v1419_v9, %s1609_s4  ;;  %991 = vst.msk [vmem:[#allocation2 + $0x3c] sm:$0xf] %vm253_vm3, %v975_v3 }
  0x68   : > { %561 = vrot.lane.b32.xlu0 %v1418_v10, %s1609_s4 }
  0x6b   : > { %716 = vrot.lane.b32.xlu1 %v653_v23, %s1610_s9 }
  0x6c   : > { %714 = vrot.lane.b32.xlu0 %v639_v49, %s1610_s9 }
  0x6f   : > { %724 = vrot.lane.b32.xlu1 %v709_v27, %s1610_s9 }
  0x70   : > { %722 = vrot.lane.b32.xlu0 %v695_v28, %s1610_s9 }
  0x73   : > { %769 = vrot.lane.b32.xlu1 %v1439_v57, %s1611_s18 }
  0x74   : > { %767 = vrot.lane.b32.xlu0 %v1438_v58, %s1611_s18 }
  0x77   : > { %777 = vrot.lane.b32.xlu1 %v1443_v1, %s1611_s18 }
  0x78   : > { %775 = vrot.lane.b32.xlu0 %v1442_v2, %s1611_s18 }
  0x7b   : > { %821 = vrot.lane.b32.xlu1 %v1447_v4, %s1612_s25  ;;  %v1575_v4 = vld [vmem:[#allocation2 + $0x14] ss:$8 sps:$4 sm:$0xff]  }
  0x7c   : > { %819 = vrot.lane.b32.xlu0 %v1446_v5, %s1612_s25 }
  0x7f   : > { %829 = vrot.lane.b32.xlu1 %v1451_v6, %s1612_s25  ;;  %v1578_v6 = vld [vmem:[#allocation2 + $0x34] ss:$8 sps:$4 sm:$0xff]  }
  0x80   : > { %827 = vrot.lane.b32.xlu0 %v1450_v7, %s1612_s25 }
  0x85   : > { %v290_v31 = vpop.permute.xlu1 %289 }
  0x86   : > { %v282_v8 = vpop.permute.xlu0 %281  ;;  %310 = vst.msk [vmem:[#allocation2 + $0x20] sm:$0xf] %vm305_vm4, %v290_v31  ;;  %v1468_v31 = vld [vmem:[%s2054_s2] ss:$0 sm:$0xff] }
  0x87   : > { %306 = vst.msk [vmem:[#allocation2] sm:$0xf] %vm305_vm4, %v282_v8 }
  0x89   : > { %v292_v9 = vpop.permute.xlu1 %291 }
  0x8a   : > { %v284_v10 = vpop.permute.xlu0 %283  ;;  %311 = vst.msk [vmem:[#allocation2 + $0x28] sm:$0xf] %vm305_vm4, %v292_v9 }
  0x8b   : > { %307 = vst.msk [vmem:[#allocation2 + $0x8] sm:$0xf] %vm305_vm4, %v284_v10 }
  0x8d   : > { %v500_v12 = vpop.permute.xlu1 %499 }
  0x8e   : > { %v498_v13 = vpop.permute.xlu0 %497 }
  0x91   : > { %v448_v14 = vpop.permute.xlu1 %447 }
  0x92   : > { %v446_v15 = vpop.permute.xlu0 %445  ;;  %471 = vst.msk [vmem:[#allocation2 + $0x8] sm:$0xf] %vm469_vm5, %v448_v14 }
  0x93   : > { %470 = vst.msk [vmem:[#allocation2] sm:$0xf] %vm469_vm5, %v446_v15 }
  0x94   : > { %522 = vst.msk [vmem:[#allocation2] sm:$0xf] %vm521_vm6, %v498_v13  ;;  %523 = vst.msk [vmem:[#allocation2 + $0x8] sm:$0xf] %vm521_vm6, %v500_v12 }
  0x95   : > { %v456_v16 = vpop.permute.xlu1 %455 }
  0x96   : > { %v454_v17 = vpop.permute.xlu0 %453  ;;  %475 = vst.msk [vmem:[#allocation2 + $0x28] sm:$0xf] %vm469_vm5, %v456_v16 }
  0x97   : > { %474 = vst.msk [vmem:[#allocation2 + $0x20] sm:$0xf] %vm469_vm5, %v454_v17 }
  0x99   : > { %v508_v11 = vpop.permute.xlu1 %507 }
  0x9a   : > { %v506_v18 = vpop.permute.xlu0 %505  ;;  %527 = vst.msk [vmem:[#allocation2 + $0x28] sm:$0xf] %vm521_vm6, %v508_v11 }
  0x9b   : > { %526 = vst.msk [vmem:[#allocation2 + $0x20] sm:$0xf] %vm521_vm6, %v506_v18 }
  0x9d   : > { %v552_v20 = vpop.permute.xlu1 %551 }
  0x9e   : > { %v550_v22 = vpop.permute.xlu0 %549  ;;  %575 = vst.msk [vmem:[#allocation2 + $0x8] sm:$0xf] %vm573_vm7, %v552_v20 }
  0x9f   : > { %574 = vst.msk [vmem:[#allocation2] sm:$0xf] %vm573_vm7, %v550_v22 }
  0xa1   : > { %v560_v23 = vpop.permute.xlu1 %559 }
  0xa2   : > { %v558_v49 = vpop.permute.xlu0 %557  ;;  %579 = vst.msk [vmem:[#allocation2 + $0x28] sm:$0xf] %vm573_vm7, %v560_v23 }
  0xa3   : > { %578 = vst.msk [vmem:[#allocation2 + $0x20] sm:$0xf] %vm573_vm7, %v558_v49 }
  0xa5   : > { %v713_v19 = vpop.permute.xlu1 %712 }
  0xa6   : > { %v711_v24 = vpop.permute.xlu0 %710  ;;  %736 = vst.msk [vmem:[#allocation2 + $0x8] sm:$0xf] %vm734_vm8, %v713_v19 }
  0xa7   : > { %735 = vst.msk [vmem:[#allocation2] sm:$0xf] %vm734_vm8, %v711_v24 }
  0xa9   : > { %v721_v25 = vpop.permute.xlu1 %720 }
  0xaa   : > { %v719_v26 = vpop.permute.xlu0 %718  ;;  %740 = vst.msk [vmem:[#allocation2 + $0x28] sm:$0xf] %vm734_vm8, %v721_v25 }
  0xab   : > { %739 = vst.msk [vmem:[#allocation2 + $0x20] sm:$0xf] %vm734_vm8, %v719_v26 }
  0xad   : > { %v766_v27 = vpop.permute.xlu1 %765 }
  0xae   : > { %v764_v28 = vpop.permute.xlu0 %763  ;;  %789 = vst.msk [vmem:[#allocation2 + $0x8] sm:$0xf] %vm787_vm9, %v766_v27 }
  0xaf   : > { %788 = vst.msk [vmem:[#allocation2] sm:$0xf] %vm787_vm9, %v764_v28 }
  0xb1   : > { %v774_v29 = vpop.permute.xlu1 %773 }
  0xb2   : > { %v772_v30 = vpop.permute.xlu0 %771  ;;  %793 = vst.msk [vmem:[#allocation2 + $0x28] sm:$0xf] %vm787_vm9, %v774_v29 }
  0xb3   : > { %792 = vst.msk [vmem:[#allocation2 + $0x20] sm:$0xf] %vm787_vm9, %v772_v30 }
  0xb5   : > { %v818_v32 = vpop.permute.xlu1 %817 }
  0xb6   : > { %v816_v33 = vpop.permute.xlu0 %815  ;;  %841 = vst.msk [vmem:[#allocation2 + $0x8] sm:$0xf] %vm839_vm10, %v818_v32 }
  0xb7   : > { %840 = vst.msk [vmem:[#allocation2] sm:$0xf] %vm839_vm10, %v816_v33 }
  0xb9   : > { %v826_v34 = vpop.permute.xlu1 %825 }
  0xba   : > { %v824_v21 = vpop.permute.xlu0 %823  ;;  %845 = vst.msk [vmem:[#allocation2 + $0x28] sm:$0xf] %vm839_vm10, %v826_v34 }
  0xbb   : > { %844 = vst.msk [vmem:[#allocation2 + $0x20] sm:$0xf] %vm839_vm10, %v824_v21 }
  0xbd   : > { %v288_v35 = vpop.permute.xlu1 %287 }
  0xbe   : > { %v286_v36 = vpop.permute.xlu0 %285  ;;  %v1569_v37 = vld [vmem:[#allocation2] ss:$8 sps:$4 sm:$0xff]   ;;  %309 = vst.msk [vmem:[#allocation2 + $0x18] sm:$0xf] %vm305_vm4, %v288_v35 }
  0xbf   : > { %308 = vst.msk [vmem:[#allocation2 + $0x10] sm:$0xf] %vm305_vm4, %v286_v36  ;;  %1161 = vmatmul.mubr.bf16.vlgmr.msra.gmra.mrb[0].mxu0 %v1569_v37 }
  0xc0   : > { %1487 = vmatprep.mubr.msk.bf16.mxu0 %vm1115_vm11, %v1575_v4 }
  0xc1   : > { %v296_v39 = vpop.permute.xlu1 %295 }
  0xc2   : > { %v294_v40 = vpop.permute.xlu0 %293  ;;  %v1572_v41 = vld [vmem:[#allocation2 + $0x20] ss:$8 sps:$4 sm:$0xff]   ;;  %313 = vst.msk [vmem:[#allocation2 + $0x38] sm:$0xf] %vm305_vm4, %v296_v39 }
  0xc3   : > { %312 = vst.msk [vmem:[#allocation2 + $0x30] sm:$0xf] %vm305_vm4, %v294_v40  ;;  %1177 = vmatmul.mubr.bf16.vlgmr.msra.gmra.mrb[0].mxu1 %v1572_v41 }
  0xc4   : > { %1489 = vmatprep.mubr.msk.bf16.mxu1 %vm1115_vm11, %v1578_v6 }
  0xc5   : > { %v452_v43 = vpop.permute.xlu1 %451 }
  0xc6   : > { %v450_v44 = vpop.permute.xlu0 %449  ;;  %473 = vst.msk [vmem:[#allocation2 + $0x18] sm:$0xf] %vm469_vm5, %v452_v43 }
  0xc7   : > { %472 = vst.msk [vmem:[#allocation2 + $0x10] sm:$0xf] %vm469_vm5, %v450_v44 }
  0xc9   : > { %v460_v45 = vpop.permute.xlu1 %459 }
  0xca   : > { %v458_v46 = vpop.permute.xlu0 %457  ;;  %477 = vst.msk [vmem:[#allocation2 + $0x38] sm:$0xf] %vm469_vm5, %v460_v45 }
  0xcb   : > { %476 = vst.msk [vmem:[#allocation2 + $0x30] sm:$0xf] %vm469_vm5, %v458_v46 }
  0xcd   : > { %v504_v47 = vpop.permute.xlu1 %503 }
  0xce   : > { %v502_v48 = vpop.permute.xlu0 %501  ;;  %525 = vst.msk [vmem:[#allocation2 + $0x18] sm:$0xf] %vm521_vm6, %v504_v47 }
  0xcf   : > { %524 = vst.msk [vmem:[#allocation2 + $0x10] sm:$0xf] %vm521_vm6, %v502_v48 }
  0xd1   : > { %v512_v50 = vpop.permute.xlu1 %511 }
  0xd2   : > { %v510_v51 = vpop.permute.xlu0 %509  ;;  %529 = vst.msk [vmem:[#allocation2 + $0x38] sm:$0xf] %vm521_vm6, %v512_v50 }
  0xd3   : > { %528 = vst.msk [vmem:[#allocation2 + $0x30] sm:$0xf] %vm521_vm6, %v510_v51 }
  0xd5   : > { %v556_v52 = vpop.permute.xlu1 %555 }
  0xd6   : > { %v554_v53 = vpop.permute.xlu0 %553  ;;  %577 = vst.msk [vmem:[#allocation2 + $0x18] sm:$0xf] %vm573_vm7, %v556_v52 }
  0xd7   : > { %576 = vst.msk [vmem:[#allocation2 + $0x10] sm:$0xf] %vm573_vm7, %v554_v53 }
  0xd9   : > { %v564_v54 = vpop.permute.xlu1 %563 }
  0xda   : > { %v562_v55 = vpop.permute.xlu0 %561  ;;  %581 = vst.msk [vmem:[#allocation2 + $0x38] sm:$0xf] %vm573_vm7, %v564_v54 }
  0xdb   : > { %580 = vst.msk [vmem:[#allocation2 + $0x30] sm:$0xf] %vm573_vm7, %v562_v55 }
  0xdd   : > { %v717_v56 = vpop.permute.xlu1 %716 }
  0xde   : > { %v715_v57 = vpop.permute.xlu0 %714  ;;  %738 = vst.msk [vmem:[#allocation2 + $0x18] sm:$0xf] %vm734_vm8, %v717_v56 }
  0xdf   : > { %737 = vst.msk [vmem:[#allocation2 + $0x10] sm:$0xf] %vm734_vm8, %v715_v57 }
  0xe1   : > { %v725_v58 = vpop.permute.xlu1 %724 }
  0xe2   : > { %v723_v59 = vpop.permute.xlu0 %722  ;;  %742 = vst.msk [vmem:[#allocation2 + $0x38] sm:$0xf] %vm734_vm8, %v725_v58 }
  0xe3   : > { %741 = vst.msk [vmem:[#allocation2 + $0x30] sm:$0xf] %vm734_vm8, %v723_v59 }
  0xe5   : > { %v770_v60 = vpop.permute.xlu1 %769 }
  0xe6   : > { %v768_v61 = vpop.permute.xlu0 %767  ;;  %791 = vst.msk [vmem:[#allocation2 + $0x18] sm:$0xf] %vm787_vm9, %v770_v60 }
  0xe7   : > { %790 = vst.msk [vmem:[#allocation2 + $0x10] sm:$0xf] %vm787_vm9, %v768_v61 }
  0xe9   : > { %v778_v62 = vpop.permute.xlu1 %777 }
  0xea   : > { %v776_v63 = vpop.permute.xlu0 %775  ;;  %795 = vst.msk [vmem:[#allocation2 + $0x38] sm:$0xf] %vm787_vm9, %v778_v62 }
  0xeb   : > { %794 = vst.msk [vmem:[#allocation2 + $0x30] sm:$0xf] %vm787_vm9, %v776_v63 }
  0xed   : > { %v822_v0 = vpop.permute.xlu1 %821 }
  0xee   : > { %v820_v1 = vpop.permute.xlu0 %819  ;;  %843 = vst.msk [vmem:[#allocation2 + $0x18] sm:$0xf] %vm839_vm10, %v822_v0 }
  0xef   : > { %842 = vst.msk [vmem:[#allocation2 + $0x10] sm:$0xf] %vm839_vm10, %v820_v1 }
  0xf1   : > { %v830_v2 = vpop.permute.xlu1 %829 }
  0xf2   : > { %v828_v3 = vpop.permute.xlu0 %827  ;;  %847 = vst.msk [vmem:[#allocation2 + $0x38] sm:$0xf] %vm839_vm10, %v830_v2 }
  0xf3   : > { %846 = vst.msk [vmem:[#allocation2 + $0x30] sm:$0xf] %vm839_vm10, %v828_v3 }
  0xf6   : > { %v1577_v5 = vld [vmem:[#allocation2 + $0x10] ss:$8 sps:$4 sm:$0xff]  }
  0xf7   : > { %1169 = vmatmul.mubr.bf16.gmra.mrb[4].mxu0 %v1577_v5 }
  0xfa   : > { %v1580_v7 = vld [vmem:[#allocation2 + $0x30] ss:$8 sps:$4 sm:$0xff]  }
  0xfb   : > { %1185 = vmatmul.mubr.bf16.gmra.mrb[4].mxu1 %v1580_v7 }
 0x192   : > { %v1162_v8 = vpop.f32.mrb[0].mxu0 }
 0x193   : > { %v1163_v9 = vadd.f32 %v1468_v31, %v1162_v8  ;;  %v1164_v10 = vpop.f32.mrb[1].mxu0 }
 0x194   : > { %v1165_v12 = vpop.f32.mrb[2].mxu0 }
 0x195   : > { %v1193_v13 = vmax.f32 %v1163_v9, 0.0  ;;  %v1166_v14 = vadd.f32 %v1468_v31, %v1165_v12  ;;  %v1167_v15 = vpop.f32.mrb[3].mxu0 }
 0x196   : > { %v1178_v16 = vpop.f32.mrb[0].mxu1 }
 0x197   : > { %v1501_v17 = vpack.c.bf16 %v1193_v13, %v1193_v13  ;;  %v1194_v11 = vmax.f32 %v1166_v14, 0.0  ;;  %v1179_v18 = vadd.f32 %v1468_v31, %v1178_v16  ;;  %v1180_v20 = vpop.f32.mrb[1].mxu1 }
 0x198   : > { %v1181_v22 = vpop.f32.mrb[2].mxu1 }
 0x199   : > { %1234 = vst.msk [vmem:[%s2025_s27] sm:$0xf] %vm1233_vm12, %v1501_v17  ;;  %v1502_v23 = vpack.c.bf16 %v1194_v11, %v1194_v11  ;;  %v1197_v49 = vmax.f32 %v1179_v18, 0.0  ;;  %v1182_v19 = vadd.f32 %v1468_v31, %v1181_v22  ;;  %v1183_v24 = vpop.f32.mrb[3].mxu1 }
 0x19b   : > { %1235 = vst.msk [vmem:[%s2025_s27 + $0x4] sm:$0xf] %vm1233_vm12, %v1502_v23  ;;  %v1505_v25 = vpack.c.bf16 %v1197_v49, %v1197_v49  ;;  %v1198_v26 = vmax.f32 %v1182_v19, 0.0 }
 0x19d   : > { %1238 = vst.msk [vmem:[%s2025_s27 + $0x10] sm:$0xf] %vm1233_vm12, %v1505_v25  ;;  %v1506_v27 = vpack.c.bf16 %v1198_v26, %v1198_v26 }
 0x19f   : > { %1239 = vst.msk [vmem:[%s2025_s27 + $0x14] sm:$0xf] %vm1233_vm12, %v1506_v27 }
 0x1ca   : > { %v1170_v28 = vpop.f32.mrb[4].mxu0 }
 0x1cb   : > { %v1171_v29 = vadd.f32 %v1468_v31, %v1170_v28  ;;  %v1172_v30 = vpop.f32.mrb[5].mxu0 }
 0x1cc   : > { %v1173_v32 = vpop.f32.mrb[6].mxu0 }
 0x1cd   : > { %v1195_v33 = vmax.f32 %v1171_v29, 0.0  ;;  %v1174_v34 = vadd.f32 %v1468_v31, %v1173_v32  ;;  %v1175_v21 = vpop.f32.mrb[7].mxu0 }
 0x1ce   : > { %v1186_v35 = vpop.f32.mrb[4].mxu1 }
 0x1cf   : > { %v1503_v36 = vpack.c.bf16 %v1195_v33, %v1195_v33  ;;  %v1196_v37 = vmax.f32 %v1174_v34, 0.0  ;;  %v1187_v38 = vadd.f32 %v1468_v31, %v1186_v35  ;;  %v1188_v39 = vpop.f32.mrb[5].mxu1 }
 0x1d0   : > { %v1189_v40 = vpop.f32.mrb[6].mxu1 }
 0x1d1   : > { %1236 = vst.msk [vmem:[%s2025_s27 + $0x8] sm:$0xf] %vm1233_vm12, %v1503_v36  ;;  %v1504_v41 = vpack.c.bf16 %v1196_v37, %v1196_v37  ;;  %v1199_v42 = vmax.f32 %v1187_v38, 0.0  ;;  %v1190_v43 = vadd.f32 %v1468_v31, %v1189_v40  ;;  %v1191_v44 = vpop.f32.mrb[7].mxu1 }
 0x1d3   : > { %1237 = vst.msk [vmem:[%s2025_s27 + $0xc] sm:$0xf] %vm1233_vm12, %v1504_v41  ;;  %v1507_v45 = vpack.c.bf16 %v1199_v42, %v1199_v42  ;;  %v1200_v46 = vmax.f32 %v1190_v43, 0.0 }
 0x1d5   : > { %1240 = vst.msk [vmem:[%s2025_s27 + $0x18] sm:$0xf] %vm1233_vm12, %v1507_v45  ;;  %v1508_v47 = vpack.c.bf16 %v1200_v46, %v1200_v46 }
 0x1d7   : > { %1241 = vst.msk [vmem:[%s2025_s27 + $0x1c] sm:$0xf] %vm1233_vm12, %v1508_v47 }
 0x1d8 PF: > { %s13_s14 = sadd.s32 1, %s1603_s14   ;;  %s2058_s12 = smov %s1599_s13 }
 0x1d9   : > { %p10_p5 = scmp.ge.s32.totalorder %s13_s14, 4   ;;  %s2059_s13 = smov %s2061_s15 }
 0x1db   :  { %12 = sbr.rel (!%p10_p5) target bundleno = 2 (0x2), region = 74 }

// kernel: _lambda_.7
= control target key start
LH: loop header
LB: loop body
LE: loop exit
PB: predicated region body
PF: predicated region fallthrough
CT: control target
= control target key end

     0   :  { %s2156_s15 = smov 0   ;;  %s2158_s16 = smov 0   ;;  %s2769_s0 = inlined_call_operand.vmem [shape: bf16[2,1,10,10,32], index: 0, kind: input, shape index: {}]   ;;  %s2770_s1 = inlined_call_operand.vmem [shape: bf16[288,32], index: 1, kind: input, shape index: {}]   ;;  %s2771_s2 = inlined_call_operand.vmem [shape: f32[1,32], index: 2, kind: input, shape index: {}]   ;;  %s2772_s3 = inlined_call_operand.vmem [shape: bf16[2,64,32], index: 3, kind: input, shape index: {}]   ;;  %s2773_s4 = inlined_call_operand.vmem [shape: bf16[2,64,32], index: 4, kind: output, shape index: {}]  }
   0x1   :  { %s2160_s17 = smov 0  }
   0x2 LB: > { %s33_s18 = sadd.s32 1, %s2122_s16  ;;  %p1785_p0 = scmp.ge.s32.totalorder %s2126_s17, 1  ;;  %s2126_s17 = sphi %s2160_s17, %s14_s17   ;;  %s2122_s16 = sphi %s2158_s16, %s2779_s16   ;;  %s2118_s15 = sphi %s2156_s15, %s2778_s15  }
   0x3   : > { %p35_p1 = scmp.ge.s32.totalorder %s33_s18, 2  ;;  %p224_p2 = scmp.lt.s32.totalorder %s2126_s17, 3 }
   0x5   : > { %s2781_s18 = smov (%p35_p1, %s33_s18), 0  ;;  %p225_p3 = pnand %p1785_p0, %p224_p2 }
   0x6   : > { %p276_p4 = scmp.lt.s32.totalorder (!%p225_p3), %s2118_s15, 1  ;;  %vm532_vm0 = vcmask (!%p225_p3), 1042432   ;;  %vm533_vm1 = vcmask (!%p225_p3), 1046532   ;;  %v2071_v1 = vld [vmem:[%s2770_s1 + $0x40] sm:$0xff] (!%p225_p3)   ;;  %v2073_v3 = vld [vmem:[%s2770_s1 + $0x48] sm:$0xff] (!%p225_p3)   ;;  %v2075_v5 = vld [vmem:[%s2770_s1 + $0x50] sm:$0xff] (!%p225_p3)  }
   0x7   : > { %228 = sbr.rel (%p225_p3) target bundleno = 466 (0x1d2), region = 36  ;;  %vm2176_vm2 = vmor (!%p225_p3), %vm532_vm0, %vm533_vm1  ;;  %v2072_v2 = vld [vmem:[%s2770_s1] sm:$0xff] (!%p225_p3)   ;;  %1969 = vmatprep.subr.bf16.mxu0 (!%p225_p3), %v2071_v1  ;;  %2027 = vmatprep.subr.bf16.mxu1 (!%p225_p3), %v2071_v1  ;;  %v2074_v4 = vld [vmem:[%s2770_s1 + $0x8] sm:$0xff] (!%p225_p3)   ;;  %vm352_vm3 = vsmask.f32 (!%p225_p3), 3328  ;;  %s2128_s7 = smov (!%p225_p3), 64  }
   0x8   : > { %1970 = vmatpush3.bf16.msra.mxu0 (!%p225_p3), %v2072_v2  ;;  %2035 = vmatpush3.bf16.msra.mxu1 (!%p225_p3), %v2072_v2  ;;  %vm353_vm4 = vsmask.f32 (!%p225_p3), 7440  ;;  %s2129_s8 = smov (!%p225_p3), 32   ;;  %v2076_v25 = vld [vmem:[%s2770_s1 + $0x10] sm:$0xff] (!%p225_p3)   ;;  %v2077_v31 = vld [vmem:[%s2770_s1 + $0x58] sm:$0xff] (!%p225_p3)   ;;  %v2079_v40 = vld [vmem:[%s2770_s1 + $0x60] sm:$0xff] (!%p225_p3)  }
   0x9   : > { %1971 = vmatprep.subr.bf16.mxu0 (!%p225_p3), %v2073_v3  ;;  %2028 = vmatprep.subr.bf16.mxu1 (!%p225_p3), %v2073_v3  ;;  %v2078_v35 = vld [vmem:[%s2770_s1 + $0x18] sm:$0xff] (!%p225_p3)   ;;  %s2130_s21 = smov (!%p225_p3), 96   ;;  %v2080_v49 = vld [vmem:[%s2770_s1 + $0x20] sm:$0xff] (!%p225_p3)   ;;  %vm2247_vm5 = vmor (!%p225_p3), %vm352_vm3, %vm353_vm4  ;;  %vm327_vm6 = vcmask (!%p225_p3), 257024   ;;  %vm491_vm7 = vcmask (!%p225_p3), 519424   ;;  %vm591_vm8 = vcmask (!%p225_p3), 781824  }
   0xa   : > { %v2081_v55 = vld [vmem:[%s2770_s1 + $0x68] sm:$0xff] (!%p225_p3)   ;;  %vm644_vm9 = vcmask (!%p225_p3), 1044224   ;;  %vm1412_vm10 = vcmask (!%p225_p3), 261120  }
   0xc   : > { %1972 = vmatpush3.bf16.msra.mxu0 (!%p225_p3), %v2074_v4  ;;  %2036 = vmatpush3.bf16.msra.mxu1 (!%p225_p3), %v2074_v4 }
   0xd   : > { %1973 = vmatprep.subr.bf16.mxu0 (!%p225_p3), %v2075_v5  ;;  %2029 = vmatprep.subr.bf16.mxu1 (!%p225_p3), %v2075_v5 }
   0xe   : > { %s2783_s15 = smov (!%p276_p4, %s2118_s15), 1 }
   0xf   : > { %s2043_s23 = smul.u32 80, %s2783_s15 }
  0x10   : > { %1974 = vmatpush3.bf16.msra.mxu0 %v2076_v25  ;;  %2037 = vmatpush3.bf16.msra.mxu1 %v2076_v25 }
  0x11   : > { %s2196_s30 = scalar_lea.vmem %s2769_s0, %s2043_s23  ;;  %1975 = vmatprep.subr.bf16.mxu0 %v2077_v31  ;;  %2030 = vmatprep.subr.bf16.mxu1 %v2077_v31 }
  0x12   : > { %v1847_v6 = vld [vmem:[%s2196_s30 + $0x10] sm:$0xf]  ;;  %v1823_v7 = vld [vmem:[%s2196_s30 + $0x8] sm:$0xe]  ;;  %v1824_v8 = vld [vmem:[%s2196_s30 + $0xc] sm:$0x1] }
  0x13   : > { %913 = vrot.lane.b32.xlu0 %v1847_v6, %s2128_s7  ;;  %v1839_v9 = vrot.slane %v1823_v7, 9  ;;  %v831_v10 = vrot.slane %v1824_v8, 5  ;;  %v500_v11 = vld [vmem:[%s2196_s30] sm:$0xe]  ;;  %v501_v12 = vld [vmem:[%s2196_s30 + $0x4] sm:$0x1] }
  0x14   : > { %v1791_v13 = vrot.slane %v500_v11, 9  ;;  %v537_v14 = vrot.slane %v501_v12, 5  ;;  %v1825_v15 = vld [vmem:[%s2196_s30 + $0x10] sm:$0xe]  ;;  %v1826_v16 = vld [vmem:[%s2196_s30 + $0x14] sm:$0x1]  ;;  %1976 = vmatpush3.bf16.msra.mxu0 %v2078_v35  ;;  %2038 = vmatpush3.bf16.msra.mxu1 %v2078_v35 }
  0x15   : > { %v832_v17 = vsel %vm2176_vm2, %v1839_v9, %v831_v10  ;;  %v1840_v18 = vrot.slane %v1825_v15, 9  ;;  %v835_v19 = vrot.slane %v1826_v16, 5  ;;  %v502_v20 = vld [vmem:[%s2196_s30 + $0x8] sm:$0xe]  ;;  %v503_v22 = vld [vmem:[%s2196_s30 + $0xc] sm:$0x1]  ;;  %1977 = vmatprep.subr.bf16.mxu0 %v2079_v40  ;;  %2031 = vmatprep.subr.bf16.mxu1 %v2079_v40 }
  0x16   : > { %861 = vrot.lane.b32.xlu1 %v832_v17, %s2129_s8  ;;  %v538_v21 = vsel %vm2176_vm2, %v1791_v13, %v537_v14  ;;  %v1792_v23 = vrot.slane %v502_v20, 9  ;;  %v336_v24 = vld [vmem:[%s2196_s30] sm:$0xf]  ;;  %v541_v27 = vrot.slane %v503_v22, 5  ;;  %v337_v28 = vld [vmem:[%s2196_s30 + $0x4] sm:$0x1] }
  0x17   : > { %567 = vrot.lane.b32.xlu0 %v538_v21, %s2128_s7  ;;  %v836_v26 = vsel %vm2176_vm2, %v1840_v18, %v835_v19  ;;  %v356_v29 = vshrl.u32 %v336_v24, 16  ;;  %v359_v30 = vshll.u32 %v336_v24, 16  ;;  %v1799_v32 = vld [vmem:[%s2196_s30 + $0x8] sm:$0xf]  ;;  %v365_v33 = vshll.u32 %v337_v28, 16  ;;  %v2083_v20 = vld [vmem:[%s2770_s1 + $0x70] sm:$0xff]  }
  0x18   : > { %v338_v34 = vld [vmem:[%s2196_s30 + $0x8] sm:$0xf]  ;;  %v339_v38 = vld [vmem:[%s2196_s30 + $0xc] sm:$0x1]  ;;  %v542_v44 = vsel %vm2176_vm2, %v1792_v23, %v541_v27  ;;  %v1855_v47 = vld [vmem:[%s2196_s30 + $0x10] sm:$0xf]  ;;  %1978 = vmatpush3.bf16.msra.mxu0 %v2080_v49  ;;  %2039 = vmatpush3.bf16.msra.mxu1 %v2080_v49 }
  0x19   : > { %v358_v36 = vrot.slane %v356_v29, 4  ;;  %v361_v37 = vrot.slane %v359_v30, 5  ;;  %v370_v39 = vshrl.u32 %v338_v34, 16  ;;  %v367_v41 = vrot.slane %v365_v33, 5  ;;  %v1856_v48 = vld [vmem:[%s2196_s30 + $0x14] sm:$0x1]  ;;  %1979 = vmatprep.subr.bf16.mxu0 %v2081_v55  ;;  %2032 = vmatprep.subr.bf16.mxu1 %v2081_v55 }
  0x1a   : > { %863 = vrot.lane.b32.xlu1 %v836_v26, %s2129_s8  ;;  %v373_v42 = vshll.u32 %v338_v34, 16  ;;  %v379_v43 = vshll.u32 %v339_v38, 16  ;;  %v962_v52 = vshrl.u32 %v1855_v47, 16  ;;  %v965_v53 = vshll.u32 %v1855_v47, 16  ;;  %v1857_v54 = vld [vmem:[%s2196_s30 + $0x18] sm:$0xf] }
  0x1b   : > { %620 = vrot.lane.b32.xlu0 %v1799_v32, %s2130_s21  ;;  %v362_v45 = vor.u32 %v361_v37, %v358_v36  ;;  %v372_v46 = vrot.slane %v370_v39, 4  ;;  %v1848_v57 = vld [vmem:[%s2196_s30 + $0x18] sm:$0xf]  ;;  %v971_v58 = vshll.u32 %v1856_v48, 16  ;;  %v1858_v59 = vld [vmem:[%s2196_s30 + $0x1c] sm:$0x1] }
  0x1c   : > { %v375_v51 = vrot.slane %v373_v42, 5  ;;  %v976_v60 = vshrl.u32 %v1857_v54, 16  ;;  %v979_v61 = vshll.u32 %v1857_v54, 16  ;;  %v381_v63 = vrot.slane %v379_v43, 5  ;;  %v348_v3 = vld [vmem:[%s2196_s30 + $0x30] sm:$0xf] }
  0x1d   : > { %v363_v56 = vrot.slane %v362_v45, 4  ;;  %v964_v1 = vrot.slane %v962_v52, 4  ;;  %v967_v2 = vrot.slane %v965_v53, 5  ;;  %v985_v7 = vshll.u32 %v1858_v59, 16  ;;  %v349_v8 = vld [vmem:[%s2196_s30 + $0x34] sm:$0x1] }
  0x1e   : > { %569 = vrot.lane.b32.xlu1 %v542_v44, %s2128_s7  ;;  %v376_v62 = vor.u32 %v375_v51, %v372_v46  ;;  %v978_v5 = vrot.slane %v976_v60, 4  ;;  %v981_v6 = vrot.slane %v979_v61, 5  ;;  %v973_v11 = vrot.slane %v971_v58, 5  ;;  %v350_v13 = vld [vmem:[%s2196_s30 + $0x38] sm:$0xf]  ;;  %v2082_v14 = vld [vmem:[%s2770_s1 + $0x28] sm:$0xff]  }
  0x1f   : > { %v368_v4 = vsel %vm2247_vm5, %v363_v56, %v367_v41  ;;  %v968_v10 = vor.u32 %v967_v2, %v964_v1  ;;  %v440_v12 = vshrl.u32 %v348_v3, 16  ;;  %v443_v16 = vshll.u32 %v348_v3, 16  ;;  %v351_v18 = vld [vmem:[%s2196_s30 + $0x3c] sm:$0x1]  ;;  %v1800_v25 = vld [vmem:[%s2196_s30 + $0x10] sm:$0xf]  ;;  %1980 = vmatpush3.bf16.msra.mxu0 %v2082_v14  ;;  %2040 = vmatpush3.bf16.msra.mxu1 %v2082_v14 }
  0x20   : > { %467 = vrot.lane.b32.xlu0 %v368_v4, %s2129_s8  ;;  %v377_v9 = vrot.slane %v376_v62, 4  ;;  %v982_v15 = vor.u32 %v981_v6, %v978_v5  ;;  %v449_v17 = vshll.u32 %v349_v8, 16  ;;  %v454_v19 = vshrl.u32 %v350_v13, 16  ;;  %v2084_v32 = vld [vmem:[%s2770_s1 + $0x30] sm:$0xff]   ;;  %1981 = vmatprep.subr.bf16.mxu0 %v2083_v20  ;;  %v2085_v36 = vld [vmem:[%s2770_s1 + $0x78] sm:$0xff]  }
  0x21   : > { %v969_v22 = vrot.slane %v968_v10, 4  ;;  %v442_v23 = vrot.slane %v440_v12, 4  ;;  %v457_v24 = vshll.u32 %v350_v13, 16  ;;  %v987_v27 = vrot.slane %v985_v7, 5  ;;  %v1835_v38 = vld [vmem:[%s2196_s30 + $0x38] sm:$0xe]  ;;  %2033 = vmatprep.subr.bf16.mxu1 %v2083_v20 }
  0x22   : > { %915 = vrot.lane.b32.xlu1 %v1848_v57, %s2128_s7  ;;  %v382_v21 = vsel %vm2247_vm5, %v377_v9, %v381_v63  ;;  %v983_v26 = vrot.slane %v982_v15, 4  ;;  %v445_v28 = vrot.slane %v443_v16, 5  ;;  %v456_v29 = vrot.slane %v454_v19, 4  ;;  %v1836_v39 = vld [vmem:[%s2196_s30 + $0x3c] sm:$0x1] }
  0x23   : > { %v459_v30 = vrot.slane %v457_v24, 5  ;;  %v463_v31 = vshll.u32 %v351_v18, 16  ;;  %v974_v33 = vsel %vm2247_vm5, %v969_v22, %v973_v11  ;;  %v451_v35 = vrot.slane %v449_v17, 5  ;;  %v1837_v43 = vld [vmem:[%s2196_s30 + $0x40] sm:$0xe]  ;;  %1982 = vmatpush3.bf16.msra.mxu0 %v2084_v32  ;;  %v2086_v47 = vld [vmem:[%s2770_s1 + $0x38] sm:$0xff]   ;;  %2041 = vmatpush3.bf16.msra.mxu1 %v2084_v32 }
  0x24   : > { %469 = vrot.lane.b32.xlu0 %v382_v21, %s2129_s8  ;;  %v446_v34 = vor.u32 %v445_v28, %v442_v23  ;;  %v988_v40 = vsel %vm2247_vm5, %v983_v26, %v987_v27  ;;  %v1838_v45 = vld [vmem:[%s2196_s30 + $0x44] sm:$0x1]  ;;  %v512_v46 = vld [vmem:[%s2196_s30 + $0x30] sm:$0xe]  ;;  %v1845_v49 = vrot.slane %v1835_v38, 9  ;;  %v855_v51 = vrot.slane %v1836_v39, 5  ;;  %1983 = vmatprep.subr.bf16.mxu0 %v2085_v36 }
  0x25   : > { %v460_v37 = vor.u32 %v459_v30, %v456_v29  ;;  %v465_v42 = vrot.slane %v463_v31, 5  ;;  %v513_v52 = vld [vmem:[%s2196_s30 + $0x34] sm:$0x1]  ;;  %v1867_v53 = vld [vmem:[%s2196_s30 + $0x40] sm:$0xf]  ;;  %2034 = vmatprep.subr.bf16.mxu1 %v2085_v36  ;;  %v1846_v56 = vrot.slane %v1837_v43, 9 }
  0x26   : > { %622 = vrot.lane.b32.xlu1 %v1800_v25, %s2130_s21  ;;  %v447_v41 = vrot.slane %v446_v34, 4  ;;  %v1869_v54 = vld [vmem:[%s2196_s30 + $0x48] sm:$0xf]  ;;  %v859_v57 = vrot.slane %v1838_v45, 5  ;;  %v1797_v58 = vrot.slane %v512_v46, 9  ;;  %v1046_v61 = vshrl.u32 %v1867_v53, 16 }
  0x27   : > { %v461_v44 = vrot.slane %v460_v37, 4  ;;  %v514_v59 = vld [vmem:[%s2196_s30 + $0x38] sm:$0xe]  ;;  %v515_v60 = vld [vmem:[%s2196_s30 + $0x3c] sm:$0x1]  ;;  %v1049_v62 = vshll.u32 %v1867_v53, 16  ;;  %1984 = vmatpush3.bf16.msra.mxu0 %v2086_v47  ;;  %v856_v1 = vsel %vm2176_vm2, %v1845_v49, %v855_v51  ;;  %2042 = vmatpush3.bf16.msra.mxu1 %v2086_v47 }
  0x28   : > { %1073 = vrot.lane.b32.xlu0 %v974_v33, %s2130_s21  ;;  %v452_v48 = vsel %vm2247_vm5, %v447_v41, %v451_v35  ;;  %v340_v63 = vld [vmem:[%s2196_s30 + $0x10] sm:$0xf]  ;;  %v561_v2 = vrot.slane %v513_v52, 5  ;;  %v1060_v3 = vshrl.u32 %v1869_v54, 16  ;;  %v1063_v4 = vshll.u32 %v1869_v54, 16 }
  0x29   : > { %v466_v55 = vsel %vm2247_vm5, %v461_v44, %v465_v42  ;;  %v384_v5 = vshrl.u32 %v340_v63, 16  ;;  %v387_v6 = vshll.u32 %v340_v63, 16  ;;  %v860_v7 = vsel %vm2176_vm2, %v1846_v56, %v859_v57  ;;  %v1868_v10 = vld [vmem:[%s2196_s30 + $0x44] sm:$0x1]  ;;  %v1870_v11 = vld [vmem:[%s2196_s30 + $0x4c] sm:$0x1] }
  0x2a   : > { %1075 = vrot.lane.b32.xlu1 %v988_v40, %s2130_s21  ;;  %v1798_v8 = vrot.slane %v514_v59, 9  ;;  %v565_v9 = vrot.slane %v515_v60, 5  ;;  %v1048_v12 = vrot.slane %v1046_v61, 4  ;;  %v1051_v13 = vrot.slane %v1049_v62, 5  ;;  %v342_v14 = vld [vmem:[%s2196_s30 + $0x18] sm:$0xf] }
  0x2b   : > { %v562_v15 = vsel %vm2176_vm2, %v1797_v58, %v561_v2  ;;  %v1062_v16 = vrot.slane %v1060_v3, 4  ;;  %v1065_v17 = vrot.slane %v1063_v4, 5  ;;  %v341_v18 = vld [vmem:[%s2196_s30 + $0x14] sm:$0x1]  ;;  %v1055_v19 = vshll.u32 %v1868_v10, 16 }
  0x2c   : > { %479 = vrot.lane.b32.xlu0 %v452_v48, %s2129_s8  ;;  %v1069_v20 = vshll.u32 %v1870_v11, 16  ;;  %v386_v21 = vrot.slane %v384_v5, 4  ;;  %v389_v22 = vrot.slane %v387_v6, 5  ;;  %v343_v23 = vld [vmem:[%s2196_s30 + $0x1c] sm:$0x1]  ;;  %v566_v24 = vsel %vm2176_vm2, %v1798_v8, %v565_v9 }
  0x2d   : > { %v398_v25 = vshrl.u32 %v342_v14, 16  ;;  %v401_v26 = vshll.u32 %v342_v14, 16  ;;  %v1052_v27 = vor.u32 %v1051_v13, %v1048_v12  ;;  %v393_v28 = vshll.u32 %v341_v18, 16  ;;  %v1853_v29 = vld [vmem:[%s2196_s30 + $0x40] sm:$0xf] }
  0x2e   : > { %481 = vrot.lane.b32.xlu1 %v466_v55, %s2129_s8  ;;  %v1854_v30 = vld [vmem:[%s2196_s30 + $0x48] sm:$0xf]  ;;  %v1066_v31 = vor.u32 %v1065_v17, %v1062_v16  ;;  %v407_v32 = vshll.u32 %v343_v23, 16  ;;  %v1057_v33 = vrot.slane %v1055_v19, 5  ;;  %v2328_v34 = vrot.slane %v1069_v20, 5 }
  0x2f   : > { %v390_v35 = vor.u32 %v389_v22, %v386_v21  ;;  %v2331_v36 = vld [vmem:[%s2196_s30 + $0x18] sm:$0xe]  ;;  %v2334_v37 = vld [vmem:[%s2196_s30 + $0x1c] sm:$0x1]  ;;  %v400_v39 = vrot.slane %v398_v25, 4  ;;  %v403_v40 = vrot.slane %v401_v26, 5 }
  0x30   : > { %873 = vrot.lane.b32.xlu0 %v856_v1, %s2129_s8  ;;  %v1805_v38 = vld [vmem:[%s2196_s30 + $0x38] sm:$0xf]  ;;  %v2338_v41 = vld [vmem:[%s2196_s30 + $0x20] sm:$0xe]  ;;  %v1053_v43 = vrot.slane %v1052_v27, 4  ;;  %v2342_v44 = vrot.slane %v393_v28, 5 }
  0x31   : > { %v1859_v42 = vld [vmem:[%s2196_s30 + $0x20] sm:$0xf]  ;;  %v1861_v47 = vld [vmem:[%s2196_s30 + $0x28] sm:$0xf]  ;;  %v1067_v49 = vrot.slane %v1066_v31, 4  ;;  %v2346_v51 = vrot.slane %v407_v32, 5  ;;  %v404_v60 = vor.u32 %v403_v40, %v400_v39 }
  0x32   : > { %875 = vrot.lane.b32.xlu1 %v860_v7, %s2129_s8  ;;  %v990_v45 = vshrl.u32 %v1859_v42, 16  ;;  %v993_v46 = vshll.u32 %v1859_v42, 16  ;;  %v1806_v48 = vld [vmem:[%s2196_s30 + $0x40] sm:$0xf]  ;;  %v1004_v52 = vshrl.u32 %v1861_v47, 16  ;;  %v1007_v53 = vshll.u32 %v1861_v47, 16 }
  0x33   : > { %v391_v54 = vrot.slane %v390_v35, 4  ;;  %v1841_v55 = vrot.slane %v2331_v36, 9  ;;  %v839_v56 = vrot.slane %v2334_v37, 5  ;;  %v2352_v57 = vld [vmem:[%s2196_s30 + $0x24] sm:$0x1]  ;;  %v1842_v58 = vrot.slane %v2338_v41, 9 }
  0x34   : > { %579 = vrot.lane.b32.xlu0 %v562_v15, %s2128_s7  ;;  %v344_v59 = vld [vmem:[%s2196_s30 + $0x20] sm:$0xf]  ;;  %v2357_v61 = vld [vmem:[%s2196_s30 + $0x10] sm:$0xe]  ;;  %v1860_v62 = vld [vmem:[%s2196_s30 + $0x24] sm:$0x1]  ;;  %v1058_v9 = vsel %vm2247_vm5, %v1053_v43, %v1057_v33  ;;  %v1072_v10 = vsel %vm2247_vm5, %v1067_v49, %v2328_v34 }
  0x35   : > { %v992_v63 = vrot.slane %v990_v45, 4  ;;  %v1862_v1 = vld [vmem:[%s2196_s30 + $0x2c] sm:$0x1]  ;;  %v412_v2 = vshrl.u32 %v344_v59, 16  ;;  %v2363_v3 = vld [vmem:[%s2196_s30 + $0x14] sm:$0x1] }
  0x36   : > { %581 = vrot.lane.b32.xlu1 %v566_v24, %s2128_s7  ;;  %v995_v4 = vrot.slane %v993_v46, 5  ;;  %v1006_v5 = vrot.slane %v1004_v52, 4  ;;  %v1009_v6 = vrot.slane %v1007_v53, 5  ;;  %v415_v7 = vshll.u32 %v344_v59, 16  ;;  %v346_v8 = vld [vmem:[%s2196_s30 + $0x28] sm:$0xf] }
  0x37   : > { %v2372_v11 = vld [vmem:[%s2196_s30 + $0x18] sm:$0xe]  ;;  %v345_v12 = vld [vmem:[%s2196_s30 + $0x24] sm:$0x1]  ;;  %v426_v13 = vshrl.u32 %v346_v8, 16  ;;  %v429_v14 = vshll.u32 %v346_v8, 16 }
  0x38   : > { %925 = vrot.lane.b32.xlu0 %v1853_v29, %s2128_s7  ;;  %v999_v15 = vshll.u32 %v1860_v62, 16  ;;  %v1013_v16 = vshll.u32 %v1862_v1, 16  ;;  %v414_v17 = vrot.slane %v412_v2, 4  ;;  %v417_v18 = vrot.slane %v415_v7, 5  ;;  %v347_v19 = vld [vmem:[%s2196_s30 + $0x2c] sm:$0x1] }
  0x39   : > { %v405_v20 = vrot.slane %v404_v60, 4  ;;  %v843_v21 = vrot.slane %v2352_v57, 5  ;;  %v507_v22 = vld [vmem:[%s2196_s30 + $0x1c] sm:$0x1]  ;;  %v428_v23 = vrot.slane %v426_v13, 4  ;;  %v431_v24 = vrot.slane %v429_v14, 5 }
  0x3a   : > { %927 = vrot.lane.b32.xlu1 %v1854_v30, %s2128_s7  ;;  %v1793_v25 = vrot.slane %v2357_v61, 9  ;;  %v996_v26 = vor.u32 %v995_v4, %v992_v63  ;;  %v1010_v27 = vor.u32 %v1009_v6, %v1006_v5  ;;  %v421_v28 = vshll.u32 %v345_v12, 16  ;;  %v2387_v33 = vld [vmem:[%s2196_s30 + $0x28] sm:$0xe]  ;;  %v2395_v40 = vld [vmem:[%s2196_s30 + $0x2c] sm:$0x1] }
  0x3b   : > { %v396_v29 = vsel %vm2247_vm5, %v391_v54, %v2342_v44  ;;  %v545_v30 = vrot.slane %v2363_v3, 5  ;;  %v1794_v31 = vrot.slane %v2372_v11, 9  ;;  %v435_v32 = vshll.u32 %v347_v19, 16  ;;  %v2400_v42 = vld [vmem:[%s2770_s1 + $0x80] sm:$0xff]   ;;  %v2406_v45 = vld [vmem:[%s2196_s30 + $0x30] sm:$0xe] }
  0x3c   : > { %632 = vrot.lane.b32.xlu0 %v1805_v38, %s2130_s21  ;;  %v549_v34 = vrot.slane %v507_v22, 5  ;;  %v2390_v35 = vrot.slane %v999_v15, 5  ;;  %v2392_v38 = vrot.slane %v1013_v16, 5  ;;  %v418_v39 = vor.u32 %v417_v18, %v414_v17  ;;  %v2409_v46 = vld [vmem:[%s2196_s30 + $0x34] sm:$0x1]  ;;  %2015 = vmatprep.subr.bf16.mxu1 %v2400_v42 }
  0x3d   : > { %v410_v43 = vsel %vm2247_vm5, %v405_v20, %v2346_v51  ;;  %v432_v44 = vor.u32 %v431_v24, %v428_v23  ;;  %v2412_v47 = vld [vmem:[%s2196_s30 + $0x20] sm:$0xe]  ;;  %v2417_v49 = vrot.slane %v1010_v27, 4  ;;  %v2419_v52 = vrot.slane %v421_v28, 5  ;;  %v2423_v54 = vld [vmem:[%s2196_s30 + $0x24] sm:$0x1] }
  0x3e   : > { %634 = vrot.lane.b32.xlu1 %v1806_v48, %s2130_s21  ;;  %v2415_v48 = vrot.slane %v996_v26, 4  ;;  %v1843_v53 = vrot.slane %v2387_v33, 9  ;;  %v840_v51 = vsel %vm2176_vm2, %v1841_v55, %v839_v56  ;;  %v2432_v57 = vrot.slane %v435_v32, 5  ;;  %v2436_v60 = vld [vmem:[%s2196_s30 + $0x28] sm:$0xe] }
  0x3f   : > { %v847_v59 = vrot.slane %v2395_v40, 5  ;;  %v2439_v61 = vld [vmem:[%s2196_s30 + $0x2c] sm:$0x1]  ;;  %v2442_v37 = vrot.slane %v418_v39, 4  ;;  %v1844_v36 = vrot.slane %v2406_v45, 9  ;;  %v851_v55 = vrot.slane %v2409_v46, 5 }
  0x40   : > { %1085 = vrot.lane.b32.xlu0 %v1058_v9, %s2130_s21  ;;  %v1795_v56 = vrot.slane %v2412_v47, 9  ;;  %v844_v62 = vsel %vm2176_vm2, %v1842_v58, %v843_v21  ;;  %v2451_v63 = vrot.slane %v432_v44, 4  ;;  %v553_v1 = vrot.slane %v2423_v54, 5  ;;  %v1863_v2 = vld [vmem:[%s2196_s30 + $0x30] sm:$0xf] }
  0x41   : > { %v1807_v3 = vld [vmem:[%s2196_s30 + $0x8] sm:$0xf]  ;;  %v1796_v4 = vrot.slane %v2436_v60, 9  ;;  %v557_v5 = vrot.slane %v2439_v61, 5  ;;  %v1864_v6 = vld [vmem:[%s2196_s30 + $0x34] sm:$0x1]  ;;  %v546_v7 = vsel %vm2176_vm2, %v1793_v25, %v545_v30  ;;  %v550_v58 = vsel %vm2176_vm2, %v1794_v31, %v549_v34 }
  0x42   : > { %1087 = vrot.lane.b32.xlu1 %v1072_v10, %s2130_s21  ;;  %v1808_v41 = vld [vmem:[%s2196_s30 + $0xc] sm:$0x1]  ;;  %v2466_v8 = vld [vmem:[%s2196_s30 + $0x38] sm:$0xf]  ;;  %v670_v9 = vshrl.u32 %v1807_v3, 16  ;;  %v673_v10 = vshll.u32 %v1807_v3, 16 }
  0x43   : > { %v1809_v11 = vld [vmem:[%s2196_s30 + $0x10] sm:$0xf]  ;;  %v1018_v12 = vshrl.u32 %v1863_v2, 16  ;;  %v1021_v13 = vshll.u32 %v1863_v2, 16  ;;  %v679_v14 = vshll.u32 %v1808_v41, 16  ;;  %v1027_v18 = vshll.u32 %v1864_v6, 16 }
  0x44   : > { %471 = vrot.lane.b32.xlu0 %v396_v29, %s2129_s8  ;;  %v1810_v15 = vld [vmem:[%s2196_s30 + $0x14] sm:$0x1]  ;;  %v684_v16 = vshrl.u32 %v1809_v11, 16  ;;  %v1849_v17 = vld [vmem:[%s2196_s30 + $0x20] sm:$0xf]  ;;  %v672_v19 = vrot.slane %v670_v9, 4 }
  0x45   : > { %v675_v20 = vrot.slane %v673_v10, 5  ;;  %v687_v21 = vshll.u32 %v1809_v11, 16  ;;  %v1032_v22 = vshrl.u32 %v2466_v8, 16  ;;  %v1035_v23 = vshll.u32 %v2466_v8, 16  ;;  %v1850_v26 = vld [vmem:[%s2196_s30 + $0x28] sm:$0xf] }
  0x46   : > { %473 = vrot.lane.b32.xlu1 %v410_v43, %s2129_s8  ;;  %v686_v24 = vrot.slane %v684_v16, 4  ;;  %v693_v25 = vshll.u32 %v1810_v15, 16  ;;  %v681_v28 = vrot.slane %v679_v14, 5  ;;  %v319_v30 = vld [vmem:[%s2196_s30] sm:$0xf]  ;;  %v2478_v31 = vrot.slane %v1018_v12, 4 }
  0x47   : > { %v676_v27 = vor.u32 %v675_v20, %v672_v19  ;;  %v689_v29 = vrot.slane %v687_v21, 5  ;;  %v2480_v32 = vrot.slane %v1021_v13, 5  ;;  %328 = vst.msk [vmem:[#allocation2] sm:$0xf] %vm327_vm6, %v319_v30  ;;  %v1801_v34 = vld [vmem:[%s2196_s30 + $0x18] sm:$0xf]  ;;  %v1002_v10 = vsel %vm2247_vm5, %v2415_v48, %v2390_v35 }
  0x48   : > { %865 = vrot.lane.b32.xlu0 %v840_v51, %s2129_s8  ;;  %v695_v44 = vrot.slane %v693_v25, 5  ;;  %v320_v51 = vld [vmem:[%s2196_s30 + $0x8] sm:$0xf]  ;;  %v2488_v2 = vrot.slane %v1027_v18, 5  ;;  %v2491_v3 = vld [vmem:[%s2196_s30 + $0x3c] sm:$0x1] }
  0x49   : > { %v677_v39 = vrot.slane %v676_v27, 4  ;;  %v690_v43 = vor.u32 %v689_v29, %v686_v24  ;;  %329 = vst.msk [vmem:[#allocation2 + $0xc] sm:$0xf] %vm327_vm6, %v320_v51  ;;  %v326_v9 = vld [vmem:[%s2196_s30 + $0x38] sm:$0xf]  ;;  %v1041_v13 = vshll.u32 %v2491_v3, 16  ;;  %v424_v24 = vsel %vm2247_vm5, %v2442_v37, %v2419_v52 }
  0x4a   : > { %867 = vrot.lane.b32.xlu1 %v844_v62, %s2129_s8  ;;  %v1802_v62 = vld [vmem:[%s2196_s30 + $0x20] sm:$0xf]  ;;  %335 = vst.msk [vmem:[#allocation2 + $0x54] sm:$0xf] %vm327_vm6, %v326_v9  ;;  %v1819_v11 = vld [vmem:[%s2196_s30 + $0x38] sm:$0xf]  ;;  %v438_v27 = vsel %vm2247_vm5, %v2451_v63, %v2432_v57  ;;  %v1024_v8 = vor.u32 %v2480_v32, %v2478_v31 }
  0x4b   : > { %v682_v6 = vsel %vm2247_vm5, %v677_v39, %v681_v28  ;;  %v691_v41 = vrot.slane %v690_v43, 4  ;;  %v1820_v12 = vld [vmem:[%s2196_s30 + $0x3c] sm:$0x1]  ;;  %v754_v14 = vshrl.u32 %v1819_v11, 16  ;;  %v757_v15 = vshll.u32 %v1819_v11, 16 }
  0x4c   : > { %571 = vrot.lane.b32.xlu0 %v546_v7, %s2128_s7  ;;  %789 = vst.msk [vmem:[#allocation2 + $0x4] sm:$0xf] %vm327_vm6, %v682_v6  ;;  %v763_v16 = vshll.u32 %v1820_v12, 16  ;;  %v1821_v18 = vld [vmem:[%s2196_s30 + $0x40] sm:$0xf]  ;;  %v2520_v48 = vrot.slane %v1032_v22, 4  ;;  %v852_v11 = vsel %vm2176_vm2, %v1844_v36, %v851_v55 }
  0x4d   : > { %v696_v7 = vsel %vm2247_vm5, %v691_v41, %v695_v44  ;;  %v1822_v35 = vld [vmem:[%s2196_s30 + $0x44] sm:$0x1]  ;;  %v756_v19 = vrot.slane %v754_v14, 4  ;;  %v759_v20 = vrot.slane %v757_v15, 5  ;;  %v768_v21 = vshrl.u32 %v1821_v18, 16 }
  0x4e   : > { %573 = vrot.lane.b32.xlu1 %v550_v58, %s2128_s7  ;;  %v325_v58 = vld [vmem:[%s2196_s30 + $0x30] sm:$0xf]  ;;  %790 = vst.msk [vmem:[#allocation2 + $0x10] sm:$0xf] %vm327_vm6, %v696_v7  ;;  %v777_v22 = vshll.u32 %v1822_v35, 16  ;;  %v765_v40 = vrot.slane %v763_v16, 5  ;;  %v554_v16 = vsel %vm2176_vm2, %v1795_v56, %v553_v1 }
  0x4f   : > { %334 = vst.msk [vmem:[#allocation2 + $0x48] sm:$0xf] %vm327_vm6, %v325_v58  ;;  %v321_v25 = vld [vmem:[%s2196_s30 + $0x10] sm:$0xf]  ;;  %v760_v52 = vor.u32 %v759_v20, %v756_v19  ;;  %v770_v37 = vrot.slane %v768_v21, 4  ;;  %v2572_v47 = vrot.slane %v1035_v23, 5 }
  0x50   : > { %917 = vrot.lane.b32.xlu0 %v1849_v17, %s2128_s7  ;;  %v1016_v17 = vsel %vm2247_vm5, %v2417_v49, %v2392_v38  ;;  %v848_v38 = vsel %vm2176_vm2, %v1843_v53, %v847_v59  ;;  %v771_v49 = vshll.u32 %v1821_v18, 16  ;;  %330 = vst.msk [vmem:[#allocation2 + $0x18] sm:$0xf] %vm327_vm6, %v321_v25  ;;  %v1811_v33 = vld [vmem:[%s2196_s30 + $0x18] sm:$0xf]  ;;  %v779_v28 = vrot.slane %v777_v22, 5 }
  0x51   : > { %v1812_v53 = vld [vmem:[%s2196_s30 + $0x1c] sm:$0x1]  ;;  %v698_v29 = vshrl.u32 %v1811_v33, 16  ;;  %v701_v30 = vshll.u32 %v1811_v33, 16  ;;  %v761_v39 = vrot.slane %v760_v52, 4 }
  0x52   : > { %919 = vrot.lane.b32.xlu1 %v1850_v26, %s2128_s7  ;;  %v322_v26 = vld [vmem:[%s2196_s30 + $0x18] sm:$0xf]  ;;  %v773_v59 = vrot.slane %v771_v49, 5  ;;  %v707_v43 = vshll.u32 %v1812_v53, 16  ;;  %v1814_v57 = vld [vmem:[%s2196_s30 + $0x24] sm:$0x1] }
  0x53   : > { %331 = vst.msk [vmem:[#allocation2 + $0x24] sm:$0xf] %vm327_vm6, %v322_v26  ;;  %v703_v6 = vrot.slane %v701_v30, 5  ;;  %v721_v41 = vshll.u32 %v1814_v57, 16  ;;  %v766_v7 = vsel %vm2247_vm5, %v761_v39, %v765_v40  ;;  %v1871_v45 = vld [vmem:[%s2196_s30 + $0x10] sm:$0xe] }
  0x54   : > { %624 = vrot.lane.b32.xlu0 %v1801_v34, %s2130_s21  ;;  %v1813_v34 = vld [vmem:[%s2196_s30 + $0x20] sm:$0xf]  ;;  %v774_v51 = vor.u32 %v773_v59, %v770_v37  ;;  %v709_v58 = vrot.slane %v707_v43, 5  ;;  %795 = vst.msk [vmem:[#allocation2 + $0x4c] sm:$0xf] %vm327_vm6, %v766_v7  ;;  %v1887_v19 = vrot.slane %v1871_v45, 9  ;;  %v1038_v43 = vor.u32 %v2572_v47, %v2520_v48 }
  0x55   : > { %v712_v63 = vshrl.u32 %v1813_v34, 16  ;;  %v715_v44 = vshll.u32 %v1813_v34, 16  ;;  %v723_v15 = vrot.slane %v721_v41, 5  ;;  %v1873_v36 = vld [vmem:[%s2196_s30 + $0x18] sm:$0xe]  ;;  %v1025_v39 = vrot.slane %v1024_v8, 4 }
  0x56   : > { %626 = vrot.lane.b32.xlu1 %v1802_v62, %s2130_s21  ;;  %v700_v62 = vrot.slane %v698_v29, 4  ;;  %v775_v12 = vrot.slane %v774_v51, 4  ;;  %v1874_v35 = vld [vmem:[%s2196_s30 + $0x1c] sm:$0x1]  ;;  %v1888_v1 = vrot.slane %v1873_v36, 9 }
  0x57   : > { %v714_v9 = vrot.slane %v712_v63, 4  ;;  %v1143_v20 = vrot.slane %v1874_v35, 5  ;;  %v1875_v21 = vld [vmem:[%s2196_s30 + $0x20] sm:$0xe]  ;;  %v1876_v22 = vld [vmem:[%s2196_s30 + $0x24] sm:$0x1] }
  0x58   : > { %1077 = vrot.lane.b32.xlu0 %v1002_v10, %s2130_s21  ;;  %v717_v10 = vrot.slane %v715_v44, 5  ;;  %v704_v14 = vor.u32 %v703_v6, %v700_v62  ;;  %v780_v55 = vsel %vm2247_vm5, %v775_v12, %v779_v28  ;;  %v1877_v61 = vld [vmem:[%s2196_s30 + $0x28] sm:$0xe]  ;;  %v1878_v25 = vld [vmem:[%s2196_s30 + $0x2c] sm:$0x1]  ;;  %v1147_v31 = vrot.slane %v1876_v22, 5 }
  0x59   : > { %796 = vst.msk [vmem:[#allocation2 + $0x58] sm:$0xf] %vm327_vm6, %v780_v55  ;;  %v323_v32 = vld [vmem:[%s2196_s30 + $0x20] sm:$0xf]  ;;  %v1879_v26 = vld [vmem:[%s2196_s30 + $0x30] sm:$0xe] }
  0x5a   : > { %1079 = vrot.lane.b32.xlu1 %v1016_v17, %s2130_s21  ;;  %v718_v46 = vor.u32 %v717_v10, %v714_v9  ;;  %v1872_v17 = vld [vmem:[%s2196_s30 + $0x14] sm:$0x1]  ;;  %v705_v18 = vrot.slane %v704_v14, 4  ;;  %v1890_v52 = vrot.slane %v1877_v61, 9  ;;  %v1151_v40 = vrot.slane %v1878_v25, 5 }
  0x5b   : > { %v1139_v54 = vrot.slane %v1872_v17, 5  ;;  %332 = vst.msk [vmem:[#allocation2 + $0x30] sm:$0xf] %vm327_vm6, %v323_v32  ;;  %v1880_v37 = vld [vmem:[%s2196_s30 + $0x34] sm:$0x1]  ;;  %v1891_v28 = vrot.slane %v1879_v26, 9 }
  0x5c   : > { %475 = vrot.lane.b32.xlu0 %v424_v24, %s2129_s8  ;;  %v719_v56 = vrot.slane %v718_v46, 4  ;;  %v558_v24 = vsel %vm2176_vm2, %v1796_v4, %v557_v5  ;;  %v710_v23 = vsel %vm2247_vm5, %v705_v18, %v709_v58  ;;  %v1144_v4 = vsel %vm2176_vm2, %v1888_v1, %v1143_v20  ;;  %v1881_v33 = vld [vmem:[%s2196_s30 + $0x38] sm:$0xe]  ;;  %v1882_v59 = vld [vmem:[%s2196_s30 + $0x3c] sm:$0x1] }
  0x5d   : > { %v1140_v49 = vsel %vm2176_vm2, %v1887_v19, %v1139_v54  ;;  %791 = vst.msk [vmem:[#allocation2 + $0x1c] sm:$0xf] %vm327_vm6, %v710_v23  ;;  %v1889_v5 = vrot.slane %v1875_v21, 9  ;;  %1178 = vst.msk [vmem:[#allocation2 + $0x14] sm:$0xf] %vm327_vm6, %v1144_v4  ;;  %v1155_v29 = vrot.slane %v1880_v37, 5  ;;  %v1152_v57 = vsel %vm2176_vm2, %v1890_v52, %v1151_v40 }
  0x5e   : > { %477 = vrot.lane.b32.xlu1 %v438_v27, %s2129_s8  ;;  %v724_v60 = vsel %vm2247_vm5, %v719_v56, %v723_v15  ;;  %1177 = vst.msk [vmem:[#allocation2 + $0x8] sm:$0xf] %vm327_vm6, %v1140_v49  ;;  %v1852_v27 = vld [vmem:[%s2196_s30 + $0x38] sm:$0xf]  ;;  %v1892_v30 = vrot.slane %v1881_v33, 9  ;;  %v1159_v63 = vrot.slane %v1882_v59, 5  ;;  %v1030_v19 = vsel %vm2247_vm5, %v1025_v39, %v2488_v2 }
  0x5f   : > { %792 = vst.msk [vmem:[#allocation2 + $0x28] sm:$0xf] %vm327_vm6, %v724_v60  ;;  %v1148_v53 = vsel %vm2176_vm2, %v1889_v5, %v1147_v31  ;;  %v1803_v34 = vld [vmem:[%s2196_s30 + $0x28] sm:$0xf]  ;;  %v1883_v51 = vld [vmem:[%s2196_s30 + $0x40] sm:$0xe]  ;;  %v1156_v62 = vsel %vm2176_vm2, %v1891_v28, %v1155_v29 }
  0x60   : > { %869 = vrot.lane.b32.xlu0 %v848_v38, %s2129_s8  ;;  %v1851_v38 = vld [vmem:[%s2196_s30 + $0x30] sm:$0xf]  ;;  %1179 = vst.msk [vmem:[#allocation2 + $0x20] sm:$0xf] %vm327_vm6, %v1148_v53  ;;  %v324_v44 = vld [vmem:[%s2196_s30 + $0x28] sm:$0xf]  ;;  %v1160_v58 = vsel %vm2176_vm2, %v1892_v30, %v1159_v63 }
  0x61   : > { %1180 = vst.msk [vmem:[#allocation2 + $0x2c] sm:$0xf] %vm327_vm6, %v1152_v57  ;;  %333 = vst.msk [vmem:[#allocation2 + $0x3c] sm:$0xf] %vm327_vm6, %v324_v44  ;;  %v1884_v48 = vld [vmem:[%s2196_s30 + $0x44] sm:$0x1] }
  0x62   : > { %871 = vrot.lane.b32.xlu1 %v852_v11, %s2129_s8  ;;  %v1885_v6 = vld [vmem:[%s2196_s30 + $0x48] sm:$0xe]  ;;  %v1886_v41 = vld [vmem:[%s2196_s30 + $0x4c] sm:$0x1]  ;;  %v1804_v7 = vld [vmem:[%s2196_s30 + $0x30] sm:$0xf] }
  0x63   : > { %1181 = vst.msk [vmem:[#allocation2 + $0x38] sm:$0xf] %vm327_vm6, %v1156_v62  ;;  %v1893_v9 = vrot.slane %v1883_v51, 9  ;;  %v1163_v10 = vrot.slane %v1884_v48, 5  ;;  %v1894_v11 = vrot.slane %v1885_v6, 9  ;;  %v1043_v14 = vrot.slane %v1041_v13, 5 }
  0x64   : > { %575 = vrot.lane.b32.xlu0 %v554_v16, %s2128_s7  ;;  %v1815_v12 = vld [vmem:[%s2196_s30 + $0x28] sm:$0xf]  ;;  %1182 = vst.msk [vmem:[#allocation2 + $0x44] sm:$0xf] %vm327_vm6, %v1160_v58  ;;  %v1167_v15 = vrot.slane %v1886_v41, 5  ;;  %v1039_v17 = vrot.slane %v1038_v43, 4 }
  0x65   : > { %v1816_v16 = vld [vmem:[%s2196_s30 + $0x2c] sm:$0x1]  ;;  %v726_v46 = vshrl.u32 %v1815_v12, 16  ;;  %v729_v45 = vshll.u32 %v1815_v12, 16  ;;  %v1164_v36 = vsel %vm2176_vm2, %v1893_v9, %v1163_v10  ;;  %v1817_v18 = vld [vmem:[%s2196_s30 + $0x30] sm:$0xf] }
  0x66   : > { %577 = vrot.lane.b32.xlu1 %v558_v24, %s2128_s7  ;;  %v735_v55 = vshll.u32 %v1816_v16, 16  ;;  %v1168_v35 = vsel %vm2176_vm2, %v1894_v11, %v1167_v15  ;;  %1183 = vst.msk [vmem:[#allocation2 + $0x50] sm:$0xf] %vm327_vm6, %v1164_v36  ;;  %v1818_v54 = vld [vmem:[%s2196_s30 + $0x34] sm:$0x1]  ;;  %v740_v47 = vshrl.u32 %v1817_v18, 16  ;;  %v1044_v0 = vsel %vm2247_vm5, %v1039_v17, %v1043_v14 }
  0x67   : > { %v728_v3 = vrot.slane %v726_v46, 4  ;;  %v731_v13 = vrot.slane %v729_v45, 5  ;;  %1184 = vst.msk [vmem:[#allocation2 + $0x5c] sm:$0xf] %vm327_vm6, %v1168_v35  ;;  %v743_v56 = vshll.u32 %v1817_v18, 16  ;;  %v749_v21 = vshll.u32 %v1818_v54, 16 }
  0x68   : > { %921 = vrot.lane.b32.xlu0 %v1851_v38, %s2128_s7  ;;  %v737_v20 = vrot.slane %v735_v55, 5  ;;  %v742_v24 = vrot.slane %v740_v47, 4  ;;  %v2094_v11 = vld [vmem:[%s2770_s1 + $0x88] sm:$0xff]   ;;  %s1940_s8 = sshll.u32 %s2783_s15, 5 }
  0x69   : > { %v732_v1 = vor.u32 %v731_v13, %v728_v3  ;;  %v745_v38 = vrot.slane %v743_v56, 5  ;;  %v751_v2 = vrot.slane %v749_v21, 5  ;;  %v2096_v16 = vld [vmem:[#allocation2 + $0x20] ss:$12 sps:$4 sm:$0xff]   ;;  %s2734_s25 = scalar_lea.vmem %s2773_s4, %s1940_s8 }
  0x6a   : > { %923 = vrot.lane.b32.xlu1 %v1852_v27, %s2128_s7 }
  0x6b   : > { %v733_v8 = vrot.slane %v732_v1, 4  ;;  %v746_v23 = vor.u32 %v745_v38, %v742_v24  ;;  %v2097_v45 = vld [vmem:[#allocation2 + $0x38] ss:$12 sps:$4 sm:$0xff]  }
  0x6c   : > { %628 = vrot.lane.b32.xlu0 %v1803_v34, %s2130_s21 }
  0x6d   : > { %v738_v49 = vsel %vm2247_vm5, %v733_v8, %v737_v20  ;;  %v747_v22 = vrot.slane %v746_v23, 4 }
  0x6e   : > { %630 = vrot.lane.b32.xlu1 %v1804_v7, %s2130_s21  ;;  %793 = vst.msk [vmem:[#allocation2 + $0x34] sm:$0xf] %vm327_vm6, %v738_v49  ;;  %v2095_v7 = vld [vmem:[#allocation2 + $0x8] ss:$12 sps:$4 sm:$0xff]   ;;  %v2098_v55 = vld [vmem:[#allocation2 + $0x50] ss:$12 sps:$4 sm:$0xff]  }
  0x6f   : > { %v752_v61 = vsel %vm2247_vm5, %v747_v22, %v751_v2 }
  0x70   : > { %1081 = vrot.lane.b32.xlu0 %v1030_v19, %s2130_s21  ;;  %794 = vst.msk [vmem:[#allocation2 + $0x40] sm:$0xf] %vm327_vm6, %v752_v61 }
  0x72   : > { %1083 = vrot.lane.b32.xlu1 %v1044_v0, %s2130_s21  ;;  %s2720_s21 = scalar_lea.vmem %s2772_s3, %s1940_s8 }
  0x85   : > { %v914_v25 = vpop.permute.xlu0 %913 }
  0x88   : > { %v862_v60 = vpop.permute.xlu1 %861 }
  0x89   : > { %885 = vst.msk [vmem:[#allocation2 + $0x4] sm:$0xf] %vm491_vm7, %v862_v60  ;;  %v568_v4 = vpop.permute.xlu0 %567 }
  0x8a   : > { %937 = vst.msk [vmem:[#allocation2 + $0x4] sm:$0xf] %vm591_vm8, %v914_v25 }
  0x8c   : > { %v864_v5 = vpop.permute.xlu1 %863 }
  0x8d   : > { %886 = vst.msk [vmem:[#allocation2 + $0x10] sm:$0xf] %vm491_vm7, %v864_v5  ;;  %v621_v31 = vpop.permute.xlu0 %620 }
  0x90   : > { %v570_v32 = vpop.permute.xlu1 %569 }
  0x92   : > { %v468_v26 = vpop.permute.xlu0 %467 }
  0x93   : > { %492 = vst.msk [vmem:[#allocation2] sm:$0xf] %vm491_vm7, %v468_v26 }
  0x94   : > { %592 = vst.msk [vmem:[#allocation2] sm:$0xf] %vm591_vm8, %v568_v4  ;;  %v916_v50 = vpop.permute.xlu1 %915 }
  0x95   : > { %645 = vst.msk [vmem:[#allocation2] sm:$0xf] %vm644_vm9, %v621_v31 }
  0x96   : > { %938 = vst.msk [vmem:[#allocation2 + $0x10] sm:$0xf] %vm591_vm8, %v916_v50  ;;  %v470_v27 = vpop.permute.xlu0 %469 }
  0x97   : > { %493 = vst.msk [vmem:[#allocation2 + $0xc] sm:$0xf] %vm491_vm7, %v470_v27 }
  0x98   : > { %593 = vst.msk [vmem:[#allocation2 + $0xc] sm:$0xf] %vm591_vm8, %v570_v32  ;;  %v623_v52 = vpop.permute.xlu1 %622 }
  0x99   : > { %646 = vst.msk [vmem:[#allocation2 + $0xc] sm:$0xf] %vm644_vm9, %v623_v52 }
  0x9a   : > { %v1074_v40 = vpop.permute.xlu0 %1073 }
  0x9b   : > { %1097 = vst.msk [vmem:[#allocation2 + $0x4] sm:$0xf] %vm644_vm9, %v1074_v40 }
  0x9c   : > { %v1076_v37 = vpop.permute.xlu1 %1075 }
  0x9d   : > { %1098 = vst.msk [vmem:[#allocation2 + $0x10] sm:$0xf] %vm644_vm9, %v1076_v37  ;;  %v2725_v37 = vld [vmem:[%s2771_s2] ss:$0 sm:$0xff] }
  0x9e   : > { %v480_v33 = vpop.permute.xlu0 %479 }
  0x9f   : > { %498 = vst.msk [vmem:[#allocation2 + $0x48] sm:$0xf] %vm491_vm7, %v480_v33  ;;  %v1951_v33 = vld [vmem:[%s2720_s21] sm:$0xff]  }
  0xa0   : > { %v482_v53 = vpop.permute.xlu1 %481  ;;  %v2087_v29 = vld [vmem:[#allocation2] ss:$12 sps:$4 sm:$0xff]  }
  0xa1   : > { %499 = vst.msk [vmem:[#allocation2 + $0x54] sm:$0xf] %vm491_vm7, %v482_v53 }
  0xa2   : > { %v874_v59 = vpop.permute.xlu0 %873 }
  0xa3   : > { %891 = vst.msk [vmem:[#allocation2 + $0x4c] sm:$0xf] %vm491_vm7, %v874_v59 }
  0xa4   : > { %v876_v28 = vpop.permute.xlu1 %875  ;;  %v2089_v30 = vld [vmem:[#allocation2 + $0x4] ss:$12 sps:$4 sm:$0xff]  }
  0xa5   : > { %892 = vst.msk [vmem:[#allocation2 + $0x58] sm:$0xf] %vm491_vm7, %v876_v28  ;;  %1457 = vmatprep.mubr.bf16.mxu0 %v2089_v30  ;;  %v1952_v28 = vunpack.c.l.bf16 %v1951_v33 }
  0xa6   : > { %v580_v34 = vpop.permute.xlu0 %579  ;;  %1458 = vmatmul.mubr.bf16.vlgmr.msra.gmra.mrb[0].mxu0 %v2087_v29 }
  0xa7   : > { %598 = vst.msk [vmem:[#allocation2 + $0x48] sm:$0xf] %vm591_vm8, %v580_v34 }
  0xa8   : > { %v582_v39 = vpop.permute.xlu1 %581 }
  0xa9   : > { %599 = vst.msk [vmem:[#allocation2 + $0x54] sm:$0xf] %vm591_vm8, %v582_v39 }
  0xaa   : > { %v926_v43 = vpop.permute.xlu0 %925 }
  0xab   : > { %943 = vst.msk [vmem:[#allocation2 + $0x4c] sm:$0xf] %vm591_vm8, %v926_v43  ;;  %v1953_v43 = vunpack.c.h.bf16 %v1951_v33 }
  0xac   : > { %v928_v57 = vpop.permute.xlu1 %927 }
  0xad   : > { %944 = vst.msk [vmem:[#allocation2 + $0x58] sm:$0xf] %vm591_vm8, %v928_v57 }
  0xae   : > { %v633_v63 = vpop.permute.xlu0 %632 }
  0xaf   : > { %651 = vst.msk [vmem:[#allocation2 + $0x48] sm:$0xf] %vm644_vm9, %v633_v63 }
  0xb0   : > { %v635_v44 = vpop.permute.xlu1 %634 }
  0xb1   : > { %652 = vst.msk [vmem:[#allocation2 + $0x54] sm:$0xf] %vm644_vm9, %v635_v44 }
  0xb2   : > { %v1086_v51 = vpop.permute.xlu0 %1085 }
  0xb3   : > { %1103 = vst.msk [vmem:[#allocation2 + $0x4c] sm:$0xf] %vm644_vm9, %v1086_v51  ;;  %v1968_v51 = vld [vmem:[%s2720_s21 + $0x18] sm:$0xff]  }
  0xb4   : > { %v1088_v62 = vpop.permute.xlu1 %1087 }
  0xb5   : > { %1104 = vst.msk [vmem:[#allocation2 + $0x58] sm:$0xf] %vm644_vm9, %v1088_v62 }
  0xb6   : > { %v472_v48 = vpop.permute.xlu0 %471 }
  0xb7   : > { %494 = vst.msk [vmem:[#allocation2 + $0x18] sm:$0xf] %vm491_vm7, %v472_v48 }
  0xb8   : > { %v474_v6 = vpop.permute.xlu1 %473  ;;  %v2090_v9 = vld [vmem:[#allocation2 + $0x48] ss:$12 sps:$4 sm:$0xff]  }
  0xb9   : > { %495 = vst.msk [vmem:[#allocation2 + $0x24] sm:$0xf] %vm491_vm7, %v474_v6 }
  0xba   : > { %v866_v41 = vpop.permute.xlu0 %865 }
  0xbb   : > { %887 = vst.msk [vmem:[#allocation2 + $0x1c] sm:$0xf] %vm491_vm7, %v866_v41  ;;  %v1964_v41 = vunpack.c.l.bf16 %v1968_v51 }
  0xbc   : > { %v868_v58 = vpop.permute.xlu1 %867  ;;  %v2092_v10 = vld [vmem:[#allocation2 + $0x4c] ss:$12 sps:$4 sm:$0xff]  }
  0xbd   : > { %888 = vst.msk [vmem:[#allocation2 + $0x28] sm:$0xf] %vm491_vm7, %v868_v58  ;;  %1481 = vmatprep.mubr.bf16.mxu1 %v2092_v10 }
  0xbe   : > { %v572_v12 = vpop.permute.xlu0 %571  ;;  %1482 = vmatmul.mubr.bf16.vlgmr.msra.gmra.mrb[0].mxu1 %v2090_v9 }
  0xbf   : > { %594 = vst.msk [vmem:[#allocation2 + $0x18] sm:$0xf] %vm591_vm8, %v572_v12  ;;  %2016 = vmatpush3.bf16.msra.mxu1 %v2400_v42  ;;  %2019 = vmatprep.mubr.msk.bf16.mxu1 %vm1412_vm10, %v2095_v7 }
  0xc0   : > { %v574_v14 = vpop.permute.xlu1 %573  ;;  %2017 = vmatprep.subr.bf16.mxu1 %v2094_v11 }
  0xc1   : > { %595 = vst.msk [vmem:[#allocation2 + $0x24] sm:$0xf] %vm591_vm8, %v574_v14  ;;  %v1965_v14 = vunpack.c.h.bf16 %v1968_v51 }
  0xc2   : > { %v918_v15 = vpop.permute.xlu0 %917 }
  0xc3   : > { %939 = vst.msk [vmem:[#allocation2 + $0x1c] sm:$0xf] %vm591_vm8, %v918_v15  ;;  %2018 = vmatpush3.bf16.msra.mxu1 %v2094_v11 }
  0xc4   : > { %v920_v46 = vpop.permute.xlu1 %919 }
  0xc5   : > { %940 = vst.msk [vmem:[#allocation2 + $0x28] sm:$0xf] %vm591_vm8, %v920_v46 }
  0xc6   : > { %v625_v17 = vpop.permute.xlu0 %624  ;;  %2020 = vmatmul.mubr.msk.bf16.vlgmr.msra.gmra.mrb[4].mxu1 %vm1412_vm10, %v2096_v16 }
  0xc7   : > { %647 = vst.msk [vmem:[#allocation2 + $0x18] sm:$0xf] %vm644_vm9, %v625_v17  ;;  %2023 = vmatprep.mubr.msk.bf16.mxu1 %vm1412_vm10, %v2097_v45 }
  0xc8   : > { %v627_v42 = vpop.permute.xlu1 %626 }
  0xc9   : > { %648 = vst.msk [vmem:[#allocation2 + $0x24] sm:$0xf] %vm644_vm9, %v627_v42 }
  0xca   : > { %v1078_v36 = vpop.permute.xlu0 %1077 }
  0xcb   : > { %1099 = vst.msk [vmem:[#allocation2 + $0x1c] sm:$0xf] %vm644_vm9, %v1078_v36 }
  0xcc   : > { %v1080_v18 = vpop.permute.xlu1 %1079 }
  0xcd   : > { %1100 = vst.msk [vmem:[#allocation2 + $0x28] sm:$0xf] %vm644_vm9, %v1080_v18 }
  0xce   : > { %v476_v35 = vpop.permute.xlu0 %475  ;;  %2024 = vmatmul.mubr.msk.bf16.gmra.mrb[8].mxu1 %vm1412_vm10, %v2098_v55 }
  0xcf   : > { %496 = vst.msk [vmem:[#allocation2 + $0x30] sm:$0xf] %vm491_vm7, %v476_v35 }
  0xd0   : > { %v478_v3 = vpop.permute.xlu1 %477 }
  0xd1   : > { %497 = vst.msk [vmem:[#allocation2 + $0x3c] sm:$0xf] %vm491_vm7, %v478_v3 }
  0xd2   : > { %v870_v13 = vpop.permute.xlu0 %869  ;;  %v1189_v54 = vld [vmem:[#allocation2 + $0x18] sm:$0xff] }
  0xd3   : > { %889 = vst.msk [vmem:[#allocation2 + $0x34] sm:$0xf] %vm491_vm7, %v870_v13 }
  0xd4   : > { %v872_v19 = vpop.permute.xlu1 %871  ;;  %v1191_v47 = vld [vmem:[#allocation2 + $0x24] sm:$0xff] }
  0xd5   : > { %v2099_v56 = vld [vmem:[#allocation2 + $0x1c] ss:$12 sps:$4 sm:$0xff]   ;;  %890 = vst.msk [vmem:[#allocation2 + $0x40] sm:$0xf] %vm491_vm7, %v872_v19  ;;  %v1899_v1 = vcombine.low %v1189_v54, %v1191_v47 }
  0xd6   : > { %v576_v20 = vpop.permute.xlu0 %575  ;;  %1465 = vmatprep.mubr.bf16.mxu0 %v2099_v56  ;;  %v1966_v19 = vld [vmem:[%s2720_s21 + $0x8] sm:$0xff]  }
  0xd7   : > { %596 = vst.msk [vmem:[#allocation2 + $0x30] sm:$0xf] %vm591_vm8, %v576_v20  ;;  %1466 = vmatmul.mubr.bf16.gmra.mrb[4].mxu0 %v1899_v1  ;;  %v1956_v20 = vunpack.c.l.bf16 %v1966_v19 }
  0xd8   : > { %v578_v21 = vpop.permute.xlu1 %577 }
  0xd9   : > { %597 = vst.msk [vmem:[#allocation2 + $0x3c] sm:$0xf] %vm591_vm8, %v578_v21 }
  0xda   : > { %v922_v0 = vpop.permute.xlu0 %921 }
  0xdb   : > { %941 = vst.msk [vmem:[#allocation2 + $0x34] sm:$0xf] %vm591_vm8, %v922_v0 }
  0xdc   : > { %v924_v24 = vpop.permute.xlu1 %923 }
  0xdd   : > { %942 = vst.msk [vmem:[#allocation2 + $0x40] sm:$0xf] %vm591_vm8, %v924_v24 }
  0xde   : > { %v629_v38 = vpop.permute.xlu0 %628 }
  0xdf   : > { %649 = vst.msk [vmem:[#allocation2 + $0x30] sm:$0xf] %vm644_vm9, %v629_v38  ;;  %v1957_v38 = vunpack.c.h.bf16 %v1966_v19 }
  0xe0   : > { %v631_v8 = vpop.permute.xlu1 %630 }
  0xe1   : > { %650 = vst.msk [vmem:[#allocation2 + $0x3c] sm:$0xf] %vm644_vm9, %v631_v8 }
  0xe2   : > { %v1082_v23 = vpop.permute.xlu0 %1081 }
  0xe3   : > { %1101 = vst.msk [vmem:[#allocation2 + $0x34] sm:$0xf] %vm644_vm9, %v1082_v23 }
  0xe4   : > { %v1084_v2 = vpop.permute.xlu1 %1083 }
  0xe5   : > { %1102 = vst.msk [vmem:[#allocation2 + $0x40] sm:$0xf] %vm644_vm9, %v1084_v2 }
  0xe8   : > { %v2103_v22 = vld [vmem:[#allocation2 + $0x30] ss:$12 sps:$4 sm:$0xff]  }
  0xec   : > { %v2101_v49 = vld [vmem:[#allocation2 + $0x34] ss:$12 sps:$4 sm:$0xff]  }
  0xed   : > { %1473 = vmatprep.mubr.bf16.mxu0 %v2101_v49 }
  0xee   : > { %1474 = vmatmul.mubr.bf16.gmra.mrb[8].mxu0 %v2103_v22 }
 0x179   : > { %v1985_v61 = vpop.f32.mrb[0].mxu0 }
 0x17a   : > { %v1986_v25 = vpop.f32.mrb[1].mxu0 }
 0x17b   : > { %v1987_v60 = vadd.f32 %v1986_v25, %v1985_v61  ;;  %v1988_v4 = vpop.f32.mrb[2].mxu0 }
 0x17c   : > { %v1989_v5 = vpop.f32.mrb[3].mxu0 }
 0x17d   : > { %v1990_v31 = vadd.f32 %v1989_v5, %v1988_v4  ;;  %v1460_v59 = vadd.f32 %v1987_v60, %v2725_v37  ;;  %v1967_v5 = vld [vmem:[%s2720_s21 + $0x10] sm:$0xff]  }
 0x17f   : > { %v1463_v39 = vadd.f32 %v1990_v31, %v2725_v37 }
 0x191   : > { %v2003_v32 = vpop.f32.mrb[0].mxu1 }
 0x192   : > { %v2004_v26 = vpop.f32.mrb[1].mxu1 }
 0x193   : > { %v2005_v50 = vadd.f32 %v2004_v26, %v2003_v32  ;;  %v2006_v27 = vpop.f32.mrb[2].mxu1 }
 0x194   : > { %v2007_v52 = vpop.f32.mrb[3].mxu1 }
 0x195   : > { %v2008_v40 = vadd.f32 %v2007_v52, %v2006_v27  ;;  %v1484_v6 = vadd.f32 %v2005_v50, %v2725_v37  ;;  %v1960_v52 = vunpack.c.l.bf16 %v1967_v5 }
 0x197   : > { %v1487_v12 = vadd.f32 %v2008_v40, %v2725_v37 }
 0x199   : > { %v2021_v53 = vpop.f32.mrb[4].mxu1 }
 0x19a   : > { %v1524_v29 = vpop.f32.mrb[5].mxu1 }
 0x19b   : > { %v1525_v30 = vadd.f32 %v1524_v29, %v1460_v59  ;;  %v2022_v34 = vpop.f32.mrb[6].mxu1 }
 0x19c   : > { %v1527_v57 = vpop.f32.mrb[7].mxu1 }
 0x19d   : > { %v1571_v63 = vadd.f32 %v1952_v28, %v1525_v30  ;;  %v1528_v44 = vadd.f32 %v1527_v57, %v1463_v39 }
 0x19f   : > { %v1579_v62 = vmax.f32 %v1571_v63, 0.0  ;;  %v1572_v48 = vadd.f32 %v1953_v43, %v1528_v44 }
 0x1a1   : > { %v1942_v7 = vpack.c.bf16 %v1579_v62, %v1579_v62  ;;  %v1580_v58 = vmax.f32 %v1572_v48, 0.0  ;;  %v2025_v9 = vpop.f32.mrb[8].mxu1 }
 0x1a2   : > { %v1549_v10 = vadd.f32 %v2025_v9, %v1484_v6  ;;  %v1540_v11 = vpop.f32.mrb[9].mxu1 }
 0x1a3   : > { %1619 = vst.msk [vmem:[%s2734_s25] sm:$0xf] %vm327_vm6, %v1942_v7  ;;  %v1943_v15 = vpack.c.bf16 %v1580_v58, %v1580_v58  ;;  %v2026_v16 = vpop.f32.mrb[10].mxu1 }
 0x1a4   : > { %v1577_v46 = vadd.f32 %v1964_v41, %v1549_v10  ;;  %v1552_v45 = vadd.f32 %v2026_v16, %v1487_v12  ;;  %v1543_v17 = vpop.f32.mrb[11].mxu1 }
 0x1a5   : > { %1620 = vst.msk [vmem:[%s2734_s25 + $0x4] sm:$0xf] %vm327_vm6, %v1943_v15 }
 0x1a6   : > { %v1585_v42 = vmax.f32 %v1577_v46, 0.0  ;;  %v1578_v36 = vadd.f32 %v1965_v14, %v1552_v45 }
 0x1a8   : > { %v1948_v55 = vpack.c.bf16 %v1585_v42, %v1585_v42  ;;  %v1586_v18 = vmax.f32 %v1578_v36, 0.0 }
 0x1aa   : > { %v1991_v35 = vpop.f32.mrb[4].mxu0  ;;  %1625 = vst.msk [vmem:[%s2734_s25 + $0x18] sm:$0xf] %vm327_vm6, %v1948_v55  ;;  %v1949_v3 = vpack.c.bf16 %v1586_v18, %v1586_v18 }
 0x1ab   : > { %v1992_v13 = vpop.f32.mrb[5].mxu0 }
 0x1ac   : > { %v1993_v54 = vadd.f32 %v1992_v13, %v1991_v35  ;;  %v1994_v47 = vpop.f32.mrb[6].mxu0  ;;  %1626 = vst.msk [vmem:[%s2734_s25 + $0x1c] sm:$0xf] %vm327_vm6, %v1949_v3 }
 0x1ad   : > { %v1995_v56 = vpop.f32.mrb[7].mxu0 }
 0x1ae   : > { %v1468_v1 = vadd.f32 %v1993_v54, %v2725_v37  ;;  %v1996_v21 = vadd.f32 %v1995_v56, %v1994_v47 }
 0x1b0   : > { %v1533_v0 = vadd.f32 %v2021_v53, %v1468_v1  ;;  %v1471_v24 = vadd.f32 %v1996_v21, %v2725_v37  ;;  %v1961_v53 = vunpack.c.h.bf16 %v1967_v5 }
 0x1b2   : > { %v1573_v8 = vadd.f32 %v1956_v20, %v1533_v0  ;;  %v1536_v23 = vadd.f32 %v2022_v34, %v1471_v24 }
 0x1b4   : > { %v1581_v2 = vmax.f32 %v1573_v8, 0.0  ;;  %v1574_v49 = vadd.f32 %v1957_v38, %v1536_v23 }
 0x1b6   : > { %v1944_v22 = vpack.c.bf16 %v1581_v2, %v1581_v2  ;;  %v1582_v61 = vmax.f32 %v1574_v49, 0.0 }
 0x1b8   : > { %1621 = vst.msk [vmem:[%s2734_s25 + $0x8] sm:$0xf] %vm327_vm6, %v1944_v22  ;;  %v1945_v25 = vpack.c.bf16 %v1582_v61, %v1582_v61 }
 0x1ba   : > { %1622 = vst.msk [vmem:[%s2734_s25 + $0xc] sm:$0xf] %vm327_vm6, %v1945_v25 }
 0x1c1   : > { %v1997_v60 = vpop.f32.mrb[8].mxu0 }
 0x1c2   : > { %v1998_v4 = vpop.f32.mrb[9].mxu0 }
 0x1c3   : > { %v1999_v31 = vadd.f32 %v1998_v4, %v1997_v60  ;;  %v2000_v32 = vpop.f32.mrb[10].mxu0 }
 0x1c4   : > { %v2001_v26 = vpop.f32.mrb[11].mxu0 }
 0x1c5   : > { %v1476_v50 = vadd.f32 %v1999_v31, %v2725_v37  ;;  %v2002_v27 = vadd.f32 %v2001_v26, %v2000_v32 }
 0x1c7   : > { %v1541_v40 = vadd.f32 %v1540_v11, %v1476_v50  ;;  %v1479_v33 = vadd.f32 %v2002_v27, %v2725_v37 }
 0x1c9   : > { %v1544_v59 = vadd.f32 %v1543_v17, %v1479_v33  ;;  %v1575_v28 = vadd.f32 %v1960_v52, %v1541_v40 }
 0x1cb   : > { %v1576_v29 = vadd.f32 %v1961_v53, %v1544_v59  ;;  %v1583_v30 = vmax.f32 %v1575_v28, 0.0 }
 0x1cd   : > { %v1584_v34 = vmax.f32 %v1576_v29, 0.0  ;;  %v1946_v39 = vpack.c.bf16 %v1583_v30, %v1583_v30 }
 0x1cf   : > { %v1947_v43 = vpack.c.bf16 %v1584_v34, %v1584_v34  ;;  %1623 = vst.msk [vmem:[%s2734_s25 + $0x10] sm:$0xf] %vm327_vm6, %v1946_v39 }
 0x1d1   : > { %1624 = vst.msk [vmem:[%s2734_s25 + $0x14] sm:$0xf] %vm327_vm6, %v1947_v43 }
 0x1d2 PF: > { %s14_s17 = sadd.s32 1, %s2126_s17   ;;  %s2778_s15 = smov %s2122_s16 }
 0x1d3   : > { %p11_p5 = scmp.ge.s32.totalorder %s14_s17, 4   ;;  %s2779_s16 = smov %s2781_s18 }
 0x1d5   :  { %13 = sbr.rel (!%p11_p5) target bundleno = 2 (0x2), region = 78 }

// kernel: _lambda_.8
= control target key start
LH: loop header
LB: loop body
LE: loop exit
PB: predicated region body
PF: predicated region fallthrough
CT: control target
= control target key end

     0   :  { %s2010_s12 = smov 0   ;;  %s2012_s13 = smov 0   ;;  %s2604_s0 = inlined_call_operand.vmem [shape: bf16[2,1,10,10,32], index: 0, kind: input, shape index: {}]   ;;  %s2605_s1 = inlined_call_operand.vmem [shape: bf16[288,32], index: 1, kind: input, shape index: {}]   ;;  %s2606_s2 = inlined_call_operand.vmem [shape: f32[1,32], index: 2, kind: input, shape index: {}]   ;;  %s2607_s3 = inlined_call_operand.vmem [shape: bf16[2,64,32], index: 3, kind: output, shape index: {}]  }
   0x1   :  { %s2014_s14 = smov 0  }
   0x2 LB: > { %s32_s15 = sadd.s32 1, %s1981_s13  ;;  %p1666_p0 = scmp.ge.s32.totalorder %s1985_s14, 1  ;;  %s1985_s14 = sphi %s2014_s14, %s13_s14   ;;  %s1981_s13 = sphi %s2012_s13, %s2613_s13   ;;  %s1977_s12 = sphi %s2010_s12, %s2612_s12  }
   0x3   : > { %p34_p1 = scmp.ge.s32.totalorder %s32_s15, 2  ;;  %p177_p2 = scmp.lt.s32.totalorder %s1985_s14, 3 }
   0x5   : > { %s2615_s15 = smov (%p34_p1, %s32_s15), 0  ;;  %p178_p3 = pnand %p1666_p0, %p177_p2 }
   0x6   : > { %p215_p4 = scmp.lt.s32.totalorder (!%p178_p3), %s1977_s12, 1  ;;  %vm458_vm0 = vcmask (!%p178_p3), 1042432   ;;  %vm459_vm1 = vcmask (!%p178_p3), 1046532   ;;  %v1930_v1 = vld [vmem:[%s2605_s1 + $0x40] sm:$0xff] (!%p178_p3)   ;;  %v1932_v3 = vld [vmem:[%s2605_s1 + $0x48] sm:$0xff] (!%p178_p3)   ;;  %v1934_v5 = vld [vmem:[%s2605_s1 + $0x50] sm:$0xff] (!%p178_p3)  }
   0x7   : > { %181 = sbr.rel (%p178_p3) target bundleno = 464 (0x1d0), region = 32  ;;  %vm2030_vm2 = vmor (!%p178_p3), %vm458_vm0, %vm459_vm1  ;;  %v1931_v2 = vld [vmem:[%s2605_s1] sm:$0xff] (!%p178_p3)   ;;  %1828 = vmatprep.subr.bf16.mxu0 (!%p178_p3), %v1930_v1  ;;  %1886 = vmatprep.subr.bf16.mxu1 (!%p178_p3), %v1930_v1  ;;  %v1933_v4 = vld [vmem:[%s2605_s1 + $0x8] sm:$0xff] (!%p178_p3)   ;;  %vm278_vm3 = vsmask.f32 (!%p178_p3), 3328  ;;  %s1987_s30 = smov (!%p178_p3), 64  }
   0x8   : > { %1829 = vmatpush3.bf16.msra.mxu0 (!%p178_p3), %v1931_v2  ;;  %1894 = vmatpush3.bf16.msra.mxu1 (!%p178_p3), %v1931_v2  ;;  %vm279_vm4 = vsmask.f32 (!%p178_p3), 7440  ;;  %s1988_s4 = smov (!%p178_p3), 32   ;;  %v1935_v25 = vld [vmem:[%s2605_s1 + $0x10] sm:$0xff] (!%p178_p3)   ;;  %v1936_v31 = vld [vmem:[%s2605_s1 + $0x58] sm:$0xff] (!%p178_p3)   ;;  %v1938_v40 = vld [vmem:[%s2605_s1 + $0x60] sm:$0xff] (!%p178_p3)  }
   0x9   : > { %1830 = vmatprep.subr.bf16.mxu0 (!%p178_p3), %v1932_v3  ;;  %1887 = vmatprep.subr.bf16.mxu1 (!%p178_p3), %v1932_v3  ;;  %v1937_v35 = vld [vmem:[%s2605_s1 + $0x18] sm:$0xff] (!%p178_p3)   ;;  %s1989_s17 = smov (!%p178_p3), 96   ;;  %v1939_v49 = vld [vmem:[%s2605_s1 + $0x20] sm:$0xff] (!%p178_p3)   ;;  %vm2101_vm5 = vmor (!%p178_p3), %vm278_vm3, %vm279_vm4  ;;  %vm253_vm6 = vcmask (!%p178_p3), 257024   ;;  %vm417_vm7 = vcmask (!%p178_p3), 519424   ;;  %vm517_vm8 = vcmask (!%p178_p3), 781824  }
   0xa   : > { %v1940_v55 = vld [vmem:[%s2605_s1 + $0x68] sm:$0xff] (!%p178_p3)   ;;  %vm570_vm9 = vcmask (!%p178_p3), 1044224   ;;  %vm1338_vm10 = vcmask (!%p178_p3), 261120  }
   0xc   : > { %1831 = vmatpush3.bf16.msra.mxu0 (!%p178_p3), %v1933_v4  ;;  %1895 = vmatpush3.bf16.msra.mxu1 (!%p178_p3), %v1933_v4 }
   0xd   : > { %1832 = vmatprep.subr.bf16.mxu0 (!%p178_p3), %v1934_v5  ;;  %1888 = vmatprep.subr.bf16.mxu1 (!%p178_p3), %v1934_v5 }
   0xe   : > { %s2617_s12 = smov (!%p215_p4, %s1977_s12), 1 }
   0xf   : > { %s1902_s20 = smul.u32 80, %s2617_s12  ;;  %s1819_s11 = sshll.u32 %s2617_s12, 5 }
  0x10   : > { %1833 = vmatpush3.bf16.msra.mxu0 %v1935_v25  ;;  %1896 = vmatpush3.bf16.msra.mxu1 %v1935_v25  ;;  %s2577_s18 = scalar_lea.vmem %s2607_s3, %s1819_s11 }
  0x11   : > { %s2050_s27 = scalar_lea.vmem %s2604_s0, %s1902_s20  ;;  %1834 = vmatprep.subr.bf16.mxu0 %v1936_v31  ;;  %1889 = vmatprep.subr.bf16.mxu1 %v1936_v31 }
  0x12   : > { %v1726_v6 = vld [vmem:[%s2050_s27 + $0x10] sm:$0xf]  ;;  %v1702_v7 = vld [vmem:[%s2050_s27 + $0x8] sm:$0xe]  ;;  %v1703_v8 = vld [vmem:[%s2050_s27 + $0xc] sm:$0x1] }
  0x13   : > { %839 = vrot.lane.b32.xlu0 %v1726_v6, %s1987_s30  ;;  %v1718_v9 = vrot.slane %v1702_v7, 9  ;;  %v757_v10 = vrot.slane %v1703_v8, 5  ;;  %v426_v11 = vld [vmem:[%s2050_s27] sm:$0xe]  ;;  %v427_v12 = vld [vmem:[%s2050_s27 + $0x4] sm:$0x1] }
  0x14   : > { %v1670_v13 = vrot.slane %v426_v11, 9  ;;  %v463_v14 = vrot.slane %v427_v12, 5  ;;  %v1704_v15 = vld [vmem:[%s2050_s27 + $0x10] sm:$0xe]  ;;  %v1705_v16 = vld [vmem:[%s2050_s27 + $0x14] sm:$0x1]  ;;  %1835 = vmatpush3.bf16.msra.mxu0 %v1937_v35  ;;  %1897 = vmatpush3.bf16.msra.mxu1 %v1937_v35 }
  0x15   : > { %v758_v17 = vsel %vm2030_vm2, %v1718_v9, %v757_v10  ;;  %v1719_v18 = vrot.slane %v1704_v15, 9  ;;  %v761_v19 = vrot.slane %v1705_v16, 5  ;;  %v428_v20 = vld [vmem:[%s2050_s27 + $0x8] sm:$0xe]  ;;  %v429_v22 = vld [vmem:[%s2050_s27 + $0xc] sm:$0x1]  ;;  %1836 = vmatprep.subr.bf16.mxu0 %v1938_v40  ;;  %1890 = vmatprep.subr.bf16.mxu1 %v1938_v40 }
  0x16   : > { %787 = vrot.lane.b32.xlu1 %v758_v17, %s1988_s4  ;;  %v464_v21 = vsel %vm2030_vm2, %v1670_v13, %v463_v14  ;;  %v1671_v23 = vrot.slane %v428_v20, 9  ;;  %v262_v24 = vld [vmem:[%s2050_s27] sm:$0xf]  ;;  %v467_v27 = vrot.slane %v429_v22, 5  ;;  %v263_v28 = vld [vmem:[%s2050_s27 + $0x4] sm:$0x1] }
  0x17   : > { %493 = vrot.lane.b32.xlu0 %v464_v21, %s1987_s30  ;;  %v762_v26 = vsel %vm2030_vm2, %v1719_v18, %v761_v19  ;;  %v282_v29 = vshrl.u32 %v262_v24, 16  ;;  %v285_v30 = vshll.u32 %v262_v24, 16  ;;  %v1678_v32 = vld [vmem:[%s2050_s27 + $0x8] sm:$0xf]  ;;  %v291_v33 = vshll.u32 %v263_v28, 16  ;;  %v1942_v20 = vld [vmem:[%s2605_s1 + $0x70] sm:$0xff]  }
  0x18   : > { %v264_v34 = vld [vmem:[%s2050_s27 + $0x8] sm:$0xf]  ;;  %v265_v38 = vld [vmem:[%s2050_s27 + $0xc] sm:$0x1]  ;;  %v468_v44 = vsel %vm2030_vm2, %v1671_v23, %v467_v27  ;;  %v1734_v47 = vld [vmem:[%s2050_s27 + $0x10] sm:$0xf]  ;;  %1837 = vmatpush3.bf16.msra.mxu0 %v1939_v49  ;;  %1898 = vmatpush3.bf16.msra.mxu1 %v1939_v49 }
  0x19   : > { %v284_v36 = vrot.slane %v282_v29, 4  ;;  %v287_v37 = vrot.slane %v285_v30, 5  ;;  %v296_v39 = vshrl.u32 %v264_v34, 16  ;;  %v293_v41 = vrot.slane %v291_v33, 5  ;;  %v1735_v48 = vld [vmem:[%s2050_s27 + $0x14] sm:$0x1]  ;;  %1838 = vmatprep.subr.bf16.mxu0 %v1940_v55  ;;  %1891 = vmatprep.subr.bf16.mxu1 %v1940_v55 }
  0x1a   : > { %789 = vrot.lane.b32.xlu1 %v762_v26, %s1988_s4  ;;  %v299_v42 = vshll.u32 %v264_v34, 16  ;;  %v305_v43 = vshll.u32 %v265_v38, 16  ;;  %v888_v52 = vshrl.u32 %v1734_v47, 16  ;;  %v891_v53 = vshll.u32 %v1734_v47, 16  ;;  %v1736_v54 = vld [vmem:[%s2050_s27 + $0x18] sm:$0xf] }
  0x1b   : > { %546 = vrot.lane.b32.xlu0 %v1678_v32, %s1989_s17  ;;  %v288_v45 = vor.u32 %v287_v37, %v284_v36  ;;  %v298_v46 = vrot.slane %v296_v39, 4  ;;  %v1727_v57 = vld [vmem:[%s2050_s27 + $0x18] sm:$0xf]  ;;  %v897_v58 = vshll.u32 %v1735_v48, 16  ;;  %v1737_v59 = vld [vmem:[%s2050_s27 + $0x1c] sm:$0x1] }
  0x1c   : > { %v301_v51 = vrot.slane %v299_v42, 5  ;;  %v902_v60 = vshrl.u32 %v1736_v54, 16  ;;  %v905_v61 = vshll.u32 %v1736_v54, 16  ;;  %v307_v63 = vrot.slane %v305_v43, 5  ;;  %v274_v3 = vld [vmem:[%s2050_s27 + $0x30] sm:$0xf] }
  0x1d   : > { %v289_v56 = vrot.slane %v288_v45, 4  ;;  %v890_v1 = vrot.slane %v888_v52, 4  ;;  %v893_v2 = vrot.slane %v891_v53, 5  ;;  %v911_v7 = vshll.u32 %v1737_v59, 16  ;;  %v275_v8 = vld [vmem:[%s2050_s27 + $0x34] sm:$0x1] }
  0x1e   : > { %495 = vrot.lane.b32.xlu1 %v468_v44, %s1987_s30  ;;  %v302_v62 = vor.u32 %v301_v51, %v298_v46  ;;  %v904_v5 = vrot.slane %v902_v60, 4  ;;  %v907_v6 = vrot.slane %v905_v61, 5  ;;  %v899_v11 = vrot.slane %v897_v58, 5  ;;  %v276_v13 = vld [vmem:[%s2050_s27 + $0x38] sm:$0xf]  ;;  %v1941_v14 = vld [vmem:[%s2605_s1 + $0x28] sm:$0xff]  }
  0x1f   : > { %v294_v4 = vsel %vm2101_vm5, %v289_v56, %v293_v41  ;;  %v894_v10 = vor.u32 %v893_v2, %v890_v1  ;;  %v366_v12 = vshrl.u32 %v274_v3, 16  ;;  %v369_v16 = vshll.u32 %v274_v3, 16  ;;  %v277_v18 = vld [vmem:[%s2050_s27 + $0x3c] sm:$0x1]  ;;  %v1679_v25 = vld [vmem:[%s2050_s27 + $0x10] sm:$0xf]  ;;  %1839 = vmatpush3.bf16.msra.mxu0 %v1941_v14  ;;  %1899 = vmatpush3.bf16.msra.mxu1 %v1941_v14 }
  0x20   : > { %393 = vrot.lane.b32.xlu0 %v294_v4, %s1988_s4  ;;  %v303_v9 = vrot.slane %v302_v62, 4  ;;  %v908_v15 = vor.u32 %v907_v6, %v904_v5  ;;  %v375_v17 = vshll.u32 %v275_v8, 16  ;;  %v380_v19 = vshrl.u32 %v276_v13, 16  ;;  %v1943_v32 = vld [vmem:[%s2605_s1 + $0x30] sm:$0xff]   ;;  %1840 = vmatprep.subr.bf16.mxu0 %v1942_v20  ;;  %v1944_v36 = vld [vmem:[%s2605_s1 + $0x78] sm:$0xff]  }
  0x21   : > { %v895_v22 = vrot.slane %v894_v10, 4  ;;  %v368_v23 = vrot.slane %v366_v12, 4  ;;  %v383_v24 = vshll.u32 %v276_v13, 16  ;;  %v913_v27 = vrot.slane %v911_v7, 5  ;;  %v1714_v38 = vld [vmem:[%s2050_s27 + $0x38] sm:$0xe]  ;;  %1892 = vmatprep.subr.bf16.mxu1 %v1942_v20 }
  0x22   : > { %841 = vrot.lane.b32.xlu1 %v1727_v57, %s1987_s30  ;;  %v308_v21 = vsel %vm2101_vm5, %v303_v9, %v307_v63  ;;  %v909_v26 = vrot.slane %v908_v15, 4  ;;  %v371_v28 = vrot.slane %v369_v16, 5  ;;  %v382_v29 = vrot.slane %v380_v19, 4  ;;  %v1715_v39 = vld [vmem:[%s2050_s27 + $0x3c] sm:$0x1] }
  0x23   : > { %v385_v30 = vrot.slane %v383_v24, 5  ;;  %v389_v31 = vshll.u32 %v277_v18, 16  ;;  %v900_v33 = vsel %vm2101_vm5, %v895_v22, %v899_v11  ;;  %v377_v35 = vrot.slane %v375_v17, 5  ;;  %v1716_v43 = vld [vmem:[%s2050_s27 + $0x40] sm:$0xe]  ;;  %1841 = vmatpush3.bf16.msra.mxu0 %v1943_v32  ;;  %v1945_v47 = vld [vmem:[%s2605_s1 + $0x38] sm:$0xff]   ;;  %1900 = vmatpush3.bf16.msra.mxu1 %v1943_v32 }
  0x24   : > { %395 = vrot.lane.b32.xlu0 %v308_v21, %s1988_s4  ;;  %v372_v34 = vor.u32 %v371_v28, %v368_v23  ;;  %v914_v40 = vsel %vm2101_vm5, %v909_v26, %v913_v27  ;;  %v1717_v45 = vld [vmem:[%s2050_s27 + $0x44] sm:$0x1]  ;;  %v438_v46 = vld [vmem:[%s2050_s27 + $0x30] sm:$0xe]  ;;  %v1724_v49 = vrot.slane %v1714_v38, 9  ;;  %v781_v51 = vrot.slane %v1715_v39, 5  ;;  %1842 = vmatprep.subr.bf16.mxu0 %v1944_v36 }
  0x25   : > { %v386_v37 = vor.u32 %v385_v30, %v382_v29  ;;  %v391_v42 = vrot.slane %v389_v31, 5  ;;  %v439_v52 = vld [vmem:[%s2050_s27 + $0x34] sm:$0x1]  ;;  %v1746_v53 = vld [vmem:[%s2050_s27 + $0x40] sm:$0xf]  ;;  %1893 = vmatprep.subr.bf16.mxu1 %v1944_v36  ;;  %v1725_v56 = vrot.slane %v1716_v43, 9 }
  0x26   : > { %548 = vrot.lane.b32.xlu1 %v1679_v25, %s1989_s17  ;;  %v373_v41 = vrot.slane %v372_v34, 4  ;;  %v1748_v54 = vld [vmem:[%s2050_s27 + $0x48] sm:$0xf]  ;;  %v785_v57 = vrot.slane %v1717_v45, 5  ;;  %v1676_v58 = vrot.slane %v438_v46, 9  ;;  %v972_v61 = vshrl.u32 %v1746_v53, 16 }
  0x27   : > { %v387_v44 = vrot.slane %v386_v37, 4  ;;  %v440_v59 = vld [vmem:[%s2050_s27 + $0x38] sm:$0xe]  ;;  %v441_v60 = vld [vmem:[%s2050_s27 + $0x3c] sm:$0x1]  ;;  %v975_v62 = vshll.u32 %v1746_v53, 16  ;;  %1843 = vmatpush3.bf16.msra.mxu0 %v1945_v47  ;;  %v782_v1 = vsel %vm2030_vm2, %v1724_v49, %v781_v51  ;;  %1901 = vmatpush3.bf16.msra.mxu1 %v1945_v47 }
  0x28   : > { %999 = vrot.lane.b32.xlu0 %v900_v33, %s1989_s17  ;;  %v378_v48 = vsel %vm2101_vm5, %v373_v41, %v377_v35  ;;  %v266_v63 = vld [vmem:[%s2050_s27 + $0x10] sm:$0xf]  ;;  %v487_v2 = vrot.slane %v439_v52, 5  ;;  %v986_v3 = vshrl.u32 %v1748_v54, 16  ;;  %v989_v4 = vshll.u32 %v1748_v54, 16 }
  0x29   : > { %v392_v55 = vsel %vm2101_vm5, %v387_v44, %v391_v42  ;;  %v310_v5 = vshrl.u32 %v266_v63, 16  ;;  %v313_v6 = vshll.u32 %v266_v63, 16  ;;  %v786_v7 = vsel %vm2030_vm2, %v1725_v56, %v785_v57  ;;  %v1747_v10 = vld [vmem:[%s2050_s27 + $0x44] sm:$0x1]  ;;  %v1749_v11 = vld [vmem:[%s2050_s27 + $0x4c] sm:$0x1] }
  0x2a   : > { %1001 = vrot.lane.b32.xlu1 %v914_v40, %s1989_s17  ;;  %v1677_v8 = vrot.slane %v440_v59, 9  ;;  %v491_v9 = vrot.slane %v441_v60, 5  ;;  %v974_v12 = vrot.slane %v972_v61, 4  ;;  %v977_v13 = vrot.slane %v975_v62, 5  ;;  %v268_v14 = vld [vmem:[%s2050_s27 + $0x18] sm:$0xf] }
  0x2b   : > { %v488_v15 = vsel %vm2030_vm2, %v1676_v58, %v487_v2  ;;  %v988_v16 = vrot.slane %v986_v3, 4  ;;  %v991_v17 = vrot.slane %v989_v4, 5  ;;  %v267_v18 = vld [vmem:[%s2050_s27 + $0x14] sm:$0x1]  ;;  %v981_v19 = vshll.u32 %v1747_v10, 16 }
  0x2c   : > { %405 = vrot.lane.b32.xlu0 %v378_v48, %s1988_s4  ;;  %v995_v20 = vshll.u32 %v1749_v11, 16  ;;  %v312_v21 = vrot.slane %v310_v5, 4  ;;  %v315_v22 = vrot.slane %v313_v6, 5  ;;  %v269_v23 = vld [vmem:[%s2050_s27 + $0x1c] sm:$0x1]  ;;  %v492_v24 = vsel %vm2030_vm2, %v1677_v8, %v491_v9 }
  0x2d   : > { %v324_v25 = vshrl.u32 %v268_v14, 16  ;;  %v327_v26 = vshll.u32 %v268_v14, 16  ;;  %v978_v27 = vor.u32 %v977_v13, %v974_v12  ;;  %v319_v28 = vshll.u32 %v267_v18, 16  ;;  %v1732_v29 = vld [vmem:[%s2050_s27 + $0x40] sm:$0xf] }
  0x2e   : > { %407 = vrot.lane.b32.xlu1 %v392_v55, %s1988_s4  ;;  %v1733_v30 = vld [vmem:[%s2050_s27 + $0x48] sm:$0xf]  ;;  %v992_v31 = vor.u32 %v991_v17, %v988_v16  ;;  %v333_v32 = vshll.u32 %v269_v23, 16  ;;  %v983_v33 = vrot.slane %v981_v19, 5  ;;  %v2182_v34 = vrot.slane %v995_v20, 5 }
  0x2f   : > { %v316_v35 = vor.u32 %v315_v22, %v312_v21  ;;  %v2185_v36 = vld [vmem:[%s2050_s27 + $0x18] sm:$0xe]  ;;  %v2188_v37 = vld [vmem:[%s2050_s27 + $0x1c] sm:$0x1]  ;;  %v326_v39 = vrot.slane %v324_v25, 4  ;;  %v329_v40 = vrot.slane %v327_v26, 5 }
  0x30   : > { %799 = vrot.lane.b32.xlu0 %v782_v1, %s1988_s4  ;;  %v1684_v38 = vld [vmem:[%s2050_s27 + $0x38] sm:$0xf]  ;;  %v2192_v41 = vld [vmem:[%s2050_s27 + $0x20] sm:$0xe]  ;;  %v979_v43 = vrot.slane %v978_v27, 4  ;;  %v2196_v44 = vrot.slane %v319_v28, 5 }
  0x31   : > { %v1738_v42 = vld [vmem:[%s2050_s27 + $0x20] sm:$0xf]  ;;  %v1740_v47 = vld [vmem:[%s2050_s27 + $0x28] sm:$0xf]  ;;  %v993_v49 = vrot.slane %v992_v31, 4  ;;  %v2200_v51 = vrot.slane %v333_v32, 5  ;;  %v330_v60 = vor.u32 %v329_v40, %v326_v39 }
  0x32   : > { %801 = vrot.lane.b32.xlu1 %v786_v7, %s1988_s4  ;;  %v916_v45 = vshrl.u32 %v1738_v42, 16  ;;  %v919_v46 = vshll.u32 %v1738_v42, 16  ;;  %v1685_v48 = vld [vmem:[%s2050_s27 + $0x40] sm:$0xf]  ;;  %v930_v52 = vshrl.u32 %v1740_v47, 16  ;;  %v933_v53 = vshll.u32 %v1740_v47, 16 }
  0x33   : > { %v317_v54 = vrot.slane %v316_v35, 4  ;;  %v1720_v55 = vrot.slane %v2185_v36, 9  ;;  %v765_v56 = vrot.slane %v2188_v37, 5  ;;  %v2206_v57 = vld [vmem:[%s2050_s27 + $0x24] sm:$0x1]  ;;  %v1721_v58 = vrot.slane %v2192_v41, 9 }
  0x34   : > { %505 = vrot.lane.b32.xlu0 %v488_v15, %s1987_s30  ;;  %v270_v59 = vld [vmem:[%s2050_s27 + $0x20] sm:$0xf]  ;;  %v2211_v61 = vld [vmem:[%s2050_s27 + $0x10] sm:$0xe]  ;;  %v1739_v62 = vld [vmem:[%s2050_s27 + $0x24] sm:$0x1]  ;;  %v984_v9 = vsel %vm2101_vm5, %v979_v43, %v983_v33  ;;  %v998_v10 = vsel %vm2101_vm5, %v993_v49, %v2182_v34 }
  0x35   : > { %v918_v63 = vrot.slane %v916_v45, 4  ;;  %v1741_v1 = vld [vmem:[%s2050_s27 + $0x2c] sm:$0x1]  ;;  %v338_v2 = vshrl.u32 %v270_v59, 16  ;;  %v2217_v3 = vld [vmem:[%s2050_s27 + $0x14] sm:$0x1] }
  0x36   : > { %507 = vrot.lane.b32.xlu1 %v492_v24, %s1987_s30  ;;  %v921_v4 = vrot.slane %v919_v46, 5  ;;  %v932_v5 = vrot.slane %v930_v52, 4  ;;  %v935_v6 = vrot.slane %v933_v53, 5  ;;  %v341_v7 = vshll.u32 %v270_v59, 16  ;;  %v272_v8 = vld [vmem:[%s2050_s27 + $0x28] sm:$0xf] }
  0x37   : > { %v2226_v11 = vld [vmem:[%s2050_s27 + $0x18] sm:$0xe]  ;;  %v271_v12 = vld [vmem:[%s2050_s27 + $0x24] sm:$0x1]  ;;  %v352_v13 = vshrl.u32 %v272_v8, 16  ;;  %v355_v14 = vshll.u32 %v272_v8, 16 }
  0x38   : > { %851 = vrot.lane.b32.xlu0 %v1732_v29, %s1987_s30  ;;  %v925_v15 = vshll.u32 %v1739_v62, 16  ;;  %v939_v16 = vshll.u32 %v1741_v1, 16  ;;  %v340_v17 = vrot.slane %v338_v2, 4  ;;  %v343_v18 = vrot.slane %v341_v7, 5  ;;  %v273_v19 = vld [vmem:[%s2050_s27 + $0x2c] sm:$0x1] }
  0x39   : > { %v331_v20 = vrot.slane %v330_v60, 4  ;;  %v769_v21 = vrot.slane %v2206_v57, 5  ;;  %v433_v22 = vld [vmem:[%s2050_s27 + $0x1c] sm:$0x1]  ;;  %v354_v23 = vrot.slane %v352_v13, 4  ;;  %v357_v24 = vrot.slane %v355_v14, 5 }
  0x3a   : > { %853 = vrot.lane.b32.xlu1 %v1733_v30, %s1987_s30  ;;  %v1672_v25 = vrot.slane %v2211_v61, 9  ;;  %v922_v26 = vor.u32 %v921_v4, %v918_v63  ;;  %v936_v27 = vor.u32 %v935_v6, %v932_v5  ;;  %v347_v28 = vshll.u32 %v271_v12, 16  ;;  %v2241_v33 = vld [vmem:[%s2050_s27 + $0x28] sm:$0xe]  ;;  %v2249_v40 = vld [vmem:[%s2050_s27 + $0x2c] sm:$0x1] }
  0x3b   : > { %v322_v29 = vsel %vm2101_vm5, %v317_v54, %v2196_v44  ;;  %v471_v30 = vrot.slane %v2217_v3, 5  ;;  %v1673_v31 = vrot.slane %v2226_v11, 9  ;;  %v361_v32 = vshll.u32 %v273_v19, 16  ;;  %v2254_v42 = vld [vmem:[%s2605_s1 + $0x80] sm:$0xff]   ;;  %v2260_v45 = vld [vmem:[%s2050_s27 + $0x30] sm:$0xe] }
  0x3c   : > { %558 = vrot.lane.b32.xlu0 %v1684_v38, %s1989_s17  ;;  %v475_v34 = vrot.slane %v433_v22, 5  ;;  %v2244_v35 = vrot.slane %v925_v15, 5  ;;  %v2246_v38 = vrot.slane %v939_v16, 5  ;;  %v344_v39 = vor.u32 %v343_v18, %v340_v17  ;;  %v2263_v46 = vld [vmem:[%s2050_s27 + $0x34] sm:$0x1]  ;;  %1874 = vmatprep.subr.bf16.mxu1 %v2254_v42 }
  0x3d   : > { %v336_v43 = vsel %vm2101_vm5, %v331_v20, %v2200_v51  ;;  %v358_v44 = vor.u32 %v357_v24, %v354_v23  ;;  %v2266_v47 = vld [vmem:[%s2050_s27 + $0x20] sm:$0xe]  ;;  %v2271_v49 = vrot.slane %v936_v27, 4  ;;  %v2273_v52 = vrot.slane %v347_v28, 5  ;;  %v2277_v54 = vld [vmem:[%s2050_s27 + $0x24] sm:$0x1] }
  0x3e   : > { %560 = vrot.lane.b32.xlu1 %v1685_v48, %s1989_s17  ;;  %v2269_v48 = vrot.slane %v922_v26, 4  ;;  %v1722_v53 = vrot.slane %v2241_v33, 9  ;;  %v766_v51 = vsel %vm2030_vm2, %v1720_v55, %v765_v56  ;;  %v2286_v57 = vrot.slane %v361_v32, 5  ;;  %v2290_v60 = vld [vmem:[%s2050_s27 + $0x28] sm:$0xe] }
  0x3f   : > { %v773_v59 = vrot.slane %v2249_v40, 5  ;;  %v2293_v61 = vld [vmem:[%s2050_s27 + $0x2c] sm:$0x1]  ;;  %v2296_v37 = vrot.slane %v344_v39, 4  ;;  %v1723_v36 = vrot.slane %v2260_v45, 9  ;;  %v777_v55 = vrot.slane %v2263_v46, 5 }
  0x40   : > { %1011 = vrot.lane.b32.xlu0 %v984_v9, %s1989_s17  ;;  %v1674_v56 = vrot.slane %v2266_v47, 9  ;;  %v770_v62 = vsel %vm2030_vm2, %v1721_v58, %v769_v21  ;;  %v2305_v63 = vrot.slane %v358_v44, 4  ;;  %v479_v1 = vrot.slane %v2277_v54, 5  ;;  %v1742_v2 = vld [vmem:[%s2050_s27 + $0x30] sm:$0xf] }
  0x41   : > { %v1686_v3 = vld [vmem:[%s2050_s27 + $0x8] sm:$0xf]  ;;  %v1675_v4 = vrot.slane %v2290_v60, 9  ;;  %v483_v5 = vrot.slane %v2293_v61, 5  ;;  %v1743_v6 = vld [vmem:[%s2050_s27 + $0x34] sm:$0x1]  ;;  %v472_v7 = vsel %vm2030_vm2, %v1672_v25, %v471_v30  ;;  %v476_v58 = vsel %vm2030_vm2, %v1673_v31, %v475_v34 }
  0x42   : > { %1013 = vrot.lane.b32.xlu1 %v998_v10, %s1989_s17  ;;  %v1687_v41 = vld [vmem:[%s2050_s27 + $0xc] sm:$0x1]  ;;  %v2320_v8 = vld [vmem:[%s2050_s27 + $0x38] sm:$0xf]  ;;  %v596_v9 = vshrl.u32 %v1686_v3, 16  ;;  %v599_v10 = vshll.u32 %v1686_v3, 16 }
  0x43   : > { %v1688_v11 = vld [vmem:[%s2050_s27 + $0x10] sm:$0xf]  ;;  %v944_v12 = vshrl.u32 %v1742_v2, 16  ;;  %v947_v13 = vshll.u32 %v1742_v2, 16  ;;  %v605_v14 = vshll.u32 %v1687_v41, 16  ;;  %v953_v18 = vshll.u32 %v1743_v6, 16 }
  0x44   : > { %397 = vrot.lane.b32.xlu0 %v322_v29, %s1988_s4  ;;  %v1689_v15 = vld [vmem:[%s2050_s27 + $0x14] sm:$0x1]  ;;  %v610_v16 = vshrl.u32 %v1688_v11, 16  ;;  %v1728_v17 = vld [vmem:[%s2050_s27 + $0x20] sm:$0xf]  ;;  %v598_v19 = vrot.slane %v596_v9, 4 }
  0x45   : > { %v601_v20 = vrot.slane %v599_v10, 5  ;;  %v613_v21 = vshll.u32 %v1688_v11, 16  ;;  %v958_v22 = vshrl.u32 %v2320_v8, 16  ;;  %v961_v23 = vshll.u32 %v2320_v8, 16  ;;  %v1729_v26 = vld [vmem:[%s2050_s27 + $0x28] sm:$0xf] }
  0x46   : > { %399 = vrot.lane.b32.xlu1 %v336_v43, %s1988_s4  ;;  %v612_v24 = vrot.slane %v610_v16, 4  ;;  %v619_v25 = vshll.u32 %v1689_v15, 16  ;;  %v607_v28 = vrot.slane %v605_v14, 5  ;;  %v245_v30 = vld [vmem:[%s2050_s27] sm:$0xf]  ;;  %v2332_v31 = vrot.slane %v944_v12, 4 }
  0x47   : > { %v602_v27 = vor.u32 %v601_v20, %v598_v19  ;;  %v615_v29 = vrot.slane %v613_v21, 5  ;;  %v2334_v32 = vrot.slane %v947_v13, 5  ;;  %254 = vst.msk [vmem:[#allocation2] sm:$0xf] %vm253_vm6, %v245_v30  ;;  %v1680_v34 = vld [vmem:[%s2050_s27 + $0x18] sm:$0xf]  ;;  %v928_v10 = vsel %vm2101_vm5, %v2269_v48, %v2244_v35 }
  0x48   : > { %791 = vrot.lane.b32.xlu0 %v766_v51, %s1988_s4  ;;  %v621_v44 = vrot.slane %v619_v25, 5  ;;  %v246_v51 = vld [vmem:[%s2050_s27 + $0x8] sm:$0xf]  ;;  %v2342_v2 = vrot.slane %v953_v18, 5  ;;  %v2345_v3 = vld [vmem:[%s2050_s27 + $0x3c] sm:$0x1] }
  0x49   : > { %v603_v39 = vrot.slane %v602_v27, 4  ;;  %v616_v43 = vor.u32 %v615_v29, %v612_v24  ;;  %255 = vst.msk [vmem:[#allocation2 + $0xc] sm:$0xf] %vm253_vm6, %v246_v51  ;;  %v252_v9 = vld [vmem:[%s2050_s27 + $0x38] sm:$0xf]  ;;  %v967_v13 = vshll.u32 %v2345_v3, 16  ;;  %v350_v24 = vsel %vm2101_vm5, %v2296_v37, %v2273_v52 }
  0x4a   : > { %793 = vrot.lane.b32.xlu1 %v770_v62, %s1988_s4  ;;  %v1681_v62 = vld [vmem:[%s2050_s27 + $0x20] sm:$0xf]  ;;  %261 = vst.msk [vmem:[#allocation2 + $0x54] sm:$0xf] %vm253_vm6, %v252_v9  ;;  %v1698_v11 = vld [vmem:[%s2050_s27 + $0x38] sm:$0xf]  ;;  %v364_v27 = vsel %vm2101_vm5, %v2305_v63, %v2286_v57  ;;  %v950_v8 = vor.u32 %v2334_v32, %v2332_v31 }
  0x4b   : > { %v608_v6 = vsel %vm2101_vm5, %v603_v39, %v607_v28  ;;  %v617_v41 = vrot.slane %v616_v43, 4  ;;  %v1699_v12 = vld [vmem:[%s2050_s27 + $0x3c] sm:$0x1]  ;;  %v680_v14 = vshrl.u32 %v1698_v11, 16  ;;  %v683_v15 = vshll.u32 %v1698_v11, 16 }
  0x4c   : > { %497 = vrot.lane.b32.xlu0 %v472_v7, %s1987_s30  ;;  %715 = vst.msk [vmem:[#allocation2 + $0x4] sm:$0xf] %vm253_vm6, %v608_v6  ;;  %v689_v16 = vshll.u32 %v1699_v12, 16  ;;  %v1700_v18 = vld [vmem:[%s2050_s27 + $0x40] sm:$0xf]  ;;  %v2374_v48 = vrot.slane %v958_v22, 4  ;;  %v778_v11 = vsel %vm2030_vm2, %v1723_v36, %v777_v55 }
  0x4d   : > { %v622_v7 = vsel %vm2101_vm5, %v617_v41, %v621_v44  ;;  %v1701_v35 = vld [vmem:[%s2050_s27 + $0x44] sm:$0x1]  ;;  %v682_v19 = vrot.slane %v680_v14, 4  ;;  %v685_v20 = vrot.slane %v683_v15, 5  ;;  %v694_v21 = vshrl.u32 %v1700_v18, 16 }
  0x4e   : > { %499 = vrot.lane.b32.xlu1 %v476_v58, %s1987_s30  ;;  %v251_v58 = vld [vmem:[%s2050_s27 + $0x30] sm:$0xf]  ;;  %716 = vst.msk [vmem:[#allocation2 + $0x10] sm:$0xf] %vm253_vm6, %v622_v7  ;;  %v703_v22 = vshll.u32 %v1701_v35, 16  ;;  %v691_v40 = vrot.slane %v689_v16, 5  ;;  %v480_v16 = vsel %vm2030_vm2, %v1674_v56, %v479_v1 }
  0x4f   : > { %260 = vst.msk [vmem:[#allocation2 + $0x48] sm:$0xf] %vm253_vm6, %v251_v58  ;;  %v247_v25 = vld [vmem:[%s2050_s27 + $0x10] sm:$0xf]  ;;  %v686_v52 = vor.u32 %v685_v20, %v682_v19  ;;  %v696_v37 = vrot.slane %v694_v21, 4  ;;  %v2426_v47 = vrot.slane %v961_v23, 5 }
  0x50   : > { %843 = vrot.lane.b32.xlu0 %v1728_v17, %s1987_s30  ;;  %v942_v17 = vsel %vm2101_vm5, %v2271_v49, %v2246_v38  ;;  %v774_v38 = vsel %vm2030_vm2, %v1722_v53, %v773_v59  ;;  %v697_v49 = vshll.u32 %v1700_v18, 16  ;;  %256 = vst.msk [vmem:[#allocation2 + $0x18] sm:$0xf] %vm253_vm6, %v247_v25  ;;  %v1690_v33 = vld [vmem:[%s2050_s27 + $0x18] sm:$0xf]  ;;  %v705_v28 = vrot.slane %v703_v22, 5 }
  0x51   : > { %v1691_v53 = vld [vmem:[%s2050_s27 + $0x1c] sm:$0x1]  ;;  %v624_v29 = vshrl.u32 %v1690_v33, 16  ;;  %v627_v30 = vshll.u32 %v1690_v33, 16  ;;  %v687_v39 = vrot.slane %v686_v52, 4 }
  0x52   : > { %845 = vrot.lane.b32.xlu1 %v1729_v26, %s1987_s30  ;;  %v248_v26 = vld [vmem:[%s2050_s27 + $0x18] sm:$0xf]  ;;  %v699_v59 = vrot.slane %v697_v49, 5  ;;  %v633_v43 = vshll.u32 %v1691_v53, 16  ;;  %v1693_v57 = vld [vmem:[%s2050_s27 + $0x24] sm:$0x1] }
  0x53   : > { %257 = vst.msk [vmem:[#allocation2 + $0x24] sm:$0xf] %vm253_vm6, %v248_v26  ;;  %v629_v6 = vrot.slane %v627_v30, 5  ;;  %v647_v41 = vshll.u32 %v1693_v57, 16  ;;  %v692_v7 = vsel %vm2101_vm5, %v687_v39, %v691_v40  ;;  %v1750_v45 = vld [vmem:[%s2050_s27 + $0x10] sm:$0xe] }
  0x54   : > { %550 = vrot.lane.b32.xlu0 %v1680_v34, %s1989_s17  ;;  %v1692_v34 = vld [vmem:[%s2050_s27 + $0x20] sm:$0xf]  ;;  %v700_v51 = vor.u32 %v699_v59, %v696_v37  ;;  %v635_v58 = vrot.slane %v633_v43, 5  ;;  %721 = vst.msk [vmem:[#allocation2 + $0x4c] sm:$0xf] %vm253_vm6, %v692_v7  ;;  %v1766_v19 = vrot.slane %v1750_v45, 9  ;;  %v964_v43 = vor.u32 %v2426_v47, %v2374_v48 }
  0x55   : > { %v638_v63 = vshrl.u32 %v1692_v34, 16  ;;  %v641_v44 = vshll.u32 %v1692_v34, 16  ;;  %v649_v15 = vrot.slane %v647_v41, 5  ;;  %v1752_v36 = vld [vmem:[%s2050_s27 + $0x18] sm:$0xe]  ;;  %v951_v39 = vrot.slane %v950_v8, 4 }
  0x56   : > { %552 = vrot.lane.b32.xlu1 %v1681_v62, %s1989_s17  ;;  %v626_v62 = vrot.slane %v624_v29, 4  ;;  %v701_v12 = vrot.slane %v700_v51, 4  ;;  %v1753_v35 = vld [vmem:[%s2050_s27 + $0x1c] sm:$0x1]  ;;  %v1767_v1 = vrot.slane %v1752_v36, 9 }
  0x57   : > { %v640_v9 = vrot.slane %v638_v63, 4  ;;  %v1069_v20 = vrot.slane %v1753_v35, 5  ;;  %v1754_v21 = vld [vmem:[%s2050_s27 + $0x20] sm:$0xe]  ;;  %v1755_v22 = vld [vmem:[%s2050_s27 + $0x24] sm:$0x1] }
  0x58   : > { %1003 = vrot.lane.b32.xlu0 %v928_v10, %s1989_s17  ;;  %v643_v10 = vrot.slane %v641_v44, 5  ;;  %v630_v14 = vor.u32 %v629_v6, %v626_v62  ;;  %v706_v55 = vsel %vm2101_vm5, %v701_v12, %v705_v28  ;;  %v1756_v61 = vld [vmem:[%s2050_s27 + $0x28] sm:$0xe]  ;;  %v1757_v25 = vld [vmem:[%s2050_s27 + $0x2c] sm:$0x1]  ;;  %v1073_v31 = vrot.slane %v1755_v22, 5 }
  0x59   : > { %722 = vst.msk [vmem:[#allocation2 + $0x58] sm:$0xf] %vm253_vm6, %v706_v55  ;;  %v249_v32 = vld [vmem:[%s2050_s27 + $0x20] sm:$0xf]  ;;  %v1758_v26 = vld [vmem:[%s2050_s27 + $0x30] sm:$0xe] }
  0x5a   : > { %1005 = vrot.lane.b32.xlu1 %v942_v17, %s1989_s17  ;;  %v644_v46 = vor.u32 %v643_v10, %v640_v9  ;;  %v1751_v17 = vld [vmem:[%s2050_s27 + $0x14] sm:$0x1]  ;;  %v631_v18 = vrot.slane %v630_v14, 4  ;;  %v1769_v52 = vrot.slane %v1756_v61, 9  ;;  %v1077_v40 = vrot.slane %v1757_v25, 5 }
  0x5b   : > { %v1065_v54 = vrot.slane %v1751_v17, 5  ;;  %258 = vst.msk [vmem:[#allocation2 + $0x30] sm:$0xf] %vm253_vm6, %v249_v32  ;;  %v1759_v37 = vld [vmem:[%s2050_s27 + $0x34] sm:$0x1]  ;;  %v1770_v28 = vrot.slane %v1758_v26, 9 }
  0x5c   : > { %401 = vrot.lane.b32.xlu0 %v350_v24, %s1988_s4  ;;  %v645_v56 = vrot.slane %v644_v46, 4  ;;  %v484_v24 = vsel %vm2030_vm2, %v1675_v4, %v483_v5  ;;  %v636_v23 = vsel %vm2101_vm5, %v631_v18, %v635_v58  ;;  %v1070_v4 = vsel %vm2030_vm2, %v1767_v1, %v1069_v20  ;;  %v1760_v33 = vld [vmem:[%s2050_s27 + $0x38] sm:$0xe]  ;;  %v1761_v59 = vld [vmem:[%s2050_s27 + $0x3c] sm:$0x1] }
  0x5d   : > { %v1066_v49 = vsel %vm2030_vm2, %v1766_v19, %v1065_v54  ;;  %717 = vst.msk [vmem:[#allocation2 + $0x1c] sm:$0xf] %vm253_vm6, %v636_v23  ;;  %v1768_v5 = vrot.slane %v1754_v21, 9  ;;  %1104 = vst.msk [vmem:[#allocation2 + $0x14] sm:$0xf] %vm253_vm6, %v1070_v4  ;;  %v1081_v29 = vrot.slane %v1759_v37, 5  ;;  %v1078_v57 = vsel %vm2030_vm2, %v1769_v52, %v1077_v40 }
  0x5e   : > { %403 = vrot.lane.b32.xlu1 %v364_v27, %s1988_s4  ;;  %v650_v60 = vsel %vm2101_vm5, %v645_v56, %v649_v15  ;;  %1103 = vst.msk [vmem:[#allocation2 + $0x8] sm:$0xf] %vm253_vm6, %v1066_v49  ;;  %v1731_v27 = vld [vmem:[%s2050_s27 + $0x38] sm:$0xf]  ;;  %v1771_v30 = vrot.slane %v1760_v33, 9  ;;  %v1085_v63 = vrot.slane %v1761_v59, 5  ;;  %v956_v19 = vsel %vm2101_vm5, %v951_v39, %v2342_v2 }
  0x5f   : > { %718 = vst.msk [vmem:[#allocation2 + $0x28] sm:$0xf] %vm253_vm6, %v650_v60  ;;  %v1074_v53 = vsel %vm2030_vm2, %v1768_v5, %v1073_v31  ;;  %v1682_v34 = vld [vmem:[%s2050_s27 + $0x28] sm:$0xf]  ;;  %v1762_v51 = vld [vmem:[%s2050_s27 + $0x40] sm:$0xe]  ;;  %v1082_v62 = vsel %vm2030_vm2, %v1770_v28, %v1081_v29 }
  0x60   : > { %795 = vrot.lane.b32.xlu0 %v774_v38, %s1988_s4  ;;  %v1730_v38 = vld [vmem:[%s2050_s27 + $0x30] sm:$0xf]  ;;  %1105 = vst.msk [vmem:[#allocation2 + $0x20] sm:$0xf] %vm253_vm6, %v1074_v53  ;;  %v250_v44 = vld [vmem:[%s2050_s27 + $0x28] sm:$0xf]  ;;  %v1086_v58 = vsel %vm2030_vm2, %v1771_v30, %v1085_v63 }
  0x61   : > { %1106 = vst.msk [vmem:[#allocation2 + $0x2c] sm:$0xf] %vm253_vm6, %v1078_v57  ;;  %259 = vst.msk [vmem:[#allocation2 + $0x3c] sm:$0xf] %vm253_vm6, %v250_v44  ;;  %v1763_v48 = vld [vmem:[%s2050_s27 + $0x44] sm:$0x1] }
  0x62   : > { %797 = vrot.lane.b32.xlu1 %v778_v11, %s1988_s4  ;;  %v1764_v6 = vld [vmem:[%s2050_s27 + $0x48] sm:$0xe]  ;;  %v1765_v41 = vld [vmem:[%s2050_s27 + $0x4c] sm:$0x1]  ;;  %v1683_v7 = vld [vmem:[%s2050_s27 + $0x30] sm:$0xf] }
  0x63   : > { %1107 = vst.msk [vmem:[#allocation2 + $0x38] sm:$0xf] %vm253_vm6, %v1082_v62  ;;  %v1772_v9 = vrot.slane %v1762_v51, 9  ;;  %v1089_v10 = vrot.slane %v1763_v48, 5  ;;  %v1773_v11 = vrot.slane %v1764_v6, 9  ;;  %v969_v14 = vrot.slane %v967_v13, 5 }
  0x64   : > { %501 = vrot.lane.b32.xlu0 %v480_v16, %s1987_s30  ;;  %v1694_v12 = vld [vmem:[%s2050_s27 + $0x28] sm:$0xf]  ;;  %1108 = vst.msk [vmem:[#allocation2 + $0x44] sm:$0xf] %vm253_vm6, %v1086_v58  ;;  %v1093_v15 = vrot.slane %v1765_v41, 5  ;;  %v965_v17 = vrot.slane %v964_v43, 4 }
  0x65   : > { %v1695_v16 = vld [vmem:[%s2050_s27 + $0x2c] sm:$0x1]  ;;  %v652_v46 = vshrl.u32 %v1694_v12, 16  ;;  %v655_v45 = vshll.u32 %v1694_v12, 16  ;;  %v1090_v36 = vsel %vm2030_vm2, %v1772_v9, %v1089_v10  ;;  %v1696_v18 = vld [vmem:[%s2050_s27 + $0x30] sm:$0xf] }
  0x66   : > { %503 = vrot.lane.b32.xlu1 %v484_v24, %s1987_s30  ;;  %v661_v55 = vshll.u32 %v1695_v16, 16  ;;  %v1094_v35 = vsel %vm2030_vm2, %v1773_v11, %v1093_v15  ;;  %1109 = vst.msk [vmem:[#allocation2 + $0x50] sm:$0xf] %vm253_vm6, %v1090_v36  ;;  %v1697_v54 = vld [vmem:[%s2050_s27 + $0x34] sm:$0x1]  ;;  %v666_v47 = vshrl.u32 %v1696_v18, 16  ;;  %v970_v0 = vsel %vm2101_vm5, %v965_v17, %v969_v14 }
  0x67   : > { %v654_v3 = vrot.slane %v652_v46, 4  ;;  %v657_v13 = vrot.slane %v655_v45, 5  ;;  %1110 = vst.msk [vmem:[#allocation2 + $0x5c] sm:$0xf] %vm253_vm6, %v1094_v35  ;;  %v669_v56 = vshll.u32 %v1696_v18, 16  ;;  %v675_v21 = vshll.u32 %v1697_v54, 16 }
  0x68   : > { %847 = vrot.lane.b32.xlu0 %v1730_v38, %s1987_s30  ;;  %v663_v20 = vrot.slane %v661_v55, 5  ;;  %v668_v24 = vrot.slane %v666_v47, 4  ;;  %v1953_v11 = vld [vmem:[%s2605_s1 + $0x88] sm:$0xff]  }
  0x69   : > { %v658_v1 = vor.u32 %v657_v13, %v654_v3  ;;  %v671_v38 = vrot.slane %v669_v56, 5  ;;  %v677_v2 = vrot.slane %v675_v21, 5  ;;  %v1955_v16 = vld [vmem:[#allocation2 + $0x20] ss:$12 sps:$4 sm:$0xff]  }
  0x6a   : > { %849 = vrot.lane.b32.xlu1 %v1731_v27, %s1987_s30 }
  0x6b   : > { %v659_v8 = vrot.slane %v658_v1, 4  ;;  %v672_v23 = vor.u32 %v671_v38, %v668_v24  ;;  %v1956_v45 = vld [vmem:[#allocation2 + $0x38] ss:$12 sps:$4 sm:$0xff]  }
  0x6c   : > { %554 = vrot.lane.b32.xlu0 %v1682_v34, %s1989_s17 }
  0x6d   : > { %v664_v49 = vsel %vm2101_vm5, %v659_v8, %v663_v20  ;;  %v673_v22 = vrot.slane %v672_v23, 4 }
  0x6e   : > { %556 = vrot.lane.b32.xlu1 %v1683_v7, %s1989_s17  ;;  %719 = vst.msk [vmem:[#allocation2 + $0x34] sm:$0xf] %vm253_vm6, %v664_v49  ;;  %v1954_v7 = vld [vmem:[#allocation2 + $0x8] ss:$12 sps:$4 sm:$0xff]   ;;  %v1957_v55 = vld [vmem:[#allocation2 + $0x50] ss:$12 sps:$4 sm:$0xff]  }
  0x6f   : > { %v678_v61 = vsel %vm2101_vm5, %v673_v22, %v677_v2 }
  0x70   : > { %1007 = vrot.lane.b32.xlu0 %v956_v19, %s1989_s17  ;;  %720 = vst.msk [vmem:[#allocation2 + $0x40] sm:$0xf] %vm253_vm6, %v678_v61 }
  0x72   : > { %1009 = vrot.lane.b32.xlu1 %v970_v0, %s1989_s17 }
  0x85   : > { %v840_v25 = vpop.permute.xlu0 %839 }
  0x88   : > { %v788_v60 = vpop.permute.xlu1 %787 }
  0x89   : > { %811 = vst.msk [vmem:[#allocation2 + $0x4] sm:$0xf] %vm417_vm7, %v788_v60  ;;  %v494_v4 = vpop.permute.xlu0 %493 }
  0x8a   : > { %863 = vst.msk [vmem:[#allocation2 + $0x4] sm:$0xf] %vm517_vm8, %v840_v25 }
  0x8c   : > { %v790_v5 = vpop.permute.xlu1 %789 }
  0x8d   : > { %812 = vst.msk [vmem:[#allocation2 + $0x10] sm:$0xf] %vm417_vm7, %v790_v5  ;;  %v547_v31 = vpop.permute.xlu0 %546 }
  0x90   : > { %v496_v32 = vpop.permute.xlu1 %495 }
  0x92   : > { %v394_v26 = vpop.permute.xlu0 %393 }
  0x93   : > { %418 = vst.msk [vmem:[#allocation2] sm:$0xf] %vm417_vm7, %v394_v26 }
  0x94   : > { %518 = vst.msk [vmem:[#allocation2] sm:$0xf] %vm517_vm8, %v494_v4  ;;  %v842_v50 = vpop.permute.xlu1 %841 }
  0x95   : > { %571 = vst.msk [vmem:[#allocation2] sm:$0xf] %vm570_vm9, %v547_v31 }
  0x96   : > { %864 = vst.msk [vmem:[#allocation2 + $0x10] sm:$0xf] %vm517_vm8, %v842_v50  ;;  %v396_v27 = vpop.permute.xlu0 %395 }
  0x97   : > { %419 = vst.msk [vmem:[#allocation2 + $0xc] sm:$0xf] %vm417_vm7, %v396_v27 }
  0x98   : > { %519 = vst.msk [vmem:[#allocation2 + $0xc] sm:$0xf] %vm517_vm8, %v496_v32  ;;  %v549_v52 = vpop.permute.xlu1 %548 }
  0x99   : > { %572 = vst.msk [vmem:[#allocation2 + $0xc] sm:$0xf] %vm570_vm9, %v549_v52 }
  0x9a   : > { %v1000_v40 = vpop.permute.xlu0 %999 }
  0x9b   : > { %1023 = vst.msk [vmem:[#allocation2 + $0x4] sm:$0xf] %vm570_vm9, %v1000_v40 }
  0x9c   : > { %v1002_v37 = vpop.permute.xlu1 %1001 }
  0x9d   : > { %1024 = vst.msk [vmem:[#allocation2 + $0x10] sm:$0xf] %vm570_vm9, %v1002_v37  ;;  %v1774_v37 = vld [vmem:[%s2606_s2] ss:$0 sm:$0xff] }
  0x9e   : > { %v406_v33 = vpop.permute.xlu0 %405 }
  0x9f   : > { %424 = vst.msk [vmem:[#allocation2 + $0x48] sm:$0xf] %vm417_vm7, %v406_v33 }
  0xa0   : > { %v408_v53 = vpop.permute.xlu1 %407  ;;  %v1946_v29 = vld [vmem:[#allocation2] ss:$12 sps:$4 sm:$0xff]  }
  0xa1   : > { %425 = vst.msk [vmem:[#allocation2 + $0x54] sm:$0xf] %vm417_vm7, %v408_v53 }
  0xa2   : > { %v800_v59 = vpop.permute.xlu0 %799 }
  0xa3   : > { %817 = vst.msk [vmem:[#allocation2 + $0x4c] sm:$0xf] %vm417_vm7, %v800_v59 }
  0xa4   : > { %v802_v28 = vpop.permute.xlu1 %801  ;;  %v1948_v30 = vld [vmem:[#allocation2 + $0x4] ss:$12 sps:$4 sm:$0xff]  }
  0xa5   : > { %818 = vst.msk [vmem:[#allocation2 + $0x58] sm:$0xf] %vm417_vm7, %v802_v28  ;;  %1383 = vmatprep.mubr.bf16.mxu0 %v1948_v30 }
  0xa6   : > { %v506_v34 = vpop.permute.xlu0 %505  ;;  %1384 = vmatmul.mubr.bf16.vlgmr.msra.gmra.mrb[0].mxu0 %v1946_v29 }
  0xa7   : > { %524 = vst.msk [vmem:[#allocation2 + $0x48] sm:$0xf] %vm517_vm8, %v506_v34 }
  0xa8   : > { %v508_v39 = vpop.permute.xlu1 %507 }
  0xa9   : > { %525 = vst.msk [vmem:[#allocation2 + $0x54] sm:$0xf] %vm517_vm8, %v508_v39 }
  0xaa   : > { %v852_v43 = vpop.permute.xlu0 %851 }
  0xab   : > { %869 = vst.msk [vmem:[#allocation2 + $0x4c] sm:$0xf] %vm517_vm8, %v852_v43 }
  0xac   : > { %v854_v57 = vpop.permute.xlu1 %853 }
  0xad   : > { %870 = vst.msk [vmem:[#allocation2 + $0x58] sm:$0xf] %vm517_vm8, %v854_v57 }
  0xae   : > { %v559_v63 = vpop.permute.xlu0 %558 }
  0xaf   : > { %577 = vst.msk [vmem:[#allocation2 + $0x48] sm:$0xf] %vm570_vm9, %v559_v63 }
  0xb0   : > { %v561_v44 = vpop.permute.xlu1 %560 }
  0xb1   : > { %578 = vst.msk [vmem:[#allocation2 + $0x54] sm:$0xf] %vm570_vm9, %v561_v44 }
  0xb2   : > { %v1012_v51 = vpop.permute.xlu0 %1011 }
  0xb3   : > { %1029 = vst.msk [vmem:[#allocation2 + $0x4c] sm:$0xf] %vm570_vm9, %v1012_v51 }
  0xb4   : > { %v1014_v62 = vpop.permute.xlu1 %1013 }
  0xb5   : > { %1030 = vst.msk [vmem:[#allocation2 + $0x58] sm:$0xf] %vm570_vm9, %v1014_v62 }
  0xb6   : > { %v398_v48 = vpop.permute.xlu0 %397 }
  0xb7   : > { %420 = vst.msk [vmem:[#allocation2 + $0x18] sm:$0xf] %vm417_vm7, %v398_v48 }
  0xb8   : > { %v400_v6 = vpop.permute.xlu1 %399  ;;  %v1949_v9 = vld [vmem:[#allocation2 + $0x48] ss:$12 sps:$4 sm:$0xff]  }
  0xb9   : > { %421 = vst.msk [vmem:[#allocation2 + $0x24] sm:$0xf] %vm417_vm7, %v400_v6 }
  0xba   : > { %v792_v41 = vpop.permute.xlu0 %791 }
  0xbb   : > { %813 = vst.msk [vmem:[#allocation2 + $0x1c] sm:$0xf] %vm417_vm7, %v792_v41 }
  0xbc   : > { %v794_v58 = vpop.permute.xlu1 %793  ;;  %v1951_v10 = vld [vmem:[#allocation2 + $0x4c] ss:$12 sps:$4 sm:$0xff]  }
  0xbd   : > { %814 = vst.msk [vmem:[#allocation2 + $0x28] sm:$0xf] %vm417_vm7, %v794_v58  ;;  %1407 = vmatprep.mubr.bf16.mxu1 %v1951_v10 }
  0xbe   : > { %v498_v12 = vpop.permute.xlu0 %497  ;;  %1408 = vmatmul.mubr.bf16.vlgmr.msra.gmra.mrb[0].mxu1 %v1949_v9 }
  0xbf   : > { %520 = vst.msk [vmem:[#allocation2 + $0x18] sm:$0xf] %vm517_vm8, %v498_v12  ;;  %1875 = vmatpush3.bf16.msra.mxu1 %v2254_v42  ;;  %1878 = vmatprep.mubr.msk.bf16.mxu1 %vm1338_vm10, %v1954_v7 }
  0xc0   : > { %v500_v14 = vpop.permute.xlu1 %499  ;;  %1876 = vmatprep.subr.bf16.mxu1 %v1953_v11 }
  0xc1   : > { %521 = vst.msk [vmem:[#allocation2 + $0x24] sm:$0xf] %vm517_vm8, %v500_v14 }
  0xc2   : > { %v844_v15 = vpop.permute.xlu0 %843 }
  0xc3   : > { %865 = vst.msk [vmem:[#allocation2 + $0x1c] sm:$0xf] %vm517_vm8, %v844_v15  ;;  %1877 = vmatpush3.bf16.msra.mxu1 %v1953_v11 }
  0xc4   : > { %v846_v46 = vpop.permute.xlu1 %845 }
  0xc5   : > { %866 = vst.msk [vmem:[#allocation2 + $0x28] sm:$0xf] %vm517_vm8, %v846_v46 }
  0xc6   : > { %v551_v17 = vpop.permute.xlu0 %550  ;;  %1879 = vmatmul.mubr.msk.bf16.vlgmr.msra.gmra.mrb[4].mxu1 %vm1338_vm10, %v1955_v16 }
  0xc7   : > { %573 = vst.msk [vmem:[#allocation2 + $0x18] sm:$0xf] %vm570_vm9, %v551_v17  ;;  %1882 = vmatprep.mubr.msk.bf16.mxu1 %vm1338_vm10, %v1956_v45 }
  0xc8   : > { %v553_v42 = vpop.permute.xlu1 %552 }
  0xc9   : > { %574 = vst.msk [vmem:[#allocation2 + $0x24] sm:$0xf] %vm570_vm9, %v553_v42 }
  0xca   : > { %v1004_v36 = vpop.permute.xlu0 %1003 }
  0xcb   : > { %1025 = vst.msk [vmem:[#allocation2 + $0x1c] sm:$0xf] %vm570_vm9, %v1004_v36 }
  0xcc   : > { %v1006_v18 = vpop.permute.xlu1 %1005 }
  0xcd   : > { %1026 = vst.msk [vmem:[#allocation2 + $0x28] sm:$0xf] %vm570_vm9, %v1006_v18 }
  0xce   : > { %v402_v35 = vpop.permute.xlu0 %401  ;;  %1883 = vmatmul.mubr.msk.bf16.gmra.mrb[8].mxu1 %vm1338_vm10, %v1957_v55 }
  0xcf   : > { %422 = vst.msk [vmem:[#allocation2 + $0x30] sm:$0xf] %vm417_vm7, %v402_v35 }
  0xd0   : > { %v404_v3 = vpop.permute.xlu1 %403 }
  0xd1   : > { %423 = vst.msk [vmem:[#allocation2 + $0x3c] sm:$0xf] %vm417_vm7, %v404_v3 }
  0xd2   : > { %v796_v13 = vpop.permute.xlu0 %795  ;;  %v1115_v54 = vld [vmem:[#allocation2 + $0x18] sm:$0xff] }
  0xd3   : > { %815 = vst.msk [vmem:[#allocation2 + $0x34] sm:$0xf] %vm417_vm7, %v796_v13 }
  0xd4   : > { %v798_v19 = vpop.permute.xlu1 %797  ;;  %v1117_v47 = vld [vmem:[#allocation2 + $0x24] sm:$0xff] }
  0xd5   : > { %v1958_v56 = vld [vmem:[#allocation2 + $0x1c] ss:$12 sps:$4 sm:$0xff]   ;;  %816 = vst.msk [vmem:[#allocation2 + $0x40] sm:$0xf] %vm417_vm7, %v798_v19  ;;  %v1778_v1 = vcombine.low %v1115_v54, %v1117_v47 }
  0xd6   : > { %v502_v20 = vpop.permute.xlu0 %501  ;;  %1391 = vmatprep.mubr.bf16.mxu0 %v1958_v56 }
  0xd7   : > { %522 = vst.msk [vmem:[#allocation2 + $0x30] sm:$0xf] %vm517_vm8, %v502_v20  ;;  %1392 = vmatmul.mubr.bf16.gmra.mrb[4].mxu0 %v1778_v1 }
  0xd8   : > { %v504_v21 = vpop.permute.xlu1 %503 }
  0xd9   : > { %523 = vst.msk [vmem:[#allocation2 + $0x3c] sm:$0xf] %vm517_vm8, %v504_v21 }
  0xda   : > { %v848_v0 = vpop.permute.xlu0 %847 }
  0xdb   : > { %867 = vst.msk [vmem:[#allocation2 + $0x34] sm:$0xf] %vm517_vm8, %v848_v0 }
  0xdc   : > { %v850_v24 = vpop.permute.xlu1 %849 }
  0xdd   : > { %868 = vst.msk [vmem:[#allocation2 + $0x40] sm:$0xf] %vm517_vm8, %v850_v24 }
  0xde   : > { %v555_v38 = vpop.permute.xlu0 %554 }
  0xdf   : > { %575 = vst.msk [vmem:[#allocation2 + $0x30] sm:$0xf] %vm570_vm9, %v555_v38 }
  0xe0   : > { %v557_v8 = vpop.permute.xlu1 %556 }
  0xe1   : > { %576 = vst.msk [vmem:[#allocation2 + $0x3c] sm:$0xf] %vm570_vm9, %v557_v8 }
  0xe2   : > { %v1008_v23 = vpop.permute.xlu0 %1007 }
  0xe3   : > { %1027 = vst.msk [vmem:[#allocation2 + $0x34] sm:$0xf] %vm570_vm9, %v1008_v23 }
  0xe4   : > { %v1010_v2 = vpop.permute.xlu1 %1009 }
  0xe5   : > { %1028 = vst.msk [vmem:[#allocation2 + $0x40] sm:$0xf] %vm570_vm9, %v1010_v2 }
  0xe8   : > { %v1962_v22 = vld [vmem:[#allocation2 + $0x30] ss:$12 sps:$4 sm:$0xff]  }
  0xec   : > { %v1960_v49 = vld [vmem:[#allocation2 + $0x34] ss:$12 sps:$4 sm:$0xff]  }
  0xed   : > { %1399 = vmatprep.mubr.bf16.mxu0 %v1960_v49 }
  0xee   : > { %1400 = vmatmul.mubr.bf16.gmra.mrb[8].mxu0 %v1962_v22 }
 0x179   : > { %v1844_v61 = vpop.f32.mrb[0].mxu0 }
 0x17a   : > { %v1845_v25 = vpop.f32.mrb[1].mxu0 }
 0x17b   : > { %v1846_v60 = vadd.f32 %v1845_v25, %v1844_v61  ;;  %v1847_v4 = vpop.f32.mrb[2].mxu0 }
 0x17c   : > { %v1848_v5 = vpop.f32.mrb[3].mxu0 }
 0x17d   : > { %v1849_v31 = vadd.f32 %v1848_v5, %v1847_v4  ;;  %v1386_v53 = vadd.f32 %v1846_v60, %v1774_v37 }
 0x17f   : > { %v1389_v30 = vadd.f32 %v1849_v31, %v1774_v37 }
 0x191   : > { %v1862_v32 = vpop.f32.mrb[0].mxu1 }
 0x192   : > { %v1863_v26 = vpop.f32.mrb[1].mxu1 }
 0x193   : > { %v1864_v50 = vadd.f32 %v1863_v26, %v1862_v32  ;;  %v1865_v27 = vpop.f32.mrb[2].mxu1 }
 0x194   : > { %v1866_v52 = vpop.f32.mrb[3].mxu1 }
 0x195   : > { %v1867_v40 = vadd.f32 %v1866_v52, %v1865_v27  ;;  %v1410_v44 = vadd.f32 %v1864_v50, %v1774_v37 }
 0x197   : > { %v1413_v41 = vadd.f32 %v1867_v40, %v1774_v37 }
 0x199   : > { %v1880_v33 = vpop.f32.mrb[4].mxu1 }
 0x19a   : > { %v1450_v59 = vpop.f32.mrb[5].mxu1 }
 0x19b   : > { %v1451_v28 = vadd.f32 %v1450_v59, %v1386_v53  ;;  %v1881_v29 = vpop.f32.mrb[6].mxu1 }
 0x19c   : > { %v1453_v34 = vpop.f32.mrb[7].mxu1 }
 0x19d   : > { %v1481_v39 = vmax.f32 %v1451_v28, 0.0  ;;  %v1454_v43 = vadd.f32 %v1453_v34, %v1389_v30 }
 0x19f   : > { %v1820_v57 = vpack.c.bf16 %v1481_v39, %v1481_v39  ;;  %v1482_v63 = vmax.f32 %v1454_v43, 0.0 }
 0x1a1   : > { %1521 = vst.msk [vmem:[%s2577_s18] sm:$0xf] %vm253_vm6, %v1820_v57  ;;  %v1821_v51 = vpack.c.bf16 %v1482_v63, %v1482_v63  ;;  %v1884_v62 = vpop.f32.mrb[8].mxu1 }
 0x1a2   : > { %v1475_v48 = vadd.f32 %v1884_v62, %v1410_v44  ;;  %v1466_v6 = vpop.f32.mrb[9].mxu1 }
 0x1a3   : > { %1522 = vst.msk [vmem:[%s2577_s18 + $0x4] sm:$0xf] %vm253_vm6, %v1821_v51  ;;  %v1885_v7 = vpop.f32.mrb[10].mxu1 }
 0x1a4   : > { %v1487_v58 = vmax.f32 %v1475_v48, 0.0  ;;  %v1478_v9 = vadd.f32 %v1885_v7, %v1413_v41  ;;  %v1469_v10 = vpop.f32.mrb[11].mxu1 }
 0x1a6   : > { %v1826_v11 = vpack.c.bf16 %v1487_v58, %v1487_v58  ;;  %v1488_v12 = vmax.f32 %v1478_v9, 0.0 }
 0x1a8   : > { %1527 = vst.msk [vmem:[%s2577_s18 + $0x18] sm:$0xf] %vm253_vm6, %v1826_v11  ;;  %v1827_v14 = vpack.c.bf16 %v1488_v12, %v1488_v12 }
 0x1aa   : > { %v1850_v15 = vpop.f32.mrb[4].mxu0  ;;  %1528 = vst.msk [vmem:[%s2577_s18 + $0x1c] sm:$0xf] %vm253_vm6, %v1827_v14 }
 0x1ab   : > { %v1851_v16 = vpop.f32.mrb[5].mxu0 }
 0x1ac   : > { %v1852_v46 = vadd.f32 %v1851_v16, %v1850_v15  ;;  %v1853_v45 = vpop.f32.mrb[6].mxu0 }
 0x1ad   : > { %v1854_v17 = vpop.f32.mrb[7].mxu0 }
 0x1ae   : > { %v1394_v42 = vadd.f32 %v1852_v46, %v1774_v37  ;;  %v1855_v36 = vadd.f32 %v1854_v17, %v1853_v45 }
 0x1b0   : > { %v1459_v55 = vadd.f32 %v1880_v33, %v1394_v42  ;;  %v1397_v18 = vadd.f32 %v1855_v36, %v1774_v37 }
 0x1b2   : > { %v1483_v35 = vmax.f32 %v1459_v55, 0.0  ;;  %v1462_v3 = vadd.f32 %v1881_v29, %v1397_v18 }
 0x1b4   : > { %v1822_v13 = vpack.c.bf16 %v1483_v35, %v1483_v35  ;;  %v1484_v19 = vmax.f32 %v1462_v3, 0.0 }
 0x1b6   : > { %1523 = vst.msk [vmem:[%s2577_s18 + $0x8] sm:$0xf] %vm253_vm6, %v1822_v13  ;;  %v1823_v54 = vpack.c.bf16 %v1484_v19, %v1484_v19 }
 0x1b8   : > { %1524 = vst.msk [vmem:[%s2577_s18 + $0xc] sm:$0xf] %vm253_vm6, %v1823_v54 }
 0x1c1   : > { %v1856_v47 = vpop.f32.mrb[8].mxu0 }
 0x1c2   : > { %v1857_v56 = vpop.f32.mrb[9].mxu0 }
 0x1c3   : > { %v1858_v1 = vadd.f32 %v1857_v56, %v1856_v47  ;;  %v1859_v20 = vpop.f32.mrb[10].mxu0 }
 0x1c4   : > { %v1860_v21 = vpop.f32.mrb[11].mxu0 }
 0x1c5   : > { %v1402_v0 = vadd.f32 %v1858_v1, %v1774_v37  ;;  %v1861_v24 = vadd.f32 %v1860_v21, %v1859_v20 }
 0x1c7   : > { %v1467_v38 = vadd.f32 %v1466_v6, %v1402_v0  ;;  %v1405_v8 = vadd.f32 %v1861_v24, %v1774_v37 }
 0x1c9   : > { %v1485_v23 = vmax.f32 %v1467_v38, 0.0  ;;  %v1470_v2 = vadd.f32 %v1469_v10, %v1405_v8 }
 0x1cb   : > { %v1824_v49 = vpack.c.bf16 %v1485_v23, %v1485_v23  ;;  %v1486_v22 = vmax.f32 %v1470_v2, 0.0 }
 0x1cd   : > { %1525 = vst.msk [vmem:[%s2577_s18 + $0x10] sm:$0xf] %vm253_vm6, %v1824_v49  ;;  %v1825_v61 = vpack.c.bf16 %v1486_v22, %v1486_v22 }
 0x1cf   : > { %1526 = vst.msk [vmem:[%s2577_s18 + $0x14] sm:$0xf] %vm253_vm6, %v1825_v61 }
 0x1d0 PF: > { %s13_s14 = sadd.s32 1, %s1985_s14   ;;  %s2612_s12 = smov %s1981_s13 }
 0x1d1   : > { %p10_p5 = scmp.ge.s32.totalorder %s13_s14, 4   ;;  %s2613_s13 = smov %s2615_s15 }
 0x1d3   :  { %12 = sbr.rel (!%p10_p5) target bundleno = 2 (0x2), region = 71 }

</bundles_post_ra>
